<compile_context>
chip_gen: v6e
topology: v6e:2x2x1
jax: 0.10.0
libtpu: 0.0.40
codegen_flags: <defaults>
</compile_context>

<pallas_src>
import jax
import jax.numpy as jnp
from jax.experimental import pallas as pl
from jax.experimental.pallas import tpu as pltpu

NUM_I = 64
NUM_H = 256
NUM_O = 64
NUM_O_PAD = 128   # lane-dense output width (>= 128 lanes)


def mlp_kernel(x_ref, w1_ref, b1_ref, w2_ref, b2_ref, w3_ref, b3_ref, o_ref):
    # x tile and weights are bf16; matmuls accumulate in f32 on the MXU.
    # Bias-add / ReLU stay in f32 (no bf16 VALU dependence).
    x = x_ref[...]
    h1 = jnp.dot(x, w1_ref[...], preferred_element_type=jnp.float32)
    h1 = jnp.maximum(h1 + b1_ref[...], 0.0)
    h2 = jnp.dot(h1.astype(jnp.bfloat16), w2_ref[...],
                 preferred_element_type=jnp.float32)
    h2 = jnp.maximum(h2 + b2_ref[...], 0.0)
    out = jnp.dot(h2.astype(jnp.bfloat16), w3_ref[...],
                  preferred_element_type=jnp.float32)
    o_ref[...] = (out + b3_ref[...]).astype(o_ref.dtype)


def _pallas_mlp(x_pad, kp, *, tile_b, single_buffer_weights):
    """x_pad: [B_pad, NUM_I] bf16 (B_pad % tile_b == 0). Returns [B_pad, NUM_O_PAD] f32."""
    B_pad = x_pad.shape[0]
    grid = (B_pad // tile_b,)

    if single_buffer_weights:
        def const_spec(shape):
            # Block index is constant across the grid -> no double buffering needed.
            return pl.BlockSpec(shape, lambda i: (0, 0), pipeline_mode=pl.Buffered(1))
    else:
        def const_spec(shape):
            return pl.BlockSpec(shape, lambda i: (0, 0))

    flops = 2 * B_pad * (NUM_I * NUM_H + NUM_H * NUM_H + NUM_H * NUM_O_PAD)
    bytes_accessed = (
        x_pad.size * x_pad.dtype.itemsize                      # x (bf16)
        + B_pad * NUM_O_PAD * 4                                 # out (f32)
        + (NUM_I * NUM_H + NUM_H * NUM_H + NUM_H * NUM_O_PAD) * 2  # weights (bf16)
        + (NUM_H + NUM_H + NUM_O_PAD) * 4                       # biases (f32)
    )

    return pl.pallas_call(
        mlp_kernel,
        out_shape=jax.ShapeDtypeStruct((B_pad, NUM_O_PAD), jnp.float32),
        grid_spec=pl.GridSpec(
            grid=grid,
            in_specs=[
                pl.BlockSpec((tile_b, NUM_I), lambda i: (i, 0)),   # x tile (streamed)
                const_spec((NUM_I, NUM_H)),                        # w1 (resident)
                const_spec((1, NUM_H)),                            # b1
                const_spec((NUM_H, NUM_H)),                        # w2
                const_spec((1, NUM_H)),                            # b2
                const_spec((NUM_H, NUM_O_PAD)),                    # w3 (lane-padded)
                const_spec((1, NUM_O_PAD)),                        # b3 (lane-padded)
            ],
            out_specs=pl.BlockSpec((tile_b, NUM_O_PAD), lambda i: (i, 0)),
        ),
        compiler_params=pltpu.CompilerParams(
            dimension_semantics=("parallel",),
        ),
        cost_estimate=pl.CostEstimate(
            flops=flops, transcendentals=0, bytes_accessed=bytes_accessed),
    )(x_pad, kp["w1"], kp["b1"], kp["w2"], kp["b2"], kp["w3"], kp["b3"])


def mlp_forward(x, kernel_params, *, tile_b=256):
    """x: [B, NUM_I] float32. kernel_params: output of prepare_kernel_params()."""
    B, Din = x.shape
    assert Din == NUM_I
    # tile_b: multiple of 256 covers v5e (128-row MXU) and v6e/v7x (256-row MXU);
    # sweep 256..1024 for large B.
    B_pad = ((B + tile_b - 1) // tile_b) * tile_b
    x_bf16 = x.astype(jnp.bfloat16)
    if B_pad != B:
        x_bf16 = jnp.pad(x_bf16, ((0, B_pad - B), (0, 0)))

    try:
        out = _pallas_mlp(x_bf16, kernel_params, tile_b=tile_b,
                          single_buffer_weights=True)
        out = jax.block_until_ready(out)
    except Exception:
        # Fallback if pl.Buffered(1) pipeline_mode is not supported by this build.
        out = _pallas_mlp(x_bf16, kernel_params, tile_b=tile_b,
                          single_buffer_weights=False)
        out = jax.block_until_ready(out)

    return out[:B, :NUM_O]


def init_params(key):
    """Deterministic init mirroring nn.Linear's U(-1/sqrt(fan_in), 1/sqrt(fan_in)).

    Weights stored as [in, out] (transpose of PyTorch's [out, in]) so the kernel
    computes x @ W + b directly. Biases as [1, out] rows. All f32 (master copy).
    """
    ks = jax.random.split(key, 6)

    def linear_init(kw, kb, fan_in, fan_out):
        bound = 1.0 / jnp.sqrt(float(fan_in))
        w = jax.random.uniform(kw, (fan_in, fan_out), jnp.float32, -bound, bound)
        b = jax.random.uniform(kb, (1, fan_out), jnp.float32, -bound, bound)
        return w, b

    w1, b1 = linear_init(ks[0], ks[1], NUM_I, NUM_H)
    w2, b2 = linear_init(ks[2], ks[3], NUM_H, NUM_H)
    w3, b3 = linear_init(ks[4], ks[5], NUM_H, NUM_O)
    return {"w1": w1, "b1": b1, "w2": w2, "b2": b2, "w3": w3, "b3": b3}


def prepare_kernel_params(p):
    """bf16 weights for the MXU, f32 biases; pad the last layer to 128 lanes."""
    w3_pad = jnp.pad(p["w3"], ((0, 0), (0, NUM_O_PAD - NUM_O)))
    b3_pad = jnp.pad(p["b3"], ((0, 0), (0, NUM_O_PAD - NUM_O)))
    return {
        "w1": p["w1"].astype(jnp.bfloat16),
        "b1": p["b1"],
        "w2": p["w2"].astype(jnp.bfloat16),
        "b2": p["b2"],
        "w3": w3_pad.astype(jnp.bfloat16),
        "b3": b3_pad,
    }


def mlp_reference_f32(x, p):
    h1 = jnp.maximum(x @ p["w1"] + p["b1"], 0.0)
    h2 = jnp.maximum(h1 @ p["w2"] + p["b2"], 0.0)
    return h2 @ p["w3"] + p["b3"]


def mlp_reference_bf16(x, p):
    # Mirrors kernel numerics: bf16 matmul operands, f32 accumulation, f32 bias/ReLU.
    w1 = p["w1"].astype(jnp.bfloat16)
    w2 = p["w2"].astype(jnp.bfloat16)
    w3 = p["w3"].astype(jnp.bfloat16)
    h1 = jnp.dot(x.astype(jnp.bfloat16), w1, preferred_element_type=jnp.float32) + p["b1"]
    h1 = jnp.maximum(h1, 0.0)
    h2 = jnp.dot(h1.astype(jnp.bfloat16), w2, preferred_element_type=jnp.float32) + p["b2"]
    h2 = jnp.maximum(h2, 0.0)
    return jnp.dot(h2.astype(jnp.bfloat16), w3, preferred_element_type=jnp.float32) + p["b3"]


if __name__ == "__main__":
    key = jax.random.PRNGKey(0)
    k_param, k_x = jax.random.split(key)

    params = init_params(k_param)
    kernel_params = prepare_kernel_params(params)

    batch = 500  # not a multiple of tile_b -> exercises the batch-padding path
    x = jax.random.normal(k_x, (batch, NUM_I), jnp.float32)

    out = mlp_forward(x, kernel_params, tile_b=256)
    out = jax.block_until_ready(out)

    ref_exact = mlp_reference_bf16(x, params)   # same numerics as the kernel
    ref_f32 = mlp_reference_f32(x, params)      # original f32 module semantics

    assert out.shape == (batch, NUM_O)
    assert jnp.allclose(out, ref_exact, atol=2e-3, rtol=2e-3), \
        "mismatch vs bf16-matched reference"
    assert jnp.allclose(out, ref_f32, atol=5e-2), \
        "mismatch vs f32 reference (beyond bf16 quantization error)"

    print("KERNEL_OK")
</pallas_src>

<mosaic_0001>
module attributes {stable_mosaic.version = 11 : i64} {
  func.func @mlp_kernel(%arg0: i32, %arg1: memref<256x64xbf16, #tpu.memory_space<vmem>>, %arg2: memref<64x256xbf16, #tpu.memory_space<vmem>>, %arg3: memref<1x256xf32, #tpu.memory_space<vmem>>, %arg4: memref<256x256xbf16, #tpu.memory_space<vmem>>, %arg5: memref<1x256xf32, #tpu.memory_space<vmem>>, %arg6: memref<256x128xbf16, #tpu.memory_space<vmem>>, %arg7: memref<1x128xf32, #tpu.memory_space<vmem>>, %arg8: memref<256x128xf32, #tpu.memory_space<vmem>>) attributes {dimension_semantics = [#tpu.dimension_semantics<parallel>], iteration_bounds = array<i64: 2>, scalar_prefetch = 0 : i64, scratch_operands = 0 : i64, tpu.core_type = #tpu.core_type<tc>, window_params = [{transform_indices = @transform_0, window_bounds = array<i64: 256, 64>}, {pipeline_mode = #tpu.pipeline_mode<synchronous>, transform_indices = @transform_1, window_bounds = array<i64: 64, 256>}, {pipeline_mode = #tpu.pipeline_mode<synchronous>, transform_indices = @transform_2, window_bounds = array<i64: 1, 256>}, {pipeline_mode = #tpu.pipeline_mode<synchronous>, transform_indices = @transform_3, window_bounds = array<i64: 256, 256>}, {pipeline_mode = #tpu.pipeline_mode<synchronous>, transform_indices = @transform_4, window_bounds = array<i64: 1, 256>}, {pipeline_mode = #tpu.pipeline_mode<synchronous>, transform_indices = @transform_5, window_bounds = array<i64: 256, 128>}, {pipeline_mode = #tpu.pipeline_mode<synchronous>, transform_indices = @transform_6, window_bounds = array<i64: 1, 128>}, {transform_indices = @transform_7, window_bounds = array<i64: 256, 128>}]} {
    %c0 = arith.constant 0 : index
    %c0_0 = arith.constant 0 : index
    %0 = vector.load %arg1[%c0, %c0_0] : memref<256x64xbf16, #tpu.memory_space<vmem>>, vector<256x64xbf16>
    %c0_1 = arith.constant 0 : index
    %c0_2 = arith.constant 0 : index
    %1 = vector.load %arg2[%c0_1, %c0_2] : memref<64x256xbf16, #tpu.memory_space<vmem>>, vector<64x256xbf16>
    %cst = arith.constant dense<0.000000e+00> : vector<256x256xf32>
    %2 = tpu.matmul %0, %1, %cst {dimension_numbers = #tpu.dot_dimension_numbers<[1], [0], [0], [1], [0, 0, 1, 1], [], []>} : vector<256x64xbf16>, vector<64x256xbf16>, vector<256x256xf32> -> vector<256x256xf32>
    %c0_3 = arith.constant 0 : index
    %c0_4 = arith.constant 0 : index
    %3 = vector.load %arg3[%c0_3, %c0_4] : memref<1x256xf32, #tpu.memory_space<vmem>>, vector<1x256xf32>
    %4 = vector.broadcast %3 : vector<1x256xf32> to vector<256x256xf32>
    %5 = arith.addf %2, %4 : vector<256x256xf32>
    %cst_5 = arith.constant 0.000000e+00 : f32
    %6 = vector.broadcast %cst_5 : f32 to vector<256x256xf32>
    %7 = arith.maximumf %5, %6 : vector<256x256xf32>
    %8 = arith.truncf %7 : vector<256x256xf32> to vector<256x256xbf16>
    %c0_6 = arith.constant 0 : index
    %c0_7 = arith.constant 0 : index
    %9 = vector.load %arg4[%c0_6, %c0_7] : memref<256x256xbf16, #tpu.memory_space<vmem>>, vector<256x256xbf16>
    %cst_8 = arith.constant dense<0.000000e+00> : vector<256x256xf32>
    %10 = tpu.matmul %8, %9, %cst_8 {dimension_numbers = #tpu.dot_dimension_numbers<[1], [0], [0], [1], [0, 0, 1, 1], [], []>} : vector<256x256xbf16>, vector<256x256xbf16>, vector<256x256xf32> -> vector<256x256xf32>
    %c0_9 = arith.constant 0 : index
    %c0_10 = arith.constant 0 : index
    %11 = vector.load %arg5[%c0_9, %c0_10] : memref<1x256xf32, #tpu.memory_space<vmem>>, vector<1x256xf32>
    %12 = vector.broadcast %11 : vector<1x256xf32> to vector<256x256xf32>
    %13 = arith.addf %10, %12 : vector<256x256xf32>
    %cst_11 = arith.constant 0.000000e+00 : f32
    %14 = vector.broadcast %cst_11 : f32 to vector<256x256xf32>
    %15 = arith.maximumf %13, %14 : vector<256x256xf32>
    %16 = arith.truncf %15 : vector<256x256xf32> to vector<256x256xbf16>
    %c0_12 = arith.constant 0 : index
    %c0_13 = arith.constant 0 : index
    %17 = vector.load %arg6[%c0_12, %c0_13] : memref<256x128xbf16, #tpu.memory_space<vmem>>, vector<256x128xbf16>
    %cst_14 = arith.constant dense<0.000000e+00> : vector<256x128xf32>
    %18 = tpu.matmul %16, %17, %cst_14 {dimension_numbers = #tpu.dot_dimension_numbers<[1], [0], [0], [1], [0, 0, 1, 1], [], []>} : vector<256x256xbf16>, vector<256x128xbf16>, vector<256x128xf32> -> vector<256x128xf32>
    %c0_15 = arith.constant 0 : index
    %c0_16 = arith.constant 0 : index
    %19 = vector.load %arg7[%c0_15, %c0_16] : memref<1x128xf32, #tpu.memory_space<vmem>>, vector<1x128xf32>
    %20 = vector.broadcast %19 : vector<1x128xf32> to vector<256x128xf32>
    %21 = arith.addf %18, %20 : vector<256x128xf32>
    %c0_17 = arith.constant 0 : index
    %c0_18 = arith.constant 0 : index
    %22 = vector.load %arg8[%c0_17, %c0_18] : memref<256x128xf32, #tpu.memory_space<vmem>>, vector<256x128xf32>
    tpu.vector_store %arg8[%c0_17, %c0_18], %21 {strides = array<i32>} : memref<256x128xf32, #tpu.memory_space<vmem>>, vector<256x128xf32>,
    return
  }
  func.func @transform_0(%arg0: i32) -> (i32, i32) {
    %c0_i32 = arith.constant 0 : i32
    %c0_i32_0 = arith.constant 0 : i32
    return %arg0, %c0_i32 : i32, i32
  }
  func.func @transform_1(%arg0: i32) -> (i32, i32) {
    %c0_i32 = arith.constant 0 : i32
    %c0_i32_0 = arith.constant 0 : i32
    %c0_i32_1 = arith.constant 0 : i32
    return %c0_i32, %c0_i32_0 : i32, i32
  }
  func.func @transform_2(%arg0: i32) -> (i32, i32) {
    %c0_i32 = arith.constant 0 : i32
    %c0_i32_0 = arith.constant 0 : i32
    %c0_i32_1 = arith.constant 0 : i32
    return %c0_i32, %c0_i32_0 : i32, i32
  }
  func.func @transform_3(%arg0: i32) -> (i32, i32) {
    %c0_i32 = arith.constant 0 : i32
    %c0_i32_0 = arith.constant 0 : i32
    %c0_i32_1 = arith.constant 0 : i32
    return %c0_i32, %c0_i32_0 : i32, i32
  }
  func.func @transform_4(%arg0: i32) -> (i32, i32) {
    %c0_i32 = arith.constant 0 : i32
    %c0_i32_0 = arith.constant 0 : i32
    %c0_i32_1 = arith.constant 0 : i32
    return %c0_i32, %c0_i32_0 : i32, i32
  }
  func.func @transform_5(%arg0: i32) -> (i32, i32) {
    %c0_i32 = arith.constant 0 : i32
    %c0_i32_0 = arith.constant 0 : i32
    %c0_i32_1 = arith.constant 0 : i32
    return %c0_i32, %c0_i32_0 : i32, i32
  }
  func.func @transform_6(%arg0: i32) -> (i32, i32) {
    %c0_i32 = arith.constant 0 : i32
    %c0_i32_0 = arith.constant 0 : i32
    %c0_i32_1 = arith.constant 0 : i32
    return %c0_i32, %c0_i32_0 : i32, i32
  }
  func.func @transform_7(%arg0: i32) -> (i32, i32) {
    %c0_i32 = arith.constant 0 : i32
    %c0_i32_0 = arith.constant 0 : i32
    return %arg0, %c0_i32 : i32, i32
  }
}

module attributes {stable_mosaic.version = 11 : i64} {
  func.func @mlp_kernel(%arg0: i32, %arg1: memref<256x64xbf16, #tpu.memory_space<vmem>>, %arg2: memref<64x256xbf16, #tpu.memory_space<vmem>>, %arg3: memref<1x256xf32, #tpu.memory_space<vmem>>, %arg4: memref<256x256xbf16, #tpu.memory_space<vmem>>, %arg5: memref<1x256xf32, #tpu.memory_space<vmem>>, %arg6: memref<256x128xbf16, #tpu.memory_space<vmem>>, %arg7: memref<1x128xf32, #tpu.memory_space<vmem>>, %arg8: memref<256x128xf32, #tpu.memory_space<vmem>>) attributes {dimension_semantics = [#tpu.dimension_semantics<parallel>], iteration_bounds = array<i64: 2>, scalar_prefetch = 0 : i64, scratch_operands = 0 : i64, tpu.core_type = #tpu.core_type<tc>, window_params = [{transform_indices = @transform_0, window_bounds = array<i64: 256, 64>}, {pipeline_mode = #tpu.pipeline_mode<synchronous>, transform_indices = @transform_1, window_bounds = array<i64: 64, 256>}, {pipeline_mode = #tpu.pipeline_mode<synchronous>, transform_indices = @transform_2, window_bounds = array<i64: 1, 256>}, {pipeline_mode = #tpu.pipeline_mode<synchronous>, transform_indices = @transform_3, window_bounds = array<i64: 256, 256>}, {pipeline_mode = #tpu.pipeline_mode<synchronous>, transform_indices = @transform_4, window_bounds = array<i64: 1, 256>}, {pipeline_mode = #tpu.pipeline_mode<synchronous>, transform_indices = @transform_5, window_bounds = array<i64: 256, 128>}, {pipeline_mode = #tpu.pipeline_mode<synchronous>, transform_indices = @transform_6, window_bounds = array<i64: 1, 128>}, {transform_indices = @transform_7, window_bounds = array<i64: 256, 128>}]} {
    %c0 = arith.constant 0 : index
    %c0_0 = arith.constant 0 : index
    %0 = vector.load %arg1[%c0, %c0_0] : memref<256x64xbf16, #tpu.memory_space<vmem>>, vector<256x64xbf16>
    %c0_1 = arith.constant 0 : index
    %c0_2 = arith.constant 0 : index
    %1 = vector.load %arg2[%c0_1, %c0_2] : memref<64x256xbf16, #tpu.memory_space<vmem>>, vector<64x256xbf16>
    %cst = arith.constant dense<0.000000e+00> : vector<256x256xf32>
    %2 = tpu.matmul %0, %1, %cst {dimension_numbers = #tpu.dot_dimension_numbers<[1], [0], [0], [1], [0, 0, 1, 1], [], []>} : vector<256x64xbf16>, vector<64x256xbf16>, vector<256x256xf32> -> vector<256x256xf32>
    %c0_3 = arith.constant 0 : index
    %c0_4 = arith.constant 0 : index
    %3 = vector.load %arg3[%c0_3, %c0_4] : memref<1x256xf32, #tpu.memory_space<vmem>>, vector<1x256xf32>
    %4 = vector.broadcast %3 : vector<1x256xf32> to vector<256x256xf32>
    %5 = arith.addf %2, %4 : vector<256x256xf32>
    %cst_5 = arith.constant 0.000000e+00 : f32
    %6 = vector.broadcast %cst_5 : f32 to vector<256x256xf32>
    %7 = arith.maximumf %5, %6 : vector<256x256xf32>
    %8 = arith.truncf %7 : vector<256x256xf32> to vector<256x256xbf16>
    %c0_6 = arith.constant 0 : index
    %c0_7 = arith.constant 0 : index
    %9 = vector.load %arg4[%c0_6, %c0_7] : memref<256x256xbf16, #tpu.memory_space<vmem>>, vector<256x256xbf16>
    %cst_8 = arith.constant dense<0.000000e+00> : vector<256x256xf32>
    %10 = tpu.matmul %8, %9, %cst_8 {dimension_numbers = #tpu.dot_dimension_numbers<[1], [0], [0], [1], [0, 0, 1, 1], [], []>} : vector<256x256xbf16>, vector<256x256xbf16>, vector<256x256xf32> -> vector<256x256xf32>
    %c0_9 = arith.constant 0 : index
    %c0_10 = arith.constant 0 : index
    %11 = vector.load %arg5[%c0_9, %c0_10] : memref<1x256xf32, #tpu.memory_space<vmem>>, vector<1x256xf32>
    %12 = vector.broadcast %11 : vector<1x256xf32> to vector<256x256xf32>
    %13 = arith.addf %10, %12 : vector<256x256xf32>
    %cst_11 = arith.constant 0.000000e+00 : f32
    %14 = vector.broadcast %cst_11 : f32 to vector<256x256xf32>
    %15 = arith.maximumf %13, %14 : vector<256x256xf32>
    %16 = arith.truncf %15 : vector<256x256xf32> to vector<256x256xbf16>
    %c0_12 = arith.constant 0 : index
    %c0_13 = arith.constant 0 : index
    %17 = vector.load %arg6[%c0_12, %c0_13] : memref<256x128xbf16, #tpu.memory_space<vmem>>, vector<256x128xbf16>
    %cst_14 = arith.constant dense<0.000000e+00> : vector<256x128xf32>
    %18 = tpu.matmul %16, %17, %cst_14 {dimension_numbers = #tpu.dot_dimension_numbers<[1], [0], [0], [1], [0, 0, 1, 1], [], []>} : vector<256x256xbf16>, vector<256x128xbf16>, vector<256x128xf32> -> vector<256x128xf32>
    %c0_15 = arith.constant 0 : index
    %c0_16 = arith.constant 0 : index
    %19 = vector.load %arg7[%c0_15, %c0_16] : memref<1x128xf32, #tpu.memory_space<vmem>>, vector<1x128xf32>
    %20 = vector.broadcast %19 : vector<1x128xf32> to vector<256x128xf32>
    %21 = arith.addf %18, %20 : vector<256x128xf32>
    %c0_17 = arith.constant 0 : index
    %c0_18 = arith.constant 0 : index
    %22 = vector.load %arg8[%c0_17, %c0_18] : memref<256x128xf32, #tpu.memory_space<vmem>>, vector<256x128xf32>
    tpu.vector_store %arg8[%c0_17, %c0_18], %21 {strides = array<i32>} : memref<256x128xf32, #tpu.memory_space<vmem>>, vector<256x128xf32>,
    return
  }
  func.func @transform_0(%arg0: i32) -> (i32, i32) {
    %c0_i32 = arith.constant 0 : i32
    %c0_i32_0 = arith.constant 0 : i32
    return %arg0, %c0_i32 : i32, i32
  }
  func.func @transform_1(%arg0: i32) -> (i32, i32) {
    %c0_i32 = arith.constant 0 : i32
    %c0_i32_0 = arith.constant 0 : i32
    %c0_i32_1 = arith.constant 0 : i32
    return %c0_i32, %c0_i32_0 : i32, i32
  }
  func.func @transform_2(%arg0: i32) -> (i32, i32) {
    %c0_i32 = arith.constant 0 : i32
    %c0_i32_0 = arith.constant 0 : i32
    %c0_i32_1 = arith.constant 0 : i32
    return %c0_i32, %c0_i32_0 : i32, i32
  }
  func.func @transform_3(%arg0: i32) -> (i32, i32) {
    %c0_i32 = arith.constant 0 : i32
    %c0_i32_0 = arith.constant 0 : i32
    %c0_i32_1 = arith.constant 0 : i32
    return %c0_i32, %c0_i32_0 : i32, i32
  }
  func.func @transform_4(%arg0: i32) -> (i32, i32) {
    %c0_i32 = arith.constant 0 : i32
    %c0_i32_0 = arith.constant 0 : i32
    %c0_i32_1 = arith.constant 0 : i32
    return %c0_i32, %c0_i32_0 : i32, i32
  }
  func.func @transform_5(%arg0: i32) -> (i32, i32) {
    %c0_i32 = arith.constant 0 : i32
    %c0_i32_0 = arith.constant 0 : i32
    %c0_i32_1 = arith.constant 0 : i32
    return %c0_i32, %c0_i32_0 : i32, i32
  }
  func.func @transform_6(%arg0: i32) -> (i32, i32) {
    %c0_i32 = arith.constant 0 : i32
    %c0_i32_0 = arith.constant 0 : i32
    %c0_i32_1 = arith.constant 0 : i32
    return %c0_i32, %c0_i32_0 : i32, i32
  }
  func.func @transform_7(%arg0: i32) -> (i32, i32) {
    %c0_i32 = arith.constant 0 : i32
    %c0_i32_0 = arith.constant 0 : i32
    return %arg0, %c0_i32 : i32, i32
  }
}

</mosaic_0001>

<bundles_post_ra>
// kernel: tpu_custom_call.1
= control target key start
LH: loop header
LB: loop body
LE: loop exit
PB: predicated region body
PF: predicated region fallthrough
CT: control target
= control target key end

     0   :  { %12 = vsyncpa [#allocation3], 0  ;;  %s2828_s0 = inlined_call_operand.vmem [shape: bf16[512,64], index: 0, kind: input, shape index: {}]   ;;  %s2829_s1 = inlined_call_operand.hbm [shape: bf16[64,256], index: 1, kind: input, shape index: {}]   ;;  %s2830_s2 = inlined_call_operand.vmem [shape: f32[1,256], index: 2, kind: input, shape index: {}]   ;;  %s2831_s3 = inlined_call_operand.vmem [shape: bf16[256,256], index: 3, kind: input, shape index: {}]   ;;  %s2832_s4 = inlined_call_operand.vmem [shape: f32[1,256], index: 4, kind: input, shape index: {}]   ;;  %s2833_s5 = inlined_call_operand.vmem [shape: bf16[256,128], index: 5, kind: input, shape index: {}]   ;;  %s2834_s6 = inlined_call_operand.vmem [shape: f32[1,128], index: 6, kind: input, shape index: {}]   ;;  %s2835_s7 = inlined_call_operand.hbm [shape: f32[512,128], index: 7, kind: output, shape index: {}]  }
   0x1   :  { %13 = vsyncpa [#allocation4], 0 }
   0x2   :  { %15 = vsyncpa [#allocation4 + $0x1], 0  ;;  %s2225_s24 = smov 0   ;;  %s2227_s25 = smov 0  }
   0x3   :  { %s2229_s26 = smov 0   ;;  %s2231_s27 = smov 0  }
   0x4 LB: > { %s2246_s28 = sadd.s32 4294967295, %s2176_s27   ;;  %s1715_s29 = sadd.s32 4294967294, %s2176_s27   ;;  %s2176_s27 = sphi %s2231_s27, %s2843_s27   ;;  %s2172_s26 = sphi %s2229_s26, %s2842_s26   ;;  %s2168_s25 = sphi %s2227_s25, %s2841_s25   ;;  %s2164_s24 = sphi %s2225_s24, %s2840_s24  }
   0x5   : > { %s2250_s30 = sadd.s32 1, %s2176_s27   ;;  %s180_s8 = sadd.s32 1, %s2172_s26 }
   0x6   : > { %s177_s9 = ssub.s32 %s2176_s27, %s2250_s30  ;;  %p190_p0 = scmp.ne.s32.totalorder %s2172_s26, %s2168_s25 }
   0x7   : > { %p178_p1 = scmp.eq.s32.totalorder %s177_s9, 0  ;;  %p191_p2 = scmp.eq.s32.totalorder %s2246_s28, 1 }
   0x8   : > { %p196_p3 = scmp.ne.s32.totalorder %s2168_s25, %s2164_s24  ;;  %p197_p4 = scmp.eq.s32.totalorder %s1715_s29, 1 }
   0x9   : > { %s2261_s10 = scalar_select %p178_p1, %s2172_s26, %s180_s8  }
   0xa   : > { %p2263_p5 = por %p191_p2, %p190_p0  ;;  %p2267_p6 = por %p197_p4, %p196_p3 }
   0xb   : > { %p1716_p7 = scmp.ge.s32.totalorder %s2176_s27, 1  ;;  %p204_p8 = scmp.lt.s32.totalorder %s2176_s27, 3 }
   0xc   : > { %s2837_s12 = scalar_select %p2267_p6, 1, 0 }
   0xd   : > { %p1953_p9 = scmp.eq.s32.totalorder %s2246_s28, 0  ;;  %p2274_p10 = pnand %p1716_p7, %p204_p8 }
   0xe   : > { %s2178_s14 = smov [#allocation2]  }
   0xf   : > { %s216_s15 = sshll.u32 %s2178_s14, 4  ;;  %p1945_p11 = pneg %p2274_p10  ;;  %s217_s15 = int_to_ptr.vmem [resolvable:$true] %s216_s15 }
  0x10   : > { %s2097_s16 = scalar_lea.vmem %s217_s15, 1024  ;;  %p2105_p3 = scmp.lt.s32.totalorder %s217_s15, %s217_s15 }
  0x11   : > { %p1946_p12 = pnand %p1953_p9, %p1945_p11  ;;  %p2098_p0 = scmp.ne.s32.totalorder %s217_s15, %s2097_s16 }
  0x12   : > { %p2106_p4 = scmp.lt.s32.totalorder %s2097_s16, %s2097_s16 }
  0x13   : > { %p2088_p13 = pneg %p1946_p12 }
  0x14   : > { %p2107_p6 = por %p2106_p4, %p2105_p3 }
  0x15   : > { %p2100_p1 = pnand %p2098_p0, %p2088_p13 }
  0x17   : > { %p2101_p2 = pneg %p2100_p1 }
  0x19   : > { %p2108_p7 = pnand %p2107_p6, %p2101_p2 }
  0x1b   : > { %2111 = shalt.err (!%p2108_p7)
}
  0x1c   : > { %s2179_s17 = smov 128   ;;  %s2180_s18 = smov 8  }
  0x1d   : > { %1948 = dma.hbm_to_vmem [thread:$0]  (!%p1946_p12), %s2829_s1, 1024, %s217_s15, [#allocation3], %s2179_s17, %s2179_s17, %s2180_s18  }
  0x1e   : > { %256 = sbr.rel (%p2274_p10) target bundleno = 803 (0x323), region = 48 }
  0x23   : > { %2155 = dma.done.wait (%p1953_p9), [#allocation3], 1024  }
  0x24   : > { %2157 = vsyncadd (%p1953_p9), [#allocation3], 4294966272  ;;  %s1722_s21 = sshll.u32 %s2246_s28, 5  ;;  %v2181_v0 = vmov 0   ;;  %v1994_v1 = vld [vmem:[#allocation2 + $0x34] ss:$8 sps:$4 sm:$0xff]   ;;  %v338_v57 = vlaneseq }
  0x25   : > { %549 = vmatprep.mubr.bf16.mxu0 %v2181_v0  ;;  %p289_p6 = scmp.lt.s32.totalorder %s1722_s21, 63  ;;  %629 = vmatprep.mubr.bf16.mxu1 %v2181_v0  ;;  %v1996_v2 = vld [vmem:[#allocation2 + $0x30] ss:$8 sps:$4 sm:$0xff]   ;;  %v1997_v3 = vld [vmem:[#allocation2 + $0x24] ss:$8 sps:$4 sm:$0xff]   ;;  %vm468_vm0 = vcmask 523264  }
  0x26   : > { %525 = vmatprep.subr.bf16.mxu0 %v1994_v1  ;;  %1931 = vmatprep.subr.bf16.mxu1 %v1994_v1  ;;  %v1999_v4 = vld [vmem:[#allocation2 + $0x20] ss:$8 sps:$4 sm:$0xff]   ;;  %v2000_v5 = vld [vmem:[#allocation2 + $0x14] ss:$8 sps:$4 sm:$0xff]   ;;  %v2002_v6 = vld [vmem:[#allocation2 + $0x10] ss:$8 sps:$4 sm:$0xff]  }
  0x27   : > { %s2845_s21 = smov (!%p289_p6, %s1722_s21), 63  ;;  %526 = vmatpush1.bf16.msra.mxu0 %v1996_v2  ;;  %1935 = vmatpush1.bf16.msra.mxu1 %v1996_v2  ;;  %v2003_v7 = vld [vmem:[#allocation2 + $0x4] ss:$8 sps:$4 sm:$0xff]   ;;  %v2005_v8 = vld [vmem:[#allocation2] ss:$8 sps:$4 sm:$0xff]   ;;  %v2441_v58 = vshrl.u32 %v338_v57, 7 }
  0x28   : > { %s1723_s22 = sshll.u32 %s2845_s21, 2  ;;  %527 = vmatprep.subr.bf16.mxu0 %v1997_v3  ;;  %1932 = vmatprep.subr.bf16.mxu1 %v1997_v3  ;;  %v2022_v13 = vld [vmem:[%s2831_s3 + $0x70] ss:$8 sps:$4 sm:$0xff]   ;;  %v2024_v14 = vld [vmem:[%s2831_s3 + $0x74] ss:$8 sps:$4 sm:$0xff]   ;;  %s2182_s15 = smov [#allocation5]  }
  0x29   : > { %s2297_s8 = scalar_lea.vmem %s2828_s0, %s1723_s22  ;;  %v2027_v15 = vld [vmem:[%s2831_s3 + $0x64] ss:$8 sps:$4 sm:$0xff]   ;;  %v2025_v16 = vld [vmem:[%s2831_s3 + $0x60] ss:$8 sps:$4 sm:$0xff]   ;;  %v2030_v17 = vld [vmem:[%s2831_s3 + $0x54] ss:$8 sps:$4 sm:$0xff]  }
  0x2a   : > { %v2006_v9 = vld [vmem:[%s2297_s8] sm:$0xff]   ;;  %v2007_v11 = vld [vmem:[%s2297_s8 + $0x8] sm:$0xff]   ;;  %v2028_v18 = vld [vmem:[%s2831_s3 + $0x50] ss:$8 sps:$4 sm:$0xff]   ;;  %v344_v59 = vsub.s32 1, %v2441_v58  ;;  %v340_v60 = vsub.s32 0, %v2441_v58 }
  0x2b   : > { %528 = vmatpush1.bf16.msra.mxu0 %v1999_v4  ;;  %1936 = vmatpush1.bf16.msra.mxu1 %v1999_v4  ;;  %v2014_v10 = vld [vmem:[%s2297_s8 + $0x40] sm:$0xff]   ;;  %v2015_v12 = vld [vmem:[%s2297_s8 + $0x48] sm:$0xff]   ;;  %v2008_v19 = vld [vmem:[%s2297_s8 + $0x10] sm:$0xff]   ;;  %s1818_s22 = sshll.u32 %s2246_s28, 12  ;;  %s2116_s16 = sshll.u32 %s2182_s15, 4  ;;  %s2117_s16 = int_to_ptr.vmem [resolvable:$false] %s2116_s16 }
  0x2c   : > { %529 = vmatprep.subr.bf16.mxu0 %v2000_v5  ;;  %1933 = vmatprep.subr.bf16.mxu1 %v2000_v5  ;;  %v2016_v20 = vld [vmem:[%s2297_s8 + $0x50] sm:$0xff]   ;;  %v2033_v21 = vld [vmem:[%s2831_s3 + $0x44] ss:$8 sps:$4 sm:$0xff]   ;;  %v2031_v22 = vld [vmem:[%s2831_s3 + $0x40] ss:$8 sps:$4 sm:$0xff]   ;;  %s2780_s13 = scalar_lea.hbm %s2835_s7, %s1818_s22  ;;  %s2118_s17 = scalar_lea.vmem %s2117_s16, 8192 }
  0x2d   : > { %v2036_v23 = vld [vmem:[%s2831_s3 + $0x34] ss:$8 sps:$4 sm:$0xff]   ;;  %v2034_v24 = vld [vmem:[%s2831_s3 + $0x30] ss:$8 sps:$4 sm:$0xff]   ;;  %v2039_v27 = vld [vmem:[%s2831_s3 + $0x24] ss:$8 sps:$4 sm:$0xff]  }
  0x2e   : > { %v2009_v25 = vld [vmem:[%s2297_s8 + $0x18] sm:$0xff]   ;;  %v2037_v28 = vld [vmem:[%s2831_s3 + $0x20] ss:$8 sps:$4 sm:$0xff]   ;;  %v2045_v33 = vld [vmem:[%s2831_s3 + $0x4] ss:$8 sps:$4 sm:$0xff]  }
  0x2f   : > { %530 = vmatpush1.bf16.msra.mxu0 %v2002_v6  ;;  %1937 = vmatpush1.bf16.msra.mxu1 %v2002_v6  ;;  %v2017_v26 = vld [vmem:[%s2297_s8 + $0x58] sm:$0xff]   ;;  %v2010_v31 = vld [vmem:[%s2297_s8 + $0x20] sm:$0xff]   ;;  %v2011_v37 = vld [vmem:[%s2297_s8 + $0x28] sm:$0xff]  }
  0x30   : > { %531 = vmatprep.subr.bf16.mxu0 %v2003_v7  ;;  %1934 = vmatprep.subr.bf16.mxu1 %v2003_v7  ;;  %v2042_v29 = vld [vmem:[%s2831_s3 + $0x14] ss:$8 sps:$4 sm:$0xff]   ;;  %v2040_v30 = vld [vmem:[%s2831_s3 + $0x10] ss:$8 sps:$4 sm:$0xff]   ;;  %v2018_v32 = vld [vmem:[%s2297_s8 + $0x60] sm:$0xff]  }
  0x31   : > { %v2043_v34 = vld [vmem:[%s2831_s3] ss:$8 sps:$4 sm:$0xff]   ;;  %v2048_v35 = vld [vmem:[%s2831_s3 + $0xf4] ss:$8 sps:$4 sm:$0xff]   ;;  %v2046_v36 = vld [vmem:[%s2831_s3 + $0xf0] ss:$8 sps:$4 sm:$0xff]  }
  0x32   : > { %v2019_v38 = vld [vmem:[%s2297_s8 + $0x68] sm:$0xff]   ;;  %v2054_v41 = vld [vmem:[%s2831_s3 + $0xd4] ss:$8 sps:$4 sm:$0xff]   ;;  %v2052_v42 = vld [vmem:[%s2831_s3 + $0xd0] ss:$8 sps:$4 sm:$0xff]  }
  0x33   : > { %532 = vmatpush1.bf16.msra.mxu0 %v2005_v8  ;;  %1938 = vmatpush1.bf16.msra.mxu1 %v2005_v8  ;;  %v2051_v39 = vld [vmem:[%s2831_s3 + $0xe4] ss:$8 sps:$4 sm:$0xff]   ;;  %v2049_v40 = vld [vmem:[%s2831_s3 + $0xe0] ss:$8 sps:$4 sm:$0xff]   ;;  %v2012_v43 = vld [vmem:[%s2297_s8 + $0x30] sm:$0xff]  }
  0x34   : > { %1010 = vmatprep.subr.bf16.mxu1 %v2024_v14  ;;  %v2020_v44 = vld [vmem:[%s2297_s8 + $0x70] sm:$0xff]   ;;  %v2057_v45 = vld [vmem:[%s2831_s3 + $0xc4] ss:$8 sps:$4 sm:$0xff]   ;;  %v2055_v46 = vld [vmem:[%s2831_s3 + $0xc0] ss:$8 sps:$4 sm:$0xff]  }
  0x35   : > { %v2060_v47 = vld [vmem:[%s2831_s3 + $0xb4] ss:$8 sps:$4 sm:$0xff]   ;;  %v2058_v48 = vld [vmem:[%s2831_s3 + $0xb0] ss:$8 sps:$4 sm:$0xff]   ;;  %v2063_v51 = vld [vmem:[%s2831_s3 + $0xa4] ss:$8 sps:$4 sm:$0xff]  }
  0x36   : > { %1748 = vmatmul.mubr.msk.bf16.vlgmr.msra.gmra.mxu0 %vm468_vm0, %v2006_v9  ;;  %1756 = vmatmul.mubr.msk.bf16.vlgmr.msra.gmra.mxu1 %vm468_vm0, %v2014_v10  ;;  %v2013_v49 = vld [vmem:[%s2297_s8 + $0x38] sm:$0xff]   ;;  %v2061_v52 = vld [vmem:[%s2831_s3 + $0xa0] ss:$8 sps:$4 sm:$0xff]   ;;  %v2069_v55 = vld [vmem:[%s2831_s3 + $0x84] ss:$8 sps:$4 sm:$0xff]  }
  0x37   : > { %559 = vmatprep.mubr.bf16.mxu0 %v2181_v0  ;;  %639 = vmatprep.mubr.bf16.mxu1 %v2181_v0  ;;  %v2021_v50 = vld [vmem:[%s2297_s8 + $0x78] sm:$0xff]   ;;  %v2067_v56 = vld [vmem:[%s2831_s3 + $0x80] ss:$8 sps:$4 sm:$0xff]   ;;  %s285_s8 = sand.u32 1, %s2168_s25  }
  0x38   : > { %1011 = vmatpush1.bf16.msra.mxu1 %v2022_v13  ;;  %v2066_v53 = vld [vmem:[%s2831_s3 + $0x94] ss:$8 sps:$4 sm:$0xff]   ;;  %v2064_v54 = vld [vmem:[%s2831_s3 + $0x90] ss:$8 sps:$4 sm:$0xff]   ;;  %v336_v61 = vld [vmem:[%s2830_s2] sm:$0x3] }
  0x39   : > { %1012 = vmatprep.subr.bf16.mxu1 %v2027_v15  ;;  %v2456_v1 = vrot.slane %v336_v61, %v340_v60  ;;  %v2072_v13 = vld [vmem:[%s2833_s5 + $0x70] sm:$0xff]   ;;  %s1721_s18 = sshll.u32 %s285_s8, 8  ;;  %s2788_s14 = scalar_lea.sflag [#allocation4], %s285_s8 }
  0x3a   : > { %s2712_s21 = scalar_lea.vmem [#allocation5], %s1721_s18 }
  0x3b   : > { %s1641_s23 = sshll.u32 %s2712_s21, 4  ;;  %s2782_s23 = int_to_ptr.vmem [resolvable:$true] %s1641_s23 }
  0x3c   : > { %1013 = vmatpush1.bf16.msra.mxu1 %v2025_v16  ;;  %s2112_s28 = scalar_lea.vmem %s2782_s23, 4096  ;;  %p2119_p11 = scmp.lt.s32.totalorder %s2782_s23, %s2117_s16 }
  0x3d   : > { %1014 = vmatprep.subr.bf16.mxu1 %v2030_v17  ;;  %p2113_p8 = scmp.ne.s32.totalorder %s2782_s23, %s2112_s28  ;;  %p2120_p12 = scmp.lt.s32.totalorder %s2118_s17, %s2112_s28 }
  0x3e   : > { %1749 = vmatmul.mubr.msk.bf16.gmra.mxu0 %vm468_vm0, %v2007_v11  ;;  %1757 = vmatmul.mubr.msk.bf16.gmra.mxu1 %vm468_vm0, %v2015_v12  ;;  %v2070_v11 = vld [vmem:[%s2833_s5 + $0x78] sm:$0xff]  }
  0x3f   : > { %569 = vmatprep.mubr.bf16.mxu0 %v2181_v0  ;;  %649 = vmatprep.mubr.bf16.mxu1 %v2181_v0  ;;  %v2071_v12 = vld [vmem:[%s2833_s5 + $0x38] sm:$0xff]   ;;  %p2114_p9 = pnand %p2113_p8, %p2263_p5  ;;  %p2121_p13 = por %p2120_p12, %p2119_p11 }
  0x40   : > { %1015 = vmatpush1.bf16.msra.mxu1 %v2028_v18  ;;  %1819 = vmatprep.subr.bf16.mxu0 %v2070_v11 }
  0x41   : > { %1016 = vmatprep.subr.bf16.mxu1 %v2033_v21  ;;  %1820 = vmatpush3.bf16.msra.mxu0 %v2071_v12  ;;  %p2115_p10 = pneg %p2114_p9 }
  0x42   : > { %1821 = vmatprep.subr.bf16.mxu0 %v2072_v13 }
  0x43   : > { %p2122_p0 = pnand %p2121_p13, %p2115_p10 }
  0x44   : > { %1017 = vmatpush1.bf16.msra.mxu1 %v2031_v22 }
  0x45   : > { %1018 = vmatprep.subr.bf16.mxu1 %v2036_v23 }
  0x46   : > { %1750 = vmatmul.mubr.msk.bf16.gmra.mxu0 %vm468_vm0, %v2008_v19  ;;  %1758 = vmatmul.mubr.msk.bf16.gmra.mxu1 %vm468_vm0, %v2016_v20  ;;  %v2073_v20 = vld [vmem:[%s2833_s5 + $0x30] sm:$0xff]  }
  0x47   : > { %579 = vmatprep.mubr.bf16.mxu0 %v2181_v0  ;;  %659 = vmatprep.mubr.bf16.mxu1 %v2181_v0 }
  0x48   : > { %1019 = vmatpush1.bf16.msra.mxu1 %v2034_v24  ;;  %v2074_v24 = vld [vmem:[%s2833_s5 + $0x68] sm:$0xff]   ;;  %1822 = vmatpush3.bf16.msra.mxu0 %v2073_v20 }
  0x49   : > { %1020 = vmatprep.subr.bf16.mxu1 %v2039_v27  ;;  %1823 = vmatprep.subr.bf16.mxu0 %v2074_v24 }
  0x4c   : > { %1021 = vmatpush1.bf16.msra.mxu1 %v2037_v28 }
  0x4d   : > { %1022 = vmatprep.subr.bf16.mxu1 %v2042_v29 }
  0x4e   : > { %1751 = vmatmul.mubr.msk.bf16.gmra.mxu0 %vm468_vm0, %v2009_v25  ;;  %1759 = vmatmul.mubr.msk.bf16.gmra.mxu1 %vm468_vm0, %v2017_v26 }
  0x4f   : > { %589 = vmatprep.mubr.bf16.mxu0 %v2181_v0  ;;  %669 = vmatprep.mubr.bf16.mxu1 %v2181_v0 }
  0x50   : > { %1023 = vmatpush1.bf16.msra.mxu1 %v2040_v30 }
  0x51   : > { %1024 = vmatprep.subr.bf16.mxu1 %v2045_v33 }
  0x54   : > { %1025 = vmatpush1.bf16.msra.mxu1 %v2043_v34  ;;  %v2076_v34 = vld [vmem:[%s2833_s5 + $0x60] sm:$0xff]  }
  0x55   : > { %1026 = vmatprep.subr.bf16.mxu1 %v2048_v35 }
  0x56   : > { %1752 = vmatmul.mubr.msk.bf16.gmra.mxu0 %vm468_vm0, %v2010_v31  ;;  %1760 = vmatmul.mubr.msk.bf16.gmra.mxu1 %vm468_vm0, %v2018_v32  ;;  %v2075_v31 = vld [vmem:[%s2833_s5 + $0x28] sm:$0xff]  }
  0x57   : > { %599 = vmatprep.mubr.bf16.mxu0 %v2181_v0  ;;  %679 = vmatprep.mubr.bf16.mxu1 %v2181_v0 }
  0x58   : > { %1027 = vmatpush2.bf16.msra.mxu1 %v2046_v36  ;;  %1824 = vmatpush3.bf16.msra.mxu0 %v2075_v31 }
  0x59   : > { %1028 = vmatprep.subr.bf16.mxu1 %v2051_v39  ;;  %1825 = vmatprep.subr.bf16.mxu0 %v2076_v34 }
  0x5c   : > { %1029 = vmatpush2.bf16.msra.mxu1 %v2049_v40 }
  0x5d   : > { %1030 = vmatprep.subr.bf16.mxu1 %v2054_v41  ;;  %v2077_v41 = vld [vmem:[%s2833_s5 + $0x20] sm:$0xff]  }
  0x5e   : > { %1753 = vmatmul.mubr.msk.bf16.gmra.mxu0 %vm468_vm0, %v2011_v37  ;;  %1761 = vmatmul.mubr.msk.bf16.gmra.mxu1 %vm468_vm0, %v2019_v38 }
  0x5f   : > { %609 = vmatprep.mubr.bf16.mxu0 %v2181_v0  ;;  %689 = vmatprep.mubr.bf16.mxu1 %v2181_v0 }
  0x60   : > { %1031 = vmatpush2.bf16.msra.mxu1 %v2052_v42  ;;  %1826 = vmatpush3.bf16.msra.mxu0 %v2077_v41 }
  0x61   : > { %1032 = vmatprep.subr.bf16.mxu1 %v2057_v45 }
  0x64   : > { %1033 = vmatpush2.bf16.msra.mxu1 %v2055_v46 }
  0x65   : > { %1034 = vmatprep.subr.bf16.mxu1 %v2060_v47 }
  0x66   : > { %1754 = vmatmul.mubr.msk.bf16.gmra.mxu0 %vm468_vm0, %v2012_v43  ;;  %1762 = vmatmul.mubr.msk.bf16.gmra.mxu1 %vm468_vm0, %v2020_v44  ;;  %v2078_v44 = vld [vmem:[%s2833_s5 + $0x58] sm:$0xff]  }
  0x67   : > { %619 = vmatprep.mubr.bf16.mxu0 %v2181_v0  ;;  %699 = vmatprep.mubr.bf16.mxu1 %v2181_v0  ;;  %v2452_v0 = vrot.slane %v336_v61, %v344_v59 }
  0x68   : > { %1035 = vmatpush2.bf16.msra.mxu1 %v2058_v48  ;;  %1827 = vmatprep.subr.bf16.mxu0 %v2078_v44 }
  0x69   : > { %1036 = vmatprep.subr.bf16.mxu1 %v2063_v51  ;;  %v2079_v51 = vld [vmem:[%s2833_s5 + $0x18] sm:$0xff]  }
  0x6a   : > { %1828 = vmatpush3.bf16.msra.mxu0 %v2079_v51 }
  0x6c   : > { %1037 = vmatpush2.bf16.msra.mxu1 %v2061_v52 }
  0x6d   : > { %1038 = vmatprep.subr.bf16.mxu1 %v2066_v53 }
  0x6e   : > { %1755 = vmatmul.mubr.msk.bf16.gmra.mxu0 %vm468_vm0, %v2013_v49  ;;  %1763 = vmatmul.mubr.msk.bf16.gmra.mxu1 %vm468_vm0, %v2021_v50 }
  0x70   : > { %1039 = vmatpush2.bf16.msra.mxu1 %v2064_v54  ;;  %v2080_v54 = vld [vmem:[%s2833_s5 + $0x50] sm:$0xff]  }
  0x71   : > { %1040 = vmatprep.subr.bf16.mxu1 %v2069_v55  ;;  %1829 = vmatprep.subr.bf16.mxu0 %v2080_v54 }
  0x74   : > { %1041 = vmatpush2.bf16.msra.mxu1 %v2067_v56 }
  0xf6   : > { %v551_v62 = vpop.f32.mrf.mxu0  ;;  %v2448_v63 = vpop.f32.mrf.mxu1 }
  0xf7   : > { %v552_v8 = vadd.f32 %v551_v62, %v2456_v1 }
  0xf8   : > { %v553_v2 = vpop.f32.mrf.mxu0  ;;  %v2458_v3 = vpop.f32.mrf.mxu1 }
  0xf9   : > { %v554_v6 = vadd.f32 %v553_v2, %v2452_v0  ;;  %v710_v21 = vmax.f32 %v552_v8, 0.0  ;;  %v2082_v8 = vld [vmem:[%s2833_s5 + $0x48] sm:$0xff]  }
  0xfa   : > { %v555_v4 = vpop.f32.mrf.mxu0  ;;  %v2460_v5 = vpop.f32.mrf.mxu1 }
  0xfb   : > { %v556_v7 = vadd.f32 %v555_v4, %v2456_v1  ;;  %v711_v18 = vmax.f32 %v554_v6, 0.0  ;;  %v2081_v4 = vld [vmem:[%s2833_s5 + $0x10] sm:$0xff]  }
  0xfc   : > { %v557_v9 = vpop.f32.mrf.mxu0  ;;  %v2465_v10 = vpop.f32.mrf.mxu1  ;;  %1830 = vmatpush3.bf16.msra.mxu0 %v2081_v4 }
  0xfd   : > { %v558_v14 = vadd.f32 %v557_v9, %v2452_v0  ;;  %v712_v15 = vmax.f32 %v556_v7, 0.0  ;;  %1831 = vmatprep.subr.bf16.mxu0 %v2082_v8 }
  0xfe   : > { %v561_v16 = vpop.f32.mrf.mxu0  ;;  %v2477_v17 = vpop.f32.mrf.mxu1 }
  0xff   : > { %v713_v19 = vmax.f32 %v558_v14, 0.0  ;;  %v774_v26 = vpack.c.bf16 %v712_v15, %v710_v21  ;;  %v562_v32 = vadd.f32 %v561_v16, %v2456_v1  ;;  %v2083_v16 = vld [vmem:[%s2833_s5 + $0x8] sm:$0xff]  }
 0x100   : > { %v563_v22 = vpop.f32.mrf.mxu0  ;;  %v2482_v23 = vpop.f32.mrf.mxu1  ;;  %1832 = vmatpush3.bf16.msra.mxu0 %v2083_v16 }
 0x101   : > { %v775_v25 = vpack.c.bf16 %v713_v19, %v711_v18  ;;  %v564_v29 = vadd.f32 %v563_v22, %v2452_v0  ;;  %v714_v42 = vmax.f32 %v562_v32, 0.0 }
 0x102   : > { %v565_v27 = vpop.f32.mrf.mxu0  ;;  %v2487_v28 = vpop.f32.mrf.mxu1 }
 0x103   : > { %v566_v30 = vadd.f32 %v565_v27, %v2456_v1  ;;  %1042 = vmatprep.mubr.bf16.mxu1 %v775_v25  ;;  %v715_v39 = vmax.f32 %v564_v29, 0.0 }
 0x104   : > { %v567_v33 = vpop.f32.mrf.mxu0  ;;  %1043 = vmatmul.mubr.bf16.vlgmr.msra.gmra.mxu1 %v774_v26  ;;  %v2499_v38 = vpop.f32.mrf.mxu1 }
 0x105   : > { %v568_v35 = vadd.f32 %v567_v33, %v2452_v0  ;;  %v716_v36 = vmax.f32 %v566_v30, 0.0 }
 0x106   : > { %v571_v37 = vpop.f32.mrf.mxu0  ;;  %v2507_v48 = vpop.f32.mrf.mxu1 }
 0x107   : > { %v717_v40 = vmax.f32 %v568_v35, 0.0  ;;  %v776_v46 = vpack.c.bf16 %v716_v36, %v714_v42  ;;  %v572_v52 = vadd.f32 %v571_v37, %v2456_v1 }
 0x108   : > { %v573_v43 = vpop.f32.mrf.mxu0  ;;  %v2519_v61 = vpop.f32.mrf.mxu1 }
 0x109   : > { %v777_v45 = vpack.c.bf16 %v717_v40, %v715_v39  ;;  %v574_v49 = vadd.f32 %v573_v43, %v2452_v0  ;;  %v718_v6 = vmax.f32 %v572_v52, 0.0 }
 0x10a   : > { %v575_v47 = vpop.f32.mrf.mxu0  ;;  %v2527_v13 = vpop.f32.mrf.mxu1 }
 0x10b   : > { %v576_v50 = vadd.f32 %v575_v47, %v2456_v1  ;;  %1052 = vmatprep.mubr.bf16.mxu1 %v777_v45  ;;  %v719_v62 = vmax.f32 %v574_v49, 0.0 }
 0x10c   : > { %v577_v53 = vpop.f32.mrf.mxu0  ;;  %1053 = vmatmul.mubr.bf16.gmra.mxu1 %v776_v46  ;;  %v2536_v24 = vpop.f32.mrf.mxu1 }
 0x10d   : > { %v578_v55 = vadd.f32 %v577_v53, %v2452_v0  ;;  %v720_v56 = vmax.f32 %v576_v50, 0.0 }
 0x10e   : > { %v581_v57 = vpop.f32.mrf.mxu0  ;;  %v2538_v33 = vpop.f32.mrf.mxu1 }
 0x10f   : > { %v721_v2 = vmax.f32 %v578_v55, 0.0  ;;  %v778_v11 = vpack.c.bf16 %v720_v56, %v718_v6  ;;  %v582_v18 = vadd.f32 %v581_v57, %v2456_v1 }
 0x110   : > { %v583_v7 = vpop.f32.mrf.mxu0  ;;  %v2544_v42 = vpop.f32.mrf.mxu1 }
 0x111   : > { %v779_v9 = vpack.c.bf16 %v721_v2, %v719_v62  ;;  %v584_v14 = vadd.f32 %v583_v7, %v2452_v0  ;;  %v722_v27 = vmax.f32 %v582_v18, 0.0 }
 0x112   : > { %v585_v12 = vpop.f32.mrf.mxu0  ;;  %v2546_v51 = vpop.f32.mrf.mxu1 }
 0x113   : > { %v586_v15 = vadd.f32 %v585_v12, %v2456_v1  ;;  %1062 = vmatprep.mubr.bf16.mxu1 %v779_v9  ;;  %v723_v25 = vmax.f32 %v584_v14, 0.0 }
 0x114   : > { %v587_v19 = vpop.f32.mrf.mxu0  ;;  %1063 = vmatmul.mubr.bf16.gmra.mxu1 %v778_v11  ;;  %v2552_v2 = vpop.f32.mrf.mxu1 }
 0x115   : > { %v588_v20 = vadd.f32 %v587_v19, %v2452_v0  ;;  %v724_v21 = vmax.f32 %v586_v15, 0.0 }
 0x116   : > { %v591_v22 = vpop.f32.mrf.mxu0  ;;  %v2554_v14 = vpop.f32.mrf.mxu1 }
 0x117   : > { %v725_v26 = vmax.f32 %v588_v20, 0.0  ;;  %v780_v31 = vpack.c.bf16 %v724_v21, %v722_v27  ;;  %v592_v36 = vadd.f32 %v591_v22, %v2456_v1 }
 0x118   : > { %v593_v29 = vpop.f32.mrf.mxu0 }
 0x119   : > { %v781_v30 = vpack.c.bf16 %v725_v26, %v723_v25  ;;  %v594_v34 = vadd.f32 %v593_v29, %v2452_v0  ;;  %v726_v45 = vmax.f32 %v592_v36, 0.0  ;;  %v2560_v25 = vpop.f32.mrf.mxu1 }
 0x11a   : > { %v595_v32 = vpop.f32.mrf.mxu0 }
 0x11b   : > { %v596_v35 = vadd.f32 %v595_v32, %v2456_v1  ;;  %1072 = vmatprep.mubr.bf16.mxu1 %v781_v30  ;;  %v727_v43 = vmax.f32 %v594_v34, 0.0  ;;  %v634_v32 = vadd.f32 %v2458_v3, %v2452_v0  ;;  %v638_v34 = vadd.f32 %v2465_v10, %v2452_v0 }
 0x11c   : > { %v597_v37 = vpop.f32.mrf.mxu0  ;;  %1073 = vmatmul.mubr.bf16.gmra.mxu1 %v780_v31 }
 0x11d   : > { %v598_v39 = vadd.f32 %v597_v37, %v2452_v0  ;;  %v728_v40 = vmax.f32 %v596_v35, 0.0  ;;  %v2566_v37 = vpop.f32.mrf.mxu1  ;;  %v745_v3 = vmax.f32 %v638_v34, 0.0 }
 0x11e   : > { %v601_v41 = vpop.f32.mrf.mxu0 }
 0x11f   : > { %v729_v44 = vmax.f32 %v598_v39, 0.0  ;;  %v782_v49 = vpack.c.bf16 %v728_v40, %v726_v45  ;;  %v602_v54 = vadd.f32 %v601_v41, %v2456_v1 }
 0x120   : > { %v603_v46 = vpop.f32.mrf.mxu0 }
 0x121   : > { %v783_v47 = vpack.c.bf16 %v729_v44, %v727_v43  ;;  %v604_v52 = vadd.f32 %v603_v46, %v2452_v0  ;;  %v730_v7 = vmax.f32 %v602_v54, 0.0  ;;  %v743_v44 = vmax.f32 %v634_v32, 0.0 }
 0x122   : > { %v605_v50 = vpop.f32.mrf.mxu0  ;;  %v644_v54 = vadd.f32 %v2482_v23, %v2452_v0 }
 0x123   : > { %v606_v53 = vadd.f32 %v605_v50, %v2456_v1  ;;  %1082 = vmatprep.mubr.bf16.mxu1 %v783_v47  ;;  %v731_v4 = vmax.f32 %v604_v52, 0.0  ;;  %v677_v47 = vpop.f32.mrf.mxu1 }
 0x124   : > { %v607_v55 = vpop.f32.mrf.mxu0  ;;  %1083 = vmatmul.mubr.bf16.gmra.mxu1 %v782_v49 }
 0x125   : > { %v608_v56 = vadd.f32 %v607_v55, %v2452_v0  ;;  %v732_v57 = vmax.f32 %v606_v53, 0.0  ;;  %v791_v53 = vpack.c.bf16 %v745_v3, %v743_v44  ;;  %v648_v55 = vadd.f32 %v2499_v38, %v2452_v0 }
 0x126   : > { %v611_v62 = vpop.f32.mrf.mxu0  ;;  %v654_v38 = vadd.f32 %v2519_v61, %v2452_v0  ;;  %v664_v61 = vadd.f32 %v2544_v42, %v2452_v0  ;;  %v2085_v42 = vld [vmem:[%s2833_s5] sm:$0xff]  }
 0x127   : > { %v733_v6 = vmax.f32 %v608_v56, 0.0  ;;  %v784_v11 = vpack.c.bf16 %v732_v57, %v730_v7  ;;  %v612_v18 = vadd.f32 %v611_v62, %v2456_v1  ;;  %v632_v56 = vadd.f32 %v2448_v63, %v2456_v1 }
 0x128   : > { %v613_v8 = vpop.f32.mrf.mxu0  ;;  %v636_v62 = vadd.f32 %v2460_v5, %v2456_v1  ;;  %v749_v7 = vmax.f32 %v648_v55, 0.0  ;;  %v658_v63 = vadd.f32 %v2536_v24, %v2452_v0  ;;  %v642_v5 = vadd.f32 %v2477_v17, %v2456_v1 }
 0x129   : > { %v785_v9 = vpack.c.bf16 %v733_v6, %v731_v4  ;;  %v614_v15 = vadd.f32 %v613_v8, %v2452_v0  ;;  %v734_v29 = vmax.f32 %v612_v18, 0.0  ;;  %v2580_v4 = vpop.f32.mrf.mxu1  ;;  %v747_v6 = vmax.f32 %v644_v54, 0.0 }
 0x12a   : > { %v615_v12 = vpop.f32.mrf.mxu0  ;;  %v742_v8 = vmax.f32 %v632_v56, 0.0  ;;  %v751_v18 = vmax.f32 %v654_v38, 0.0  ;;  %v668_v24 = vadd.f32 %v2552_v2, %v2452_v0  ;;  %v652_v17 = vadd.f32 %v2507_v48, %v2456_v1 }
 0x12b   : > { %v616_v16 = vadd.f32 %v615_v12, %v2456_v1  ;;  %1092 = vmatprep.mubr.bf16.mxu1 %v785_v9  ;;  %v735_v26 = vmax.f32 %v614_v15, 0.0  ;;  %v744_v9 = vmax.f32 %v636_v62, 0.0  ;;  %v683_v23 = vpop.f32.mrf.mxu1  ;;  %v646_v15 = vadd.f32 %v2487_v28, %v2456_v1 }
 0x12c   : > { %v617_v19 = vpop.f32.mrf.mxu0  ;;  %1093 = vmatmul.mubr.bf16.gmra.mxu1 %v784_v11  ;;  %v793_v11 = vpack.c.bf16 %v749_v7, %v747_v6  ;;  %v656_v28 = vadd.f32 %v2527_v13, %v2456_v1  ;;  %v757_v32 = vmax.f32 %v668_v24, 0.0  ;;  %v750_v2 = vmax.f32 %v652_v17, 0.0 }
 0x12d   : > { %v618_v20 = vadd.f32 %v617_v19, %v2452_v0  ;;  %v736_v21 = vmax.f32 %v616_v16, 0.0  ;;  %v790_v12 = vpack.c.bf16 %v744_v9, %v742_v8  ;;  %v685_v16 = vpop.f32.mrf.mxu1  ;;  %v753_v19 = vmax.f32 %v658_v63, 0.0 }
 0x12e   : > { %v621_v22 = vpop.f32.mrf.mxu0  ;;  %v752_v34 = vmax.f32 %v656_v28, 0.0  ;;  %v674_v13 = vadd.f32 %v2560_v25, %v2452_v0  ;;  %v684_v25 = vadd.f32 %v683_v23, %v2452_v0  ;;  %v686_v9 = vadd.f32 %v685_v16, %v2456_v1 }
 0x12f   : > { %v737_v27 = vmax.f32 %v618_v20, 0.0  ;;  %v786_v35 = vpack.c.bf16 %v736_v21, %v734_v29  ;;  %v622_v41 = vadd.f32 %v621_v22, %v2456_v1  ;;  %v746_v20 = vmax.f32 %v642_v5, 0.0  ;;  %v687_v22 = vpop.f32.mrf.mxu1 }
 0x130   : > { %v623_v30 = vpop.f32.mrf.mxu0  ;;  %v748_v21 = vmax.f32 %v646_v15, 0.0  ;;  %v759_v44 = vmax.f32 %v674_v13, 0.0  ;;  %v764_v63 = vmax.f32 %v686_v9, 0.0 }
 0x131   : > { %v787_v31 = vpack.c.bf16 %v737_v27, %v735_v26  ;;  %v624_v39 = vadd.f32 %v623_v30, %v2452_v0  ;;  %v738_v50 = vmax.f32 %v622_v41, 0.0  ;;  %v795_v26 = vpack.c.bf16 %v753_v19, %v751_v18  ;;  %v691_v29 = vpop.f32.mrf.mxu1  ;;  %v2084_v30 = vld [vmem:[%s2833_s5 + $0x40] sm:$0xff]  }
 0x132   : > { %v625_v36 = vpop.f32.mrf.mxu0  ;;  %v792_v27 = vpack.c.bf16 %v748_v21, %v746_v20  ;;  %1833 = vmatprep.subr.bf16.mxu0 %v2084_v30  ;;  %v666_v41 = vadd.f32 %v2546_v51, %v2456_v1  ;;  %v676_v51 = vadd.f32 %v2566_v37, %v2456_v1  ;;  %v692_v20 = vadd.f32 %v691_v29, %v2456_v1  ;;  %v838_v29 = vld [vmem:[%s2832_s4] sm:$0x3] }
 0x133   : > { %v626_v40 = vadd.f32 %v625_v36, %v2456_v1  ;;  %1102 = vmatprep.mubr.bf16.mxu1 %v787_v31  ;;  %v739_v10 = vmax.f32 %v624_v39, 0.0  ;;  %v755_v31 = vmax.f32 %v664_v61, 0.0  ;;  %1834 = vmatpush3.bf16.msra.mxu0 %v2085_v42  ;;  %v678_v36 = vadd.f32 %v677_v47, %v2452_v0 }
 0x134   : > { %v627_v43 = vpop.f32.mrf.mxu0  ;;  %1103 = vmatmul.mubr.bf16.gmra.mxu1 %v786_v35  ;;  %v693_v35 = vpop.f32.mrf.mxu1  ;;  %v794_v39 = vpack.c.bf16 %v752_v34, %v750_v2  ;;  %v688_v47 = vadd.f32 %v687_v22, %v2452_v0  ;;  %v760_v56 = vmax.f32 %v676_v51, 0.0  ;;  %v766_v22 = vmax.f32 %v692_v20, 0.0 }
 0x135   : > { %v628_v45 = vadd.f32 %v627_v43, %v2452_v0  ;;  %v740_v46 = vmax.f32 %v626_v40, 0.0  ;;  %v797_v48 = vpack.c.bf16 %v757_v32, %v755_v31  ;;  %v662_v40 = vadd.f32 %v2538_v33, %v2456_v1 }
 0x136   : > { %v695_v43 = vpop.f32.mrf.mxu1  ;;  %v672_v33 = vadd.f32 %v2554_v14, %v2456_v1  ;;  %v765_v54 = vmax.f32 %v688_v47, 0.0  ;;  %v694_v6 = vadd.f32 %v693_v35, %v2452_v0  ;;  %v682_v14 = vadd.f32 %v2580_v4, %v2456_v1 }
 0x137   : > { %v741_v49 = vmax.f32 %v628_v45, 0.0  ;;  %v788_v57 = vpack.c.bf16 %v740_v46, %v738_v50  ;;  %v761_v45 = vmax.f32 %v678_v36, 0.0  ;;  %v754_v3 = vmax.f32 %v662_v40, 0.0 }
 0x138   : > { %v756_v46 = vmax.f32 %v666_v41, 0.0  ;;  %v758_v55 = vmax.f32 %v672_v33, 0.0  ;;  %v767_v23 = vmax.f32 %v694_v6, 0.0  ;;  %v762_v38 = vmax.f32 %v682_v14, 0.0 }
 0x139   : > { %v789_v52 = vpack.c.bf16 %v741_v49, %v739_v10  ;;  %v697_v10 = vpop.f32.mrf.mxu1  ;;  %v799_v49 = vpack.c.bf16 %v761_v45, %v759_v44  ;;  %v696_v4 = vadd.f32 %v695_v43, %v2456_v1  ;;  %v2633_v32 = vrot.slane %v838_v29, %v344_v59 }
 0x13a   : > { %v796_v50 = vpack.c.bf16 %v756_v46, %v754_v3  ;;  %v698_v7 = vadd.f32 %v697_v10, %v2452_v0  ;;  %v798_v8 = vpack.c.bf16 %v760_v56, %v758_v55  ;;  %v800_v19 = vpack.c.bf16 %v764_v63, %v762_v38 }
 0x13b   : > { %1112 = vmatprep.mubr.bf16.mxu1 %v789_v52  ;;  %v701_v52 = vpop.f32.mrf.mxu1  ;;  %v2637_v42 = vrot.slane %v838_v29, %v340_v60 }
 0x13c   : > { %1113 = vmatmul.mubr.bf16.gmra.mxu1 %v788_v57 }
 0x13d   : > { %1122 = vmatprep.mubr.bf16.mxu1 %v791_v53  ;;  %v763_v53 = vmax.f32 %v684_v25, 0.0  ;;  %v703_v57 = vpop.f32.mrf.mxu1 }
 0x13e   : > { %v704_v15 = vadd.f32 %v703_v57, %v2452_v0 }
 0x13f   : > { %v801_v62 = vpack.c.bf16 %v765_v54, %v763_v53  ;;  %v705_v37 = vpop.f32.mrf.mxu1 }
 0x140   : > { %v771_v16 = vmax.f32 %v704_v15, 0.0  ;;  %v706_v17 = vadd.f32 %v705_v37, %v2456_v1 }
 0x142   : > { %v772_v28 = vmax.f32 %v706_v17, 0.0 }
 0x144   : > { %1123 = vmatmul.mubr.bf16.gmra.mxu1 %v790_v12  ;;  %v707_v12 = vpop.f32.mrf.mxu1 }
 0x145   : > { %1132 = vmatprep.mubr.bf16.mxu1 %v793_v11  ;;  %v769_v11 = vmax.f32 %v698_v7, 0.0  ;;  %v708_v18 = vadd.f32 %v707_v12, %v2452_v0 }
 0x147   : > { %v803_v5 = vpack.c.bf16 %v769_v11, %v767_v23  ;;  %v773_v21 = vmax.f32 %v708_v18, 0.0 }
 0x149   : > { %v805_v61 = vpack.c.bf16 %v773_v21, %v771_v16 }
 0x14c   : > { %1133 = vmatmul.mubr.bf16.gmra.mxu1 %v792_v27  ;;  %v702_v27 = vadd.f32 %v701_v52, %v2456_v1 }
 0x14d   : > { %1142 = vmatprep.mubr.bf16.mxu1 %v795_v26  ;;  %v768_v26 = vmax.f32 %v696_v4, 0.0 }
 0x14e   : > { %v770_v0 = vmax.f32 %v702_v27, 0.0 }
 0x14f   : > { %v802_v24 = vpack.c.bf16 %v768_v26, %v766_v22 }
 0x150   : > { %v804_v30 = vpack.c.bf16 %v772_v28, %v770_v0 }
 0x154   : > { %1143 = vmatmul.mubr.bf16.gmra.mxu1 %v794_v39 }
 0x155   : > { %1152 = vmatprep.mubr.bf16.mxu1 %v797_v48 }
 0x15c   : > { %1153 = vmatmul.mubr.bf16.gmra.mxu1 %v796_v50 }
 0x15d   : > { %1162 = vmatprep.mubr.bf16.mxu1 %v799_v49 }
 0x164   : > { %1163 = vmatmul.mubr.bf16.gmra.mxu1 %v798_v8 }
 0x165   : > { %1172 = vmatprep.mubr.bf16.mxu1 %v801_v62 }
 0x16c   : > { %1173 = vmatmul.mubr.bf16.gmra.mxu1 %v800_v19 }
 0x16d   : > { %1182 = vmatprep.mubr.bf16.mxu1 %v803_v5 }
 0x174   : > { %1183 = vmatmul.mubr.bf16.gmra.mxu1 %v802_v24 }
 0x175   : > { %1192 = vmatprep.mubr.bf16.mxu1 %v805_v61 }
 0x17c   : > { %1193 = vmatmul.mubr.bf16.gmra.mxu1 %v804_v30 }
 0x1c4   : > { %v1044_v31 = vpop.f32.mrf.mxu1 }
 0x1c5   : > { %v1045_v48 = vadd.f32 %v1044_v31, %v2637_v42 }
 0x1c6   : > { %v1046_v1 = vpop.f32.mrf.mxu1 }
 0x1c7   : > { %v1047_v34 = vadd.f32 %v1046_v1, %v2633_v32  ;;  %v1203_v43 = vmax.f32 %v1045_v48, 0.0 }
 0x1c8   : > { %v1048_v2 = vpop.f32.mrf.mxu1 }
 0x1c9   : > { %v1049_v35 = vadd.f32 %v1048_v2, %v2637_v42  ;;  %v1204_v41 = vmax.f32 %v1047_v34, 0.0 }
 0x1ca   : > { %v1050_v13 = vpop.f32.mrf.mxu1 }
 0x1cb   : > { %v1051_v36 = vadd.f32 %v1050_v13, %v2633_v32  ;;  %v1205_v39 = vmax.f32 %v1049_v35, 0.0 }
 0x1cc   : > { %v1054_v40 = vpop.f32.mrf.mxu1 }
 0x1cd   : > { %v1206_v59 = vmax.f32 %v1051_v36, 0.0  ;;  %v1267_v60 = vpack.c.bf16 %v1205_v39, %v1203_v43  ;;  %v1055_v10 = vadd.f32 %v1054_v40, %v2637_v42 }
 0x1ce   : > { %v1056_v44 = vpop.f32.mrf.mxu1 }
 0x1cf   : > { %v1268_v58 = vpack.c.bf16 %v1206_v59, %v1204_v41  ;;  %v1057_v3 = vadd.f32 %v1056_v44, %v2633_v32  ;;  %v1207_v52 = vmax.f32 %v1055_v10, 0.0 }
 0x1d0   : > { %v1058_v45 = vpop.f32.mrf.mxu1 }
 0x1d1   : > { %v1059_v46 = vadd.f32 %v1058_v45, %v2637_v42  ;;  %1466 = vmatprep.mubr.bf16.mxu0 %v1268_v58  ;;  %v1208_v33 = vmax.f32 %v1057_v3, 0.0 }
 0x1d2   : > { %v1060_v49 = vpop.f32.mrf.mxu1  ;;  %1467 = vmatmul.mubr.bf16.vlgmr.msra.gmra.mxu0 %v1267_v60 }
 0x1d3   : > { %v1061_v25 = vadd.f32 %v1060_v49, %v2633_v32  ;;  %v1209_v47 = vmax.f32 %v1059_v46, 0.0 }
 0x1d4   : > { %v1064_v50 = vpop.f32.mrf.mxu1 }
 0x1d5   : > { %v1210_v51 = vmax.f32 %v1061_v25, 0.0  ;;  %v1269_v55 = vpack.c.bf16 %v1209_v47, %v1207_v52  ;;  %v1065_v6 = vadd.f32 %v1064_v50, %v2637_v42 }
 0x1d6   : > { %v1066_v53 = vpop.f32.mrf.mxu1 }
 0x1d7   : > { %v1270_v54 = vpack.c.bf16 %v1210_v51, %v1208_v33  ;;  %v1067_v57 = vadd.f32 %v1066_v53, %v2633_v32  ;;  %v1211_v11 = vmax.f32 %v1065_v6, 0.0 }
 0x1d8   : > { %v1068_v56 = vpop.f32.mrf.mxu1 }
 0x1d9   : > { %v1069_v62 = vadd.f32 %v1068_v56, %v2637_v42  ;;  %1474 = vmatprep.mubr.bf16.mxu0 %v1270_v54  ;;  %v1212_v37 = vmax.f32 %v1067_v57, 0.0 }
 0x1da   : > { %v1070_v7 = vpop.f32.mrf.mxu1  ;;  %1475 = vmatmul.mubr.bf16.gmra.mxu0 %v1269_v55 }
 0x1db   : > { %v1071_v8 = vadd.f32 %v1070_v7, %v2633_v32  ;;  %v1213_v14 = vmax.f32 %v1069_v62, 0.0 }
 0x1dc   : > { %v1074_v9 = vpop.f32.mrf.mxu1 }
 0x1dd   : > { %v1214_v23 = vmax.f32 %v1071_v8, 0.0  ;;  %v1271_v12 = vpack.c.bf16 %v1213_v14, %v1211_v11  ;;  %v1075_v19 = vadd.f32 %v1074_v9, %v2637_v42 }
 0x1de   : > { %v1076_v38 = vpop.f32.mrf.mxu1 }
 0x1df   : > { %v1272_v63 = vpack.c.bf16 %v1214_v23, %v1212_v37  ;;  %v1077_v15 = vadd.f32 %v1076_v38, %v2633_v32  ;;  %v1215_v61 = vmax.f32 %v1075_v19, 0.0 }
 0x1e0   : > { %v1078_v5 = vpop.f32.mrf.mxu1 }
 0x1e1   : > { %v1079_v18 = vadd.f32 %v1078_v5, %v2637_v42  ;;  %1482 = vmatprep.mubr.bf16.mxu0 %v1272_v63  ;;  %v1216_v22 = vmax.f32 %v1077_v15, 0.0 }
 0x1e2   : > { %v1080_v20 = vpop.f32.mrf.mxu1  ;;  %1483 = vmatmul.mubr.bf16.gmra.mxu0 %v1271_v12 }
 0x1e3   : > { %v1081_v4 = vadd.f32 %v1080_v20, %v2633_v32  ;;  %v1217_v16 = vmax.f32 %v1079_v18, 0.0 }
 0x1e4   : > { %v1084_v21 = vpop.f32.mrf.mxu1 }
 0x1e5   : > { %v1218_v26 = vmax.f32 %v1081_v4, 0.0  ;;  %v1273_v17 = vpack.c.bf16 %v1217_v16, %v1215_v61  ;;  %v1085_v29 = vadd.f32 %v1084_v21, %v2637_v42 }
 0x1e6   : > { %v1086_v24 = vpop.f32.mrf.mxu1 }
 0x1e7   : > { %v1274_v27 = vpack.c.bf16 %v1218_v26, %v1216_v22  ;;  %v1087_v28 = vadd.f32 %v1086_v24, %v2633_v32  ;;  %v1219_v13 = vmax.f32 %v1085_v29, 0.0 }
 0x1e8   : > { %v1088_v0 = vpop.f32.mrf.mxu1 }
 0x1e9   : > { %v1089_v30 = vadd.f32 %v1088_v0, %v2637_v42  ;;  %1490 = vmatprep.mubr.bf16.mxu0 %v1274_v27  ;;  %v1220_v35 = vmax.f32 %v1087_v28, 0.0 }
 0x1ea   : > { %v1090_v31 = vpop.f32.mrf.mxu1  ;;  %1491 = vmatmul.mubr.bf16.gmra.mxu0 %v1273_v17 }
 0x1eb   : > { %v1091_v1 = vadd.f32 %v1090_v31, %v2633_v32  ;;  %v1221_v2 = vmax.f32 %v1089_v30, 0.0 }
 0x1ec   : > { %v1094_v34 = vpop.f32.mrf.mxu1 }
 0x1ed   : > { %v1222_v48 = vmax.f32 %v1091_v1, 0.0  ;;  %v1275_v40 = vpack.c.bf16 %v1221_v2, %v1219_v13  ;;  %v1095_v44 = vadd.f32 %v1094_v34, %v2637_v42 }
 0x1ee   : > { %v1096_v36 = vpop.f32.mrf.mxu1 }
 0x1ef   : > { %v1276_v39 = vpack.c.bf16 %v1222_v48, %v1220_v35  ;;  %v1097_v59 = vadd.f32 %v1096_v36, %v2633_v32  ;;  %v1223_v49 = vmax.f32 %v1095_v44, 0.0 }
 0x1f0   : > { %v1098_v41 = vpop.f32.mrf.mxu1 }
 0x1f1   : > { %v1099_v43 = vadd.f32 %v1098_v41, %v2637_v42  ;;  %1498 = vmatprep.mubr.bf16.mxu0 %v1276_v39  ;;  %v1224_v46 = vmax.f32 %v1097_v59, 0.0 }
 0x1f2   : > { %v1100_v58 = vpop.f32.mrf.mxu1  ;;  %1499 = vmatmul.mubr.bf16.gmra.mxu0 %v1275_v40 }
 0x1f3   : > { %v1101_v60 = vadd.f32 %v1100_v58, %v2633_v32  ;;  %v1225_v45 = vmax.f32 %v1099_v43, 0.0 }
 0x1f4   : > { %v1104_v3 = vpop.f32.mrf.mxu1 }
 0x1f5   : > { %v1226_v10 = vmax.f32 %v1101_v60, 0.0  ;;  %v1277_v50 = vpack.c.bf16 %v1225_v45, %v1223_v49  ;;  %v1105_v53 = vadd.f32 %v1104_v3, %v2637_v42 }
 0x1f6   : > { %v1106_v25 = vpop.f32.mrf.mxu1 }
 0x1f7   : > { %v1278_v47 = vpack.c.bf16 %v1226_v10, %v1224_v46  ;;  %v1107_v51 = vadd.f32 %v1106_v25, %v2633_v32  ;;  %v1227_v7 = vmax.f32 %v1105_v53, 0.0 }
 0x1f8   : > { %v1108_v33 = vpop.f32.mrf.mxu1 }
 0x1f9   : > { %v1109_v52 = vadd.f32 %v1108_v33, %v2637_v42  ;;  %1506 = vmatprep.mubr.bf16.mxu0 %v1278_v47  ;;  %v1228_v62 = vmax.f32 %v1107_v51, 0.0 }
 0x1fa   : > { %v1110_v54 = vpop.f32.mrf.mxu1  ;;  %1507 = vmatmul.mubr.bf16.gmra.mxu0 %v1277_v50 }
 0x1fb   : > { %v1111_v55 = vadd.f32 %v1110_v54, %v2633_v32  ;;  %v1229_v56 = vmax.f32 %v1109_v52, 0.0 }
 0x1fc   : > { %v1114_v57 = vpop.f32.mrf.mxu1 }
 0x1fd   : > { %v1230_v6 = vmax.f32 %v1111_v55, 0.0  ;;  %v1279_v9 = vpack.c.bf16 %v1229_v56, %v1227_v7  ;;  %v1115_v38 = vadd.f32 %v1114_v57, %v2637_v42 }
 0x1fe   : > { %v1116_v8 = vpop.f32.mrf.mxu1 }
 0x1ff   : > { %v1280_v14 = vpack.c.bf16 %v1230_v6, %v1228_v62  ;;  %v1117_v23 = vadd.f32 %v1116_v8, %v2633_v32  ;;  %v1231_v20 = vmax.f32 %v1115_v38, 0.0 }
 0x200   : > { %v1118_v37 = vpop.f32.mrf.mxu1 }
 0x201   : > { %v1119_v11 = vadd.f32 %v1118_v37, %v2637_v42  ;;  %1514 = vmatprep.mubr.bf16.mxu0 %v1280_v14  ;;  %v1232_v18 = vmax.f32 %v1117_v23, 0.0 }
 0x202   : > { %v1120_v63 = vpop.f32.mrf.mxu1  ;;  %1515 = vmatmul.mubr.bf16.gmra.mxu0 %v1279_v9 }
 0x203   : > { %v1121_v12 = vadd.f32 %v1120_v63, %v2633_v32  ;;  %v1233_v5 = vmax.f32 %v1119_v11, 0.0 }
 0x204   : > { %v1124_v15 = vpop.f32.mrf.mxu1 }
 0x205   : > { %v1234_v19 = vmax.f32 %v1121_v12, 0.0  ;;  %v1281_v21 = vpack.c.bf16 %v1233_v5, %v1231_v20  ;;  %v1125_v24 = vadd.f32 %v1124_v15, %v2637_v42 }
 0x206   : > { %v1126_v4 = vpop.f32.mrf.mxu1 }
 0x207   : > { %v1282_v16 = vpack.c.bf16 %v1234_v19, %v1232_v18  ;;  %v1127_v26 = vadd.f32 %v1126_v4, %v2633_v32  ;;  %v1235_v31 = vmax.f32 %v1125_v24, 0.0 }
 0x208   : > { %v1128_v22 = vpop.f32.mrf.mxu1 }
 0x209   : > { %v1129_v61 = vadd.f32 %v1128_v22, %v2637_v42  ;;  %1522 = vmatprep.mubr.bf16.mxu0 %v1282_v16  ;;  %v1236_v30 = vmax.f32 %v1127_v26, 0.0 }
 0x20a   : > { %v1130_v27 = vpop.f32.mrf.mxu1  ;;  %1523 = vmatmul.mubr.bf16.gmra.mxu0 %v1281_v21 }
 0x20b   : > { %v1131_v17 = vadd.f32 %v1130_v27, %v2633_v32  ;;  %v1237_v0 = vmax.f32 %v1129_v61, 0.0 }
 0x20c   : > { %v1134_v28 = vpop.f32.mrf.mxu1 }
 0x20d   : > { %v1238_v29 = vmax.f32 %v1131_v17, 0.0  ;;  %v1283_v34 = vpack.c.bf16 %v1237_v0, %v1235_v31  ;;  %v1135_v36 = vadd.f32 %v1134_v28, %v2637_v42 }
 0x20e   : > { %v1136_v1 = vpop.f32.mrf.mxu1 }
 0x20f   : > { %v1284_v2 = vpack.c.bf16 %v1238_v29, %v1236_v30  ;;  %v1137_v48 = vadd.f32 %v1136_v1, %v2633_v32  ;;  %v1239_v58 = vmax.f32 %v1135_v36, 0.0 }
 0x210   : > { %v1138_v35 = vpop.f32.mrf.mxu1 }
 0x211   : > { %v1139_v13 = vadd.f32 %v1138_v35, %v2637_v42  ;;  %1530 = vmatprep.mubr.bf16.mxu0 %v1284_v2  ;;  %v1240_v43 = vmax.f32 %v1137_v48, 0.0 }
 0x212   : > { %v1140_v39 = vpop.f32.mrf.mxu1  ;;  %1531 = vmatmul.mubr.bf16.gmra.mxu0 %v1283_v34 }
 0x213   : > { %v1141_v40 = vadd.f32 %v1140_v39, %v2633_v32  ;;  %v1241_v41 = vmax.f32 %v1139_v13, 0.0 }
 0x214   : > { %v1144_v59 = vpop.f32.mrf.mxu1 }
 0x215   : > { %v1242_v44 = vmax.f32 %v1141_v40, 0.0  ;;  %v1285_v3 = vpack.c.bf16 %v1241_v41, %v1239_v58  ;;  %v1145_v25 = vadd.f32 %v1144_v59, %v2637_v42 }
 0x216   : > { %v1146_v60 = vpop.f32.mrf.mxu1 }
 0x217   : > { %v1286_v45 = vpack.c.bf16 %v1242_v44, %v1240_v43  ;;  %v1147_v10 = vadd.f32 %v1146_v60, %v2633_v32  ;;  %v1243_v54 = vmax.f32 %v1145_v25, 0.0 }
 0x218   : > { %v1148_v46 = vpop.f32.mrf.mxu1 }
 0x219   : > { %v1149_v49 = vadd.f32 %v1148_v46, %v2637_v42  ;;  %1538 = vmatprep.mubr.bf16.mxu0 %v1286_v45  ;;  %v1244_v52 = vmax.f32 %v1147_v10, 0.0 }
 0x21a   : > { %v1150_v47 = vpop.f32.mrf.mxu1  ;;  %1539 = vmatmul.mubr.bf16.gmra.mxu0 %v1285_v3 }
 0x21b   : > { %v1151_v50 = vadd.f32 %v1150_v47, %v2633_v32  ;;  %v1245_v33 = vmax.f32 %v1149_v49, 0.0 }
 0x21c   : > { %v1154_v51 = vpop.f32.mrf.mxu1 }
 0x21d   : > { %v1246_v53 = vmax.f32 %v1151_v50, 0.0  ;;  %v1287_v57 = vpack.c.bf16 %v1245_v33, %v1243_v54  ;;  %v1155_v8 = vadd.f32 %v1154_v51, %v2637_v42 }
 0x21e   : > { %v1156_v55 = vpop.f32.mrf.mxu1 }
 0x21f   : > { %v1288_v56 = vpack.c.bf16 %v1246_v53, %v1244_v52  ;;  %v1157_v6 = vadd.f32 %v1156_v55, %v2633_v32  ;;  %v1247_v63 = vmax.f32 %v1155_v8, 0.0 }
 0x220   : > { %v1158_v62 = vpop.f32.mrf.mxu1 }
 0x221   : > { %v1159_v7 = vadd.f32 %v1158_v62, %v2637_v42  ;;  %1546 = vmatprep.mubr.bf16.mxu0 %v1288_v56  ;;  %v1248_v11 = vmax.f32 %v1157_v6, 0.0 }
 0x222   : > { %v1160_v14 = vpop.f32.mrf.mxu1  ;;  %1547 = vmatmul.mubr.bf16.gmra.mxu0 %v1287_v57 }
 0x223   : > { %v1161_v9 = vadd.f32 %v1160_v14, %v2633_v32  ;;  %v1249_v37 = vmax.f32 %v1159_v7, 0.0 }
 0x224   : > { %v1164_v23 = vpop.f32.mrf.mxu1 }
 0x225   : > { %v1250_v38 = vmax.f32 %v1161_v9, 0.0  ;;  %v1289_v15 = vpack.c.bf16 %v1249_v37, %v1247_v63  ;;  %v1165_v4 = vadd.f32 %v1164_v23, %v2637_v42 }
 0x226   : > { %v1166_v12 = vpop.f32.mrf.mxu1 }
 0x227   : > { %v1290_v5 = vpack.c.bf16 %v1250_v38, %v1248_v11  ;;  %v1167_v19 = vadd.f32 %v1166_v12, %v2633_v32  ;;  %v1251_v27 = vmax.f32 %v1165_v4, 0.0 }
 0x228   : > { %v1168_v18 = vpop.f32.mrf.mxu1 }
 0x229   : > { %v1169_v20 = vadd.f32 %v1168_v18, %v2637_v42  ;;  %1554 = vmatprep.mubr.bf16.mxu0 %v1290_v5  ;;  %v1252_v61 = vmax.f32 %v1167_v19, 0.0 }
 0x22a   : > { %v1170_v16 = vpop.f32.mrf.mxu1  ;;  %1555 = vmatmul.mubr.bf16.gmra.mxu0 %v1289_v15 }
 0x22b   : > { %v1171_v21 = vadd.f32 %v1170_v16, %v2633_v32  ;;  %v1253_v22 = vmax.f32 %v1169_v20, 0.0 }
 0x22c   : > { %v1174_v26 = vpop.f32.mrf.mxu1 }
 0x22d   : > { %v1254_v24 = vmax.f32 %v1171_v21, 0.0  ;;  %v1291_v28 = vpack.c.bf16 %v1253_v22, %v1251_v27  ;;  %v1175_v1 = vadd.f32 %v1174_v26, %v2637_v42 }
 0x22e   : > { %v1176_v17 = vpop.f32.mrf.mxu1 }
 0x22f   : > { %v1292_v0 = vpack.c.bf16 %v1254_v24, %v1252_v61  ;;  %v1177_v29 = vadd.f32 %v1176_v17, %v2633_v32  ;;  %v1255_v39 = vmax.f32 %v1175_v1, 0.0 }
 0x230   : > { %v1178_v30 = vpop.f32.mrf.mxu1 }
 0x231   : > { %v1179_v31 = vadd.f32 %v1178_v30, %v2637_v42  ;;  %1562 = vmatprep.mubr.bf16.mxu0 %v1292_v0  ;;  %v1256_v13 = vmax.f32 %v1177_v29, 0.0 }
 0x232   : > { %v1180_v2 = vpop.f32.mrf.mxu1  ;;  %1563 = vmatmul.mubr.bf16.gmra.mxu0 %v1291_v28 }
 0x233   : > { %v1181_v34 = vadd.f32 %v1180_v2, %v2633_v32  ;;  %v1257_v35 = vmax.f32 %v1179_v31, 0.0 }
 0x234   : > { %v1184_v48 = vpop.f32.mrf.mxu1 }
 0x235   : > { %v1258_v36 = vmax.f32 %v1181_v34, 0.0  ;;  %v1293_v59 = vpack.c.bf16 %v1257_v35, %v1255_v39  ;;  %v1185_v60 = vadd.f32 %v1184_v48, %v2637_v42 }
 0x236   : > { %v1186_v40 = vpop.f32.mrf.mxu1 }
 0x237   : > { %v1294_v41 = vpack.c.bf16 %v1258_v36, %v1256_v13  ;;  %v1187_v44 = vadd.f32 %v1186_v40, %v2633_v32  ;;  %v1259_v47 = vmax.f32 %v1185_v60, 0.0 }
 0x238   : > { %v1188_v43 = vpop.f32.mrf.mxu1 }
 0x239   : > { %v1189_v58 = vadd.f32 %v1188_v43, %v2637_v42  ;;  %1570 = vmatprep.mubr.bf16.mxu0 %v1294_v41  ;;  %v1260_v49 = vmax.f32 %v1187_v44, 0.0 }
 0x23a   : > { %v1190_v45 = vpop.f32.mrf.mxu1  ;;  %1571 = vmatmul.mubr.bf16.gmra.mxu0 %v1293_v59 }
 0x23b   : > { %v1191_v3 = vadd.f32 %v1190_v45, %v2633_v32  ;;  %v1261_v46 = vmax.f32 %v1189_v58, 0.0 }
 0x23c   : > { %v1194_v10 = vpop.f32.mrf.mxu1 }
 0x23d   : > { %v1262_v25 = vmax.f32 %v1191_v3, 0.0  ;;  %v1295_v51 = vpack.c.bf16 %v1261_v46, %v1259_v47  ;;  %v1195_v55 = vadd.f32 %v1194_v10, %v2637_v42 }
 0x23e   : > { %v1196_v50 = vpop.f32.mrf.mxu1 }
 0x23f   : > { %v1296_v33 = vpack.c.bf16 %v1262_v25, %v1260_v49  ;;  %v1197_v53 = vadd.f32 %v1196_v50, %v2633_v32  ;;  %v1263_v8 = vmax.f32 %v1195_v55, 0.0 }
 0x240   : > { %v1198_v52 = vpop.f32.mrf.mxu1 }
 0x241   : > { %v1199_v54 = vadd.f32 %v1198_v52, %v2637_v42  ;;  %1578 = vmatprep.mubr.bf16.mxu0 %v1296_v33  ;;  %v1264_v6 = vmax.f32 %v1197_v53, 0.0  ;;  %v2709_v42 = vld [vmem:[%s2834_s6] ss:$0 sm:$0xff] }
 0x242   : > { %v1200_v56 = vpop.f32.mrf.mxu1  ;;  %1579 = vmatmul.mubr.bf16.gmra.mxu0 %v1295_v51 }
 0x243   : > { %v1201_v57 = vadd.f32 %v1200_v56, %v2633_v32  ;;  %v1265_v62 = vmax.f32 %v1199_v54, 0.0 }
 0x245   : > { %v1266_v7 = vmax.f32 %v1201_v57, 0.0  ;;  %v1297_v9 = vpack.c.bf16 %v1265_v62, %v1263_v8 }
 0x247   : > { %v1298_v14 = vpack.c.bf16 %v1266_v7, %v1264_v6 }
 0x249   : > { %1586 = vmatprep.mubr.bf16.mxu0 %v1298_v14 }
 0x24a   : > { %1587 = vmatmul.mubr.bf16.gmra.mxu0 %v1297_v9 }
 0x292   : > { %v1835_v37 = vpop.f32.mrf.mxu0 }
 0x294   : > { %v1836_v23 = vpop.f32.mrf.mxu0 }
 0x295   : > { %v1837_v11 = vadd.f32 %v1836_v23, %v1835_v37 }
 0x296   : > { %v1838_v32 = vpop.f32.mrf.mxu0 }
 0x297   : > { %v1469_v38 = vadd.f32 %v1837_v11, %v2709_v42 }
 0x298   : > { %v1839_v63 = vpop.f32.mrf.mxu0 }
 0x299   : > { %1595 = vst [vmem:[%s2712_s21] sm:$0xff] %v1469_v38  ;;  %v1840_v12 = vadd.f32 %v1839_v63, %v1838_v32 }
 0x29a   : > { %v1841_v5 = vpop.f32.mrf.mxu0 }
 0x29b   : > { %v1472_v15 = vadd.f32 %v1840_v12, %v2709_v42 }
 0x29c   : > { %v1842_v18 = vpop.f32.mrf.mxu0 }
 0x29d   : > { %1596 = vst [vmem:[%s2712_s21 + $0x8] sm:$0xff] %v1472_v15  ;;  %v1843_v19 = vadd.f32 %v1842_v18, %v1841_v5 }
 0x29e   : > { %v1844_v20 = vpop.f32.mrf.mxu0 }
 0x29f   : > { %v1477_v4 = vadd.f32 %v1843_v19, %v2709_v42 }
 0x2a0   : > { %v1845_v16 = vpop.f32.mrf.mxu0 }
 0x2a1   : > { %1597 = vst [vmem:[%s2712_s21 + $0x10] sm:$0xff] %v1477_v4  ;;  %v1846_v21 = vadd.f32 %v1845_v16, %v1844_v20 }
 0x2a2   : > { %v1847_v22 = vpop.f32.mrf.mxu0 }
 0x2a3   : > { %v1480_v26 = vadd.f32 %v1846_v21, %v2709_v42 }
 0x2a4   : > { %v1848_v61 = vpop.f32.mrf.mxu0 }
 0x2a5   : > { %1598 = vst [vmem:[%s2712_s21 + $0x18] sm:$0xff] %v1480_v26  ;;  %v1849_v24 = vadd.f32 %v1848_v61, %v1847_v22 }
 0x2a6   : > { %v1850_v27 = vpop.f32.mrf.mxu0 }
 0x2a7   : > { %v1485_v17 = vadd.f32 %v1849_v24, %v2709_v42 }
 0x2a8   : > { %v1851_v0 = vpop.f32.mrf.mxu0 }
 0x2a9   : > { %1599 = vst [vmem:[%s2712_s21 + $0x20] sm:$0xff] %v1485_v17  ;;  %v1852_v28 = vadd.f32 %v1851_v0, %v1850_v27 }
 0x2aa   : > { %v1853_v30 = vpop.f32.mrf.mxu0 }
 0x2ab   : > { %v1488_v29 = vadd.f32 %v1852_v28, %v2709_v42 }
 0x2ac   : > { %v1854_v31 = vpop.f32.mrf.mxu0 }
 0x2ad   : > { %1600 = vst [vmem:[%s2712_s21 + $0x28] sm:$0xff] %v1488_v29  ;;  %v1855_v1 = vadd.f32 %v1854_v31, %v1853_v30 }
 0x2ae   : > { %v1856_v2 = vpop.f32.mrf.mxu0 }
 0x2af   : > { %v1493_v34 = vadd.f32 %v1855_v1, %v2709_v42 }
 0x2b0   : > { %v1857_v35 = vpop.f32.mrf.mxu0 }
 0x2b1   : > { %1601 = vst [vmem:[%s2712_s21 + $0x30] sm:$0xff] %v1493_v34  ;;  %v1858_v48 = vadd.f32 %v1857_v35, %v1856_v2 }
 0x2b2   : > { %v1859_v13 = vpop.f32.mrf.mxu0 }
 0x2b3   : > { %v1496_v36 = vadd.f32 %v1858_v48, %v2709_v42 }
 0x2b4   : > { %v1860_v39 = vpop.f32.mrf.mxu0 }
 0x2b5   : > { %1602 = vst [vmem:[%s2712_s21 + $0x38] sm:$0xff] %v1496_v36  ;;  %v1861_v40 = vadd.f32 %v1860_v39, %v1859_v13 }
 0x2b6   : > { %v1862_v41 = vpop.f32.mrf.mxu0 }
 0x2b7   : > { %v1501_v59 = vadd.f32 %v1861_v40, %v2709_v42 }
 0x2b8   : > { %v1863_v43 = vpop.f32.mrf.mxu0 }
 0x2b9   : > { %1603 = vst [vmem:[%s2712_s21 + $0x40] sm:$0xff] %v1501_v59  ;;  %v1864_v44 = vadd.f32 %v1863_v43, %v1862_v41 }
 0x2ba   : > { %v1865_v58 = vpop.f32.mrf.mxu0 }
 0x2bb   : > { %v1504_v60 = vadd.f32 %v1864_v44, %v2709_v42 }
 0x2bc   : > { %v1866_v45 = vpop.f32.mrf.mxu0 }
 0x2bd   : > { %1604 = vst [vmem:[%s2712_s21 + $0x48] sm:$0xff] %v1504_v60  ;;  %v1867_v3 = vadd.f32 %v1866_v45, %v1865_v58 }
 0x2be   : > { %v1868_v46 = vpop.f32.mrf.mxu0 }
 0x2bf   : > { %v1509_v10 = vadd.f32 %v1867_v3, %v2709_v42 }
 0x2c0   : > { %v1869_v49 = vpop.f32.mrf.mxu0 }
 0x2c1   : > { %1605 = vst [vmem:[%s2712_s21 + $0x50] sm:$0xff] %v1509_v10  ;;  %v1870_v25 = vadd.f32 %v1869_v49, %v1868_v46 }
 0x2c2   : > { %v1871_v47 = vpop.f32.mrf.mxu0 }
 0x2c3   : > { %v1512_v50 = vadd.f32 %v1870_v25, %v2709_v42 }
 0x2c4   : > { %v1872_v33 = vpop.f32.mrf.mxu0 }
 0x2c5   : > { %1606 = vst [vmem:[%s2712_s21 + $0x58] sm:$0xff] %v1512_v50  ;;  %v1873_v51 = vadd.f32 %v1872_v33, %v1871_v47 }
 0x2c6   : > { %v1874_v52 = vpop.f32.mrf.mxu0 }
 0x2c7   : > { %v1517_v53 = vadd.f32 %v1873_v51, %v2709_v42 }
 0x2c8   : > { %v1875_v54 = vpop.f32.mrf.mxu0 }
 0x2c9   : > { %1607 = vst [vmem:[%s2712_s21 + $0x60] sm:$0xff] %v1517_v53  ;;  %v1876_v55 = vadd.f32 %v1875_v54, %v1874_v52 }
 0x2ca   : > { %v1877_v56 = vpop.f32.mrf.mxu0 }
 0x2cb   : > { %v1520_v57 = vadd.f32 %v1876_v55, %v2709_v42 }
 0x2cc   : > { %v1878_v62 = vpop.f32.mrf.mxu0 }
 0x2cd   : > { %1608 = vst [vmem:[%s2712_s21 + $0x68] sm:$0xff] %v1520_v57  ;;  %v1879_v6 = vadd.f32 %v1878_v62, %v1877_v56 }
 0x2ce   : > { %v1880_v7 = vpop.f32.mrf.mxu0 }
 0x2cf   : > { %v1525_v8 = vadd.f32 %v1879_v6, %v2709_v42 }
 0x2d0   : > { %v1881_v14 = vpop.f32.mrf.mxu0 }
 0x2d1   : > { %1609 = vst [vmem:[%s2712_s21 + $0x70] sm:$0xff] %v1525_v8  ;;  %v1882_v9 = vadd.f32 %v1881_v14, %v1880_v7 }
 0x2d2   : > { %v1883_v37 = vpop.f32.mrf.mxu0 }
 0x2d3   : > { %v1528_v23 = vadd.f32 %v1882_v9, %v2709_v42 }
 0x2d4   : > { %v1884_v11 = vpop.f32.mrf.mxu0 }
 0x2d5   : > { %1610 = vst [vmem:[%s2712_s21 + $0x78] sm:$0xff] %v1528_v23  ;;  %v1885_v32 = vadd.f32 %v1884_v11, %v1883_v37 }
 0x2d6   : > { %v1886_v38 = vpop.f32.mrf.mxu0 }
 0x2d7   : > { %v1533_v63 = vadd.f32 %v1885_v32, %v2709_v42 }
 0x2d8   : > { %v1887_v12 = vpop.f32.mrf.mxu0 }
 0x2d9   : > { %1611 = vst [vmem:[%s2712_s21 + $0x80] sm:$0xff] %v1533_v63  ;;  %v1888_v5 = vadd.f32 %v1887_v12, %v1886_v38 }
 0x2da   : > { %v1889_v15 = vpop.f32.mrf.mxu0 }
 0x2db   : > { %v1536_v18 = vadd.f32 %v1888_v5, %v2709_v42 }
 0x2dc   : > { %v1890_v19 = vpop.f32.mrf.mxu0 }
 0x2dd   : > { %1612 = vst [vmem:[%s2712_s21 + $0x88] sm:$0xff] %v1536_v18  ;;  %v1891_v20 = vadd.f32 %v1890_v19, %v1889_v15 }
 0x2de   : > { %v1892_v4 = vpop.f32.mrf.mxu0 }
 0x2df   : > { %v1541_v16 = vadd.f32 %v1891_v20, %v2709_v42 }
 0x2e0   : > { %v1893_v21 = vpop.f32.mrf.mxu0 }
 0x2e1   : > { %1613 = vst [vmem:[%s2712_s21 + $0x90] sm:$0xff] %v1541_v16  ;;  %v1894_v22 = vadd.f32 %v1893_v21, %v1892_v4 }
 0x2e2   : > { %v1895_v26 = vpop.f32.mrf.mxu0 }
 0x2e3   : > { %v1544_v61 = vadd.f32 %v1894_v22, %v2709_v42 }
 0x2e4   : > { %v1896_v24 = vpop.f32.mrf.mxu0 }
 0x2e5   : > { %1614 = vst [vmem:[%s2712_s21 + $0x98] sm:$0xff] %v1544_v61  ;;  %v1897_v27 = vadd.f32 %v1896_v24, %v1895_v26 }
 0x2e6   : > { %v1898_v17 = vpop.f32.mrf.mxu0 }
 0x2e7   : > { %v1549_v0 = vadd.f32 %v1897_v27, %v2709_v42 }
 0x2e8   : > { %v1899_v28 = vpop.f32.mrf.mxu0 }
 0x2e9   : > { %1615 = vst [vmem:[%s2712_s21 + $0xa0] sm:$0xff] %v1549_v0  ;;  %v1900_v30 = vadd.f32 %v1899_v28, %v1898_v17 }
 0x2ea   : > { %v1901_v29 = vpop.f32.mrf.mxu0 }
 0x2eb   : > { %v1552_v31 = vadd.f32 %v1900_v30, %v2709_v42 }
 0x2ec   : > { %v1902_v1 = vpop.f32.mrf.mxu0 }
 0x2ed   : > { %1616 = vst [vmem:[%s2712_s21 + $0xa8] sm:$0xff] %v1552_v31  ;;  %v1903_v2 = vadd.f32 %v1902_v1, %v1901_v29 }
 0x2ee   : > { %v1904_v34 = vpop.f32.mrf.mxu0 }
 0x2ef   : > { %v1557_v35 = vadd.f32 %v1903_v2, %v2709_v42 }
 0x2f0   : > { %v1905_v48 = vpop.f32.mrf.mxu0 }
 0x2f1   : > { %1617 = vst [vmem:[%s2712_s21 + $0xb0] sm:$0xff] %v1557_v35  ;;  %v1906_v13 = vadd.f32 %v1905_v48, %v1904_v34 }
 0x2f2   : > { %v1907_v36 = vpop.f32.mrf.mxu0 }
 0x2f3   : > { %v1560_v39 = vadd.f32 %v1906_v13, %v2709_v42 }
 0x2f4   : > { %v1908_v40 = vpop.f32.mrf.mxu0 }
 0x2f5   : > { %1618 = vst [vmem:[%s2712_s21 + $0xb8] sm:$0xff] %v1560_v39  ;;  %v1909_v41 = vadd.f32 %v1908_v40, %v1907_v36 }
 0x2f6   : > { %v1910_v59 = vpop.f32.mrf.mxu0 }
 0x2f7   : > { %v1565_v43 = vadd.f32 %v1909_v41, %v2709_v42 }
 0x2f8   : > { %v1911_v44 = vpop.f32.mrf.mxu0 }
 0x2f9   : > { %1619 = vst [vmem:[%s2712_s21 + $0xc0] sm:$0xff] %v1565_v43  ;;  %v1912_v58 = vadd.f32 %v1911_v44, %v1910_v59 }
 0x2fa   : > { %v1913_v60 = vpop.f32.mrf.mxu0 }
 0x2fb   : > { %v1568_v45 = vadd.f32 %v1912_v58, %v2709_v42 }
 0x2fc   : > { %v1914_v3 = vpop.f32.mrf.mxu0 }
 0x2fd   : > { %1620 = vst [vmem:[%s2712_s21 + $0xc8] sm:$0xff] %v1568_v45  ;;  %v1915_v46 = vadd.f32 %v1914_v3, %v1913_v60 }
 0x2fe   : > { %v1916_v10 = vpop.f32.mrf.mxu0 }
 0x2ff   : > { %v1573_v49 = vadd.f32 %v1915_v46, %v2709_v42 }
 0x300   : > { %v1917_v25 = vpop.f32.mrf.mxu0 }
 0x301   : > { %1621 = vst [vmem:[%s2712_s21 + $0xd0] sm:$0xff] %v1573_v49  ;;  %v1918_v47 = vadd.f32 %v1917_v25, %v1916_v10 }
 0x302   : > { %v1919_v50 = vpop.f32.mrf.mxu0 }
 0x303   : > { %v1576_v33 = vadd.f32 %v1918_v47, %v2709_v42 }
 0x304   : > { %v1920_v51 = vpop.f32.mrf.mxu0 }
 0x305   : > { %1622 = vst [vmem:[%s2712_s21 + $0xd8] sm:$0xff] %v1576_v33  ;;  %v1921_v52 = vadd.f32 %v1920_v51, %v1919_v50 }
 0x306   : > { %v1922_v53 = vpop.f32.mrf.mxu0 }
 0x307   : > { %v1581_v54 = vadd.f32 %v1921_v52, %v2709_v42 }
 0x308   : > { %v1923_v55 = vpop.f32.mrf.mxu0 }
 0x309   : > { %1623 = vst [vmem:[%s2712_s21 + $0xe0] sm:$0xff] %v1581_v54  ;;  %v1924_v56 = vadd.f32 %v1923_v55, %v1922_v53 }
 0x30a   : > { %v1925_v57 = vpop.f32.mrf.mxu0 }
 0x30b   : > { %v1584_v62 = vadd.f32 %v1924_v56, %v2709_v42 }
 0x30c   : > { %v1926_v6 = vpop.f32.mrf.mxu0 }
 0x30d   : > { %1624 = vst [vmem:[%s2712_s21 + $0xe8] sm:$0xff] %v1584_v62  ;;  %v1927_v7 = vadd.f32 %v1926_v6, %v1925_v57 }
 0x30e   : > { %v1928_v8 = vpop.f32.mrf.mxu0 }
 0x30f   : > { %v1589_v14 = vadd.f32 %v1927_v7, %v2709_v42 }
 0x310   : > { %v1929_v9 = vpop.f32.mrf.mxu0 }
 0x311   : > { %1625 = vst [vmem:[%s2712_s21 + $0xf0] sm:$0xff] %v1589_v14  ;;  %v1930_v37 = vadd.f32 %v1929_v9, %v1928_v8 }
 0x313   : > { %v1592_v23 = vadd.f32 %v1930_v37, %v2709_v42 }
 0x315   : > { %1626 = vst [vmem:[%s2712_s21 + $0xf8] sm:$0xff] %v1592_v23 }
 0x316   : > { %2125 = shalt.err (!%p2122_p0)
}
 0x317   : > { %s2126_s8 = scalar_lea.hbm %s2780_s13, 4096  ;;  %s2130_s20 = scalar_lea.hbm %s2835_s7, 8192 }
 0x318   : > { %p2127_p1 = scmp.ne.s32.totalorder %s2780_s13, %s2126_s8  ;;  %p2131_p4 = scmp.lt.s32.totalorder %s2780_s13, %s2835_s7 }
 0x319   : > { %p2132_p7 = scmp.lt.s32.totalorder %s2130_s20, %s2126_s8 }
 0x31a   : > { %p2128_p2 = pnand %p2127_p1, %p2263_p5 }
 0x31b   : > { %p2133_p6 = por %p2132_p7, %p2131_p4 }
 0x31c   : > { %p2129_p3 = pneg %p2128_p2 }
 0x31e   : > { %p2134_p8 = pnand %p2133_p6, %p2129_p3 }
 0x320   : > { %2137 = shalt.err (!%p2134_p8)
}
 0x321   : > { %s2183_s29 = smov 128   ;;  %s2184_s9 = smov 8  }
 0x322   : > { %1943 = dma.vmem_to_hbm [thread:$0]  (%p2263_p5), %s2782_s23, 4096, %s2780_s13, %s2788_s14, %s2183_s29, %s2183_s29, %s2184_s9  }
 0x323 PF: > { %p1955_p9 = scmp.ge.s32.totalorder %s2176_s27, 2  ;;  %s1656_s28 = sand.u32 1, %s2164_s24  }
 0x324   : > { %p2839_p10 = scmp.ne.s32.totalorder %s2837_s12, 0  ;;  %s1657_s15 = scalar_lea.sflag [#allocation4], %s1656_s28 }
 0x326   : > { %p1950_p11 = pnand %p1955_p9, %p2839_p10 }
 0x328   : > { %p1951_p12 = pneg %p1950_p11 }
 0x32a   : > { %2159 = dma.done.wait (%p1951_p12), %s1657_s15, 4096  }
 0x32b   : > { %2161 = vsyncadd (%p1951_p12), %s1657_s15, 4294963200  ;;  %p18_p13 = scmp.ge.s32.totalorder %s2250_s30, 4   ;;  %s2840_s24 = smov %s2168_s25 }
 0x32c   : > { %s2841_s25 = smov %s2172_s26  ;;  %s2842_s26 = smov %s2261_s10 }
 0x32d   : > { %s2843_s27 = smov %s2250_s30  ;;  %20 = sbr.rel (!%p18_p13) target bundleno = 4 (0x4), region = 88 }
 0x332   :  { %1662 = vsyncpa [#allocation3], 1 }
 0x333   :  { %1664 = vsyncpa [#allocation3 + $0x1], 1 }
 0x334   :  { %1665 = vsyncpa [#allocation4], 1 }
 0x335   :  { %1667 = vsyncpa [#allocation4 + $0x1], 1 }

// kernel: tpu_custom_call.1
= control target key start
LH: loop header
LB: loop body
LE: loop exit
PB: predicated region body
PF: predicated region fallthrough
CT: control target
= control target key end

     0   :  { %12 = vsyncpa [#allocation3], 0  ;;  %s2828_s0 = inlined_call_operand.vmem [shape: bf16[512,64], index: 0, kind: input, shape index: {}]   ;;  %s2829_s1 = inlined_call_operand.hbm [shape: bf16[64,256], index: 1, kind: input, shape index: {}]   ;;  %s2830_s2 = inlined_call_operand.vmem [shape: f32[1,256], index: 2, kind: input, shape index: {}]   ;;  %s2831_s3 = inlined_call_operand.vmem [shape: bf16[256,256], index: 3, kind: input, shape index: {}]   ;;  %s2832_s4 = inlined_call_operand.vmem [shape: f32[1,256], index: 4, kind: input, shape index: {}]   ;;  %s2833_s5 = inlined_call_operand.vmem [shape: bf16[256,128], index: 5, kind: input, shape index: {}]   ;;  %s2834_s6 = inlined_call_operand.vmem [shape: f32[1,128], index: 6, kind: input, shape index: {}]   ;;  %s2835_s7 = inlined_call_operand.hbm [shape: f32[512,128], index: 7, kind: output, shape index: {}]  }
   0x1   :  { %13 = vsyncpa [#allocation4], 0 }
   0x2   :  { %15 = vsyncpa [#allocation4 + $0x1], 0  ;;  %s2225_s24 = smov 0   ;;  %s2227_s25 = smov 0  }
   0x3   :  { %s2229_s26 = smov 0   ;;  %s2231_s27 = smov 0  }
   0x4 LB: > { %s2246_s28 = sadd.s32 4294967295, %s2176_s27   ;;  %s1715_s29 = sadd.s32 4294967294, %s2176_s27   ;;  %s2176_s27 = sphi %s2231_s27, %s2843_s27   ;;  %s2172_s26 = sphi %s2229_s26, %s2842_s26   ;;  %s2168_s25 = sphi %s2227_s25, %s2841_s25   ;;  %s2164_s24 = sphi %s2225_s24, %s2840_s24  }
   0x5   : > { %s2250_s30 = sadd.s32 1, %s2176_s27   ;;  %s180_s8 = sadd.s32 1, %s2172_s26 }
   0x6   : > { %s177_s9 = ssub.s32 %s2176_s27, %s2250_s30  ;;  %p190_p0 = scmp.ne.s32.totalorder %s2172_s26, %s2168_s25 }
   0x7   : > { %p178_p1 = scmp.eq.s32.totalorder %s177_s9, 0  ;;  %p191_p2 = scmp.eq.s32.totalorder %s2246_s28, 1 }
   0x8   : > { %p196_p3 = scmp.ne.s32.totalorder %s2168_s25, %s2164_s24  ;;  %p197_p4 = scmp.eq.s32.totalorder %s1715_s29, 1 }
   0x9   : > { %s2261_s10 = scalar_select %p178_p1, %s2172_s26, %s180_s8  }
   0xa   : > { %p2263_p5 = por %p191_p2, %p190_p0  ;;  %p2267_p6 = por %p197_p4, %p196_p3 }
   0xb   : > { %p1716_p7 = scmp.ge.s32.totalorder %s2176_s27, 1  ;;  %p204_p8 = scmp.lt.s32.totalorder %s2176_s27, 3 }
   0xc   : > { %s2837_s12 = scalar_select %p2267_p6, 1, 0 }
   0xd   : > { %p1953_p9 = scmp.eq.s32.totalorder %s2246_s28, 0  ;;  %p2274_p10 = pnand %p1716_p7, %p204_p8 }
   0xe   : > { %s2178_s14 = smov [#allocation2]  }
   0xf   : > { %s216_s15 = sshll.u32 %s2178_s14, 4  ;;  %p1945_p11 = pneg %p2274_p10  ;;  %s217_s15 = int_to_ptr.vmem [resolvable:$true] %s216_s15 }
  0x10   : > { %s2097_s16 = scalar_lea.vmem %s217_s15, 1024  ;;  %p2105_p3 = scmp.lt.s32.totalorder %s217_s15, %s217_s15 }
  0x11   : > { %p1946_p12 = pnand %p1953_p9, %p1945_p11  ;;  %p2098_p0 = scmp.ne.s32.totalorder %s217_s15, %s2097_s16 }
  0x12   : > { %p2106_p4 = scmp.lt.s32.totalorder %s2097_s16, %s2097_s16 }
  0x13   : > { %p2088_p13 = pneg %p1946_p12 }
  0x14   : > { %p2107_p6 = por %p2106_p4, %p2105_p3 }
  0x15   : > { %p2100_p1 = pnand %p2098_p0, %p2088_p13 }
  0x17   : > { %p2101_p2 = pneg %p2100_p1 }
  0x19   : > { %p2108_p7 = pnand %p2107_p6, %p2101_p2 }
  0x1b   : > { %2111 = shalt.err (!%p2108_p7)
}
  0x1c   : > { %s2179_s17 = smov 128   ;;  %s2180_s18 = smov 8  }
  0x1d   : > { %1948 = dma.hbm_to_vmem [thread:$0]  (!%p1946_p12), %s2829_s1, 1024, %s217_s15, [#allocation3], %s2179_s17, %s2179_s17, %s2180_s18  }
  0x1e   : > { %256 = sbr.rel (%p2274_p10) target bundleno = 803 (0x323), region = 48 }
  0x23   : > { %2155 = dma.done.wait (%p1953_p9), [#allocation3], 1024  }
  0x24   : > { %2157 = vsyncadd (%p1953_p9), [#allocation3], 4294966272  ;;  %s1722_s21 = sshll.u32 %s2246_s28, 5  ;;  %v2181_v0 = vmov 0   ;;  %v1994_v1 = vld [vmem:[#allocation2 + $0x34] ss:$8 sps:$4 sm:$0xff]   ;;  %v338_v57 = vlaneseq }
  0x25   : > { %549 = vmatprep.mubr.bf16.mxu0 %v2181_v0  ;;  %p289_p6 = scmp.lt.s32.totalorder %s1722_s21, 63  ;;  %629 = vmatprep.mubr.bf16.mxu1 %v2181_v0  ;;  %v1996_v2 = vld [vmem:[#allocation2 + $0x30] ss:$8 sps:$4 sm:$0xff]   ;;  %v1997_v3 = vld [vmem:[#allocation2 + $0x24] ss:$8 sps:$4 sm:$0xff]   ;;  %vm468_vm0 = vcmask 523264  }
  0x26   : > { %525 = vmatprep.subr.bf16.mxu0 %v1994_v1  ;;  %1931 = vmatprep.subr.bf16.mxu1 %v1994_v1  ;;  %v1999_v4 = vld [vmem:[#allocation2 + $0x20] ss:$8 sps:$4 sm:$0xff]   ;;  %v2000_v5 = vld [vmem:[#allocation2 + $0x14] ss:$8 sps:$4 sm:$0xff]   ;;  %v2002_v6 = vld [vmem:[#allocation2 + $0x10] ss:$8 sps:$4 sm:$0xff]  }
  0x27   : > { %s2845_s21 = smov (!%p289_p6, %s1722_s21), 63  ;;  %526 = vmatpush1.bf16.msra.mxu0 %v1996_v2  ;;  %1935 = vmatpush1.bf16.msra.mxu1 %v1996_v2  ;;  %v2003_v7 = vld [vmem:[#allocation2 + $0x4] ss:$8 sps:$4 sm:$0xff]   ;;  %v2005_v8 = vld [vmem:[#allocation2] ss:$8 sps:$4 sm:$0xff]   ;;  %v2441_v58 = vshrl.u32 %v338_v57, 7 }
  0x28   : > { %s1723_s22 = sshll.u32 %s2845_s21, 2  ;;  %527 = vmatprep.subr.bf16.mxu0 %v1997_v3  ;;  %1932 = vmatprep.subr.bf16.mxu1 %v1997_v3  ;;  %v2022_v13 = vld [vmem:[%s2831_s3 + $0x70] ss:$8 sps:$4 sm:$0xff]   ;;  %v2024_v14 = vld [vmem:[%s2831_s3 + $0x74] ss:$8 sps:$4 sm:$0xff]   ;;  %s2182_s15 = smov [#allocation5]  }
  0x29   : > { %s2297_s8 = scalar_lea.vmem %s2828_s0, %s1723_s22  ;;  %v2027_v15 = vld [vmem:[%s2831_s3 + $0x64] ss:$8 sps:$4 sm:$0xff]   ;;  %v2025_v16 = vld [vmem:[%s2831_s3 + $0x60] ss:$8 sps:$4 sm:$0xff]   ;;  %v2030_v17 = vld [vmem:[%s2831_s3 + $0x54] ss:$8 sps:$4 sm:$0xff]  }
  0x2a   : > { %v2006_v9 = vld [vmem:[%s2297_s8] sm:$0xff]   ;;  %v2007_v11 = vld [vmem:[%s2297_s8 + $0x8] sm:$0xff]   ;;  %v2028_v18 = vld [vmem:[%s2831_s3 + $0x50] ss:$8 sps:$4 sm:$0xff]   ;;  %v344_v59 = vsub.s32 1, %v2441_v58  ;;  %v340_v60 = vsub.s32 0, %v2441_v58 }
  0x2b   : > { %528 = vmatpush1.bf16.msra.mxu0 %v1999_v4  ;;  %1936 = vmatpush1.bf16.msra.mxu1 %v1999_v4  ;;  %v2014_v10 = vld [vmem:[%s2297_s8 + $0x40] sm:$0xff]   ;;  %v2015_v12 = vld [vmem:[%s2297_s8 + $0x48] sm:$0xff]   ;;  %v2008_v19 = vld [vmem:[%s2297_s8 + $0x10] sm:$0xff]   ;;  %s1818_s22 = sshll.u32 %s2246_s28, 12  ;;  %s2116_s16 = sshll.u32 %s2182_s15, 4  ;;  %s2117_s16 = int_to_ptr.vmem [resolvable:$false] %s2116_s16 }
  0x2c   : > { %529 = vmatprep.subr.bf16.mxu0 %v2000_v5  ;;  %1933 = vmatprep.subr.bf16.mxu1 %v2000_v5  ;;  %v2016_v20 = vld [vmem:[%s2297_s8 + $0x50] sm:$0xff]   ;;  %v2033_v21 = vld [vmem:[%s2831_s3 + $0x44] ss:$8 sps:$4 sm:$0xff]   ;;  %v2031_v22 = vld [vmem:[%s2831_s3 + $0x40] ss:$8 sps:$4 sm:$0xff]   ;;  %s2780_s13 = scalar_lea.hbm %s2835_s7, %s1818_s22  ;;  %s2118_s17 = scalar_lea.vmem %s2117_s16, 8192 }
  0x2d   : > { %v2036_v23 = vld [vmem:[%s2831_s3 + $0x34] ss:$8 sps:$4 sm:$0xff]   ;;  %v2034_v24 = vld [vmem:[%s2831_s3 + $0x30] ss:$8 sps:$4 sm:$0xff]   ;;  %v2039_v27 = vld [vmem:[%s2831_s3 + $0x24] ss:$8 sps:$4 sm:$0xff]  }
  0x2e   : > { %v2009_v25 = vld [vmem:[%s2297_s8 + $0x18] sm:$0xff]   ;;  %v2037_v28 = vld [vmem:[%s2831_s3 + $0x20] ss:$8 sps:$4 sm:$0xff]   ;;  %v2045_v33 = vld [vmem:[%s2831_s3 + $0x4] ss:$8 sps:$4 sm:$0xff]  }
  0x2f   : > { %530 = vmatpush1.bf16.msra.mxu0 %v2002_v6  ;;  %1937 = vmatpush1.bf16.msra.mxu1 %v2002_v6  ;;  %v2017_v26 = vld [vmem:[%s2297_s8 + $0x58] sm:$0xff]   ;;  %v2010_v31 = vld [vmem:[%s2297_s8 + $0x20] sm:$0xff]   ;;  %v2011_v37 = vld [vmem:[%s2297_s8 + $0x28] sm:$0xff]  }
  0x30   : > { %531 = vmatprep.subr.bf16.mxu0 %v2003_v7  ;;  %1934 = vmatprep.subr.bf16.mxu1 %v2003_v7  ;;  %v2042_v29 = vld [vmem:[%s2831_s3 + $0x14] ss:$8 sps:$4 sm:$0xff]   ;;  %v2040_v30 = vld [vmem:[%s2831_s3 + $0x10] ss:$8 sps:$4 sm:$0xff]   ;;  %v2018_v32 = vld [vmem:[%s2297_s8 + $0x60] sm:$0xff]  }
  0x31   : > { %v2043_v34 = vld [vmem:[%s2831_s3] ss:$8 sps:$4 sm:$0xff]   ;;  %v2048_v35 = vld [vmem:[%s2831_s3 + $0xf4] ss:$8 sps:$4 sm:$0xff]   ;;  %v2046_v36 = vld [vmem:[%s2831_s3 + $0xf0] ss:$8 sps:$4 sm:$0xff]  }
  0x32   : > { %v2019_v38 = vld [vmem:[%s2297_s8 + $0x68] sm:$0xff]   ;;  %v2054_v41 = vld [vmem:[%s2831_s3 + $0xd4] ss:$8 sps:$4 sm:$0xff]   ;;  %v2052_v42 = vld [vmem:[%s2831_s3 + $0xd0] ss:$8 sps:$4 sm:$0xff]  }
  0x33   : > { %532 = vmatpush1.bf16.msra.mxu0 %v2005_v8  ;;  %1938 = vmatpush1.bf16.msra.mxu1 %v2005_v8  ;;  %v2051_v39 = vld [vmem:[%s2831_s3 + $0xe4] ss:$8 sps:$4 sm:$0xff]   ;;  %v2049_v40 = vld [vmem:[%s2831_s3 + $0xe0] ss:$8 sps:$4 sm:$0xff]   ;;  %v2012_v43 = vld [vmem:[%s2297_s8 + $0x30] sm:$0xff]  }
  0x34   : > { %1010 = vmatprep.subr.bf16.mxu1 %v2024_v14  ;;  %v2020_v44 = vld [vmem:[%s2297_s8 + $0x70] sm:$0xff]   ;;  %v2057_v45 = vld [vmem:[%s2831_s3 + $0xc4] ss:$8 sps:$4 sm:$0xff]   ;;  %v2055_v46 = vld [vmem:[%s2831_s3 + $0xc0] ss:$8 sps:$4 sm:$0xff]  }
  0x35   : > { %v2060_v47 = vld [vmem:[%s2831_s3 + $0xb4] ss:$8 sps:$4 sm:$0xff]   ;;  %v2058_v48 = vld [vmem:[%s2831_s3 + $0xb0] ss:$8 sps:$4 sm:$0xff]   ;;  %v2063_v51 = vld [vmem:[%s2831_s3 + $0xa4] ss:$8 sps:$4 sm:$0xff]  }
  0x36   : > { %1748 = vmatmul.mubr.msk.bf16.vlgmr.msra.gmra.mxu0 %vm468_vm0, %v2006_v9  ;;  %1756 = vmatmul.mubr.msk.bf16.vlgmr.msra.gmra.mxu1 %vm468_vm0, %v2014_v10  ;;  %v2013_v49 = vld [vmem:[%s2297_s8 + $0x38] sm:$0xff]   ;;  %v2061_v52 = vld [vmem:[%s2831_s3 + $0xa0] ss:$8 sps:$4 sm:$0xff]   ;;  %v2069_v55 = vld [vmem:[%s2831_s3 + $0x84] ss:$8 sps:$4 sm:$0xff]  }
  0x37   : > { %559 = vmatprep.mubr.bf16.mxu0 %v2181_v0  ;;  %639 = vmatprep.mubr.bf16.mxu1 %v2181_v0  ;;  %v2021_v50 = vld [vmem:[%s2297_s8 + $0x78] sm:$0xff]   ;;  %v2067_v56 = vld [vmem:[%s2831_s3 + $0x80] ss:$8 sps:$4 sm:$0xff]   ;;  %s285_s8 = sand.u32 1, %s2168_s25  }
  0x38   : > { %1011 = vmatpush1.bf16.msra.mxu1 %v2022_v13  ;;  %v2066_v53 = vld [vmem:[%s2831_s3 + $0x94] ss:$8 sps:$4 sm:$0xff]   ;;  %v2064_v54 = vld [vmem:[%s2831_s3 + $0x90] ss:$8 sps:$4 sm:$0xff]   ;;  %v336_v61 = vld [vmem:[%s2830_s2] sm:$0x3] }
  0x39   : > { %1012 = vmatprep.subr.bf16.mxu1 %v2027_v15  ;;  %v2456_v1 = vrot.slane %v336_v61, %v340_v60  ;;  %v2072_v13 = vld [vmem:[%s2833_s5 + $0x70] sm:$0xff]   ;;  %s1721_s18 = sshll.u32 %s285_s8, 8  ;;  %s2788_s14 = scalar_lea.sflag [#allocation4], %s285_s8 }
  0x3a   : > { %s2712_s21 = scalar_lea.vmem [#allocation5], %s1721_s18 }
  0x3b   : > { %s1641_s23 = sshll.u32 %s2712_s21, 4  ;;  %s2782_s23 = int_to_ptr.vmem [resolvable:$true] %s1641_s23 }
  0x3c   : > { %1013 = vmatpush1.bf16.msra.mxu1 %v2025_v16  ;;  %s2112_s28 = scalar_lea.vmem %s2782_s23, 4096  ;;  %p2119_p11 = scmp.lt.s32.totalorder %s2782_s23, %s2117_s16 }
  0x3d   : > { %1014 = vmatprep.subr.bf16.mxu1 %v2030_v17  ;;  %p2113_p8 = scmp.ne.s32.totalorder %s2782_s23, %s2112_s28  ;;  %p2120_p12 = scmp.lt.s32.totalorder %s2118_s17, %s2112_s28 }
  0x3e   : > { %1749 = vmatmul.mubr.msk.bf16.gmra.mxu0 %vm468_vm0, %v2007_v11  ;;  %1757 = vmatmul.mubr.msk.bf16.gmra.mxu1 %vm468_vm0, %v2015_v12  ;;  %v2070_v11 = vld [vmem:[%s2833_s5 + $0x78] sm:$0xff]  }
  0x3f   : > { %569 = vmatprep.mubr.bf16.mxu0 %v2181_v0  ;;  %649 = vmatprep.mubr.bf16.mxu1 %v2181_v0  ;;  %v2071_v12 = vld [vmem:[%s2833_s5 + $0x38] sm:$0xff]   ;;  %p2114_p9 = pnand %p2113_p8, %p2263_p5  ;;  %p2121_p13 = por %p2120_p12, %p2119_p11 }
  0x40   : > { %1015 = vmatpush1.bf16.msra.mxu1 %v2028_v18  ;;  %1819 = vmatprep.subr.bf16.mxu0 %v2070_v11 }
  0x41   : > { %1016 = vmatprep.subr.bf16.mxu1 %v2033_v21  ;;  %1820 = vmatpush3.bf16.msra.mxu0 %v2071_v12  ;;  %p2115_p10 = pneg %p2114_p9 }
  0x42   : > { %1821 = vmatprep.subr.bf16.mxu0 %v2072_v13 }
  0x43   : > { %p2122_p0 = pnand %p2121_p13, %p2115_p10 }
  0x44   : > { %1017 = vmatpush1.bf16.msra.mxu1 %v2031_v22 }
  0x45   : > { %1018 = vmatprep.subr.bf16.mxu1 %v2036_v23 }
  0x46   : > { %1750 = vmatmul.mubr.msk.bf16.gmra.mxu0 %vm468_vm0, %v2008_v19  ;;  %1758 = vmatmul.mubr.msk.bf16.gmra.mxu1 %vm468_vm0, %v2016_v20  ;;  %v2073_v20 = vld [vmem:[%s2833_s5 + $0x30] sm:$0xff]  }
  0x47   : > { %579 = vmatprep.mubr.bf16.mxu0 %v2181_v0  ;;  %659 = vmatprep.mubr.bf16.mxu1 %v2181_v0 }
  0x48   : > { %1019 = vmatpush1.bf16.msra.mxu1 %v2034_v24  ;;  %v2074_v24 = vld [vmem:[%s2833_s5 + $0x68] sm:$0xff]   ;;  %1822 = vmatpush3.bf16.msra.mxu0 %v2073_v20 }
  0x49   : > { %1020 = vmatprep.subr.bf16.mxu1 %v2039_v27  ;;  %1823 = vmatprep.subr.bf16.mxu0 %v2074_v24 }
  0x4c   : > { %1021 = vmatpush1.bf16.msra.mxu1 %v2037_v28 }
  0x4d   : > { %1022 = vmatprep.subr.bf16.mxu1 %v2042_v29 }
  0x4e   : > { %1751 = vmatmul.mubr.msk.bf16.gmra.mxu0 %vm468_vm0, %v2009_v25  ;;  %1759 = vmatmul.mubr.msk.bf16.gmra.mxu1 %vm468_vm0, %v2017_v26 }
  0x4f   : > { %589 = vmatprep.mubr.bf16.mxu0 %v2181_v0  ;;  %669 = vmatprep.mubr.bf16.mxu1 %v2181_v0 }
  0x50   : > { %1023 = vmatpush1.bf16.msra.mxu1 %v2040_v30 }
  0x51   : > { %1024 = vmatprep.subr.bf16.mxu1 %v2045_v33 }
  0x54   : > { %1025 = vmatpush1.bf16.msra.mxu1 %v2043_v34  ;;  %v2076_v34 = vld [vmem:[%s2833_s5 + $0x60] sm:$0xff]  }
  0x55   : > { %1026 = vmatprep.subr.bf16.mxu1 %v2048_v35 }
  0x56   : > { %1752 = vmatmul.mubr.msk.bf16.gmra.mxu0 %vm468_vm0, %v2010_v31  ;;  %1760 = vmatmul.mubr.msk.bf16.gmra.mxu1 %vm468_vm0, %v2018_v32  ;;  %v2075_v31 = vld [vmem:[%s2833_s5 + $0x28] sm:$0xff]  }
  0x57   : > { %599 = vmatprep.mubr.bf16.mxu0 %v2181_v0  ;;  %679 = vmatprep.mubr.bf16.mxu1 %v2181_v0 }
  0x58   : > { %1027 = vmatpush2.bf16.msra.mxu1 %v2046_v36  ;;  %1824 = vmatpush3.bf16.msra.mxu0 %v2075_v31 }
  0x59   : > { %1028 = vmatprep.subr.bf16.mxu1 %v2051_v39  ;;  %1825 = vmatprep.subr.bf16.mxu0 %v2076_v34 }
  0x5c   : > { %1029 = vmatpush2.bf16.msra.mxu1 %v2049_v40 }
  0x5d   : > { %1030 = vmatprep.subr.bf16.mxu1 %v2054_v41  ;;  %v2077_v41 = vld [vmem:[%s2833_s5 + $0x20] sm:$0xff]  }
  0x5e   : > { %1753 = vmatmul.mubr.msk.bf16.gmra.mxu0 %vm468_vm0, %v2011_v37  ;;  %1761 = vmatmul.mubr.msk.bf16.gmra.mxu1 %vm468_vm0, %v2019_v38 }
  0x5f   : > { %609 = vmatprep.mubr.bf16.mxu0 %v2181_v0  ;;  %689 = vmatprep.mubr.bf16.mxu1 %v2181_v0 }
  0x60   : > { %1031 = vmatpush2.bf16.msra.mxu1 %v2052_v42  ;;  %1826 = vmatpush3.bf16.msra.mxu0 %v2077_v41 }
  0x61   : > { %1032 = vmatprep.subr.bf16.mxu1 %v2057_v45 }
  0x64   : > { %1033 = vmatpush2.bf16.msra.mxu1 %v2055_v46 }
  0x65   : > { %1034 = vmatprep.subr.bf16.mxu1 %v2060_v47 }
  0x66   : > { %1754 = vmatmul.mubr.msk.bf16.gmra.mxu0 %vm468_vm0, %v2012_v43  ;;  %1762 = vmatmul.mubr.msk.bf16.gmra.mxu1 %vm468_vm0, %v2020_v44  ;;  %v2078_v44 = vld [vmem:[%s2833_s5 + $0x58] sm:$0xff]  }
  0x67   : > { %619 = vmatprep.mubr.bf16.mxu0 %v2181_v0  ;;  %699 = vmatprep.mubr.bf16.mxu1 %v2181_v0  ;;  %v2452_v0 = vrot.slane %v336_v61, %v344_v59 }
  0x68   : > { %1035 = vmatpush2.bf16.msra.mxu1 %v2058_v48  ;;  %1827 = vmatprep.subr.bf16.mxu0 %v2078_v44 }
  0x69   : > { %1036 = vmatprep.subr.bf16.mxu1 %v2063_v51  ;;  %v2079_v51 = vld [vmem:[%s2833_s5 + $0x18] sm:$0xff]  }
  0x6a   : > { %1828 = vmatpush3.bf16.msra.mxu0 %v2079_v51 }
  0x6c   : > { %1037 = vmatpush2.bf16.msra.mxu1 %v2061_v52 }
  0x6d   : > { %1038 = vmatprep.subr.bf16.mxu1 %v2066_v53 }
  0x6e   : > { %1755 = vmatmul.mubr.msk.bf16.gmra.mxu0 %vm468_vm0, %v2013_v49  ;;  %1763 = vmatmul.mubr.msk.bf16.gmra.mxu1 %vm468_vm0, %v2021_v50 }
  0x70   : > { %1039 = vmatpush2.bf16.msra.mxu1 %v2064_v54  ;;  %v2080_v54 = vld [vmem:[%s2833_s5 + $0x50] sm:$0xff]  }
  0x71   : > { %1040 = vmatprep.subr.bf16.mxu1 %v2069_v55  ;;  %1829 = vmatprep.subr.bf16.mxu0 %v2080_v54 }
  0x74   : > { %1041 = vmatpush2.bf16.msra.mxu1 %v2067_v56 }
  0xf6   : > { %v551_v62 = vpop.f32.mrf.mxu0  ;;  %v2448_v63 = vpop.f32.mrf.mxu1 }
  0xf7   : > { %v552_v8 = vadd.f32 %v551_v62, %v2456_v1 }
  0xf8   : > { %v553_v2 = vpop.f32.mrf.mxu0  ;;  %v2458_v3 = vpop.f32.mrf.mxu1 }
  0xf9   : > { %v554_v6 = vadd.f32 %v553_v2, %v2452_v0  ;;  %v710_v21 = vmax.f32 %v552_v8, 0.0  ;;  %v2082_v8 = vld [vmem:[%s2833_s5 + $0x48] sm:$0xff]  }
  0xfa   : > { %v555_v4 = vpop.f32.mrf.mxu0  ;;  %v2460_v5 = vpop.f32.mrf.mxu1 }
  0xfb   : > { %v556_v7 = vadd.f32 %v555_v4, %v2456_v1  ;;  %v711_v18 = vmax.f32 %v554_v6, 0.0  ;;  %v2081_v4 = vld [vmem:[%s2833_s5 + $0x10] sm:$0xff]  }
  0xfc   : > { %v557_v9 = vpop.f32.mrf.mxu0  ;;  %v2465_v10 = vpop.f32.mrf.mxu1  ;;  %1830 = vmatpush3.bf16.msra.mxu0 %v2081_v4 }
  0xfd   : > { %v558_v14 = vadd.f32 %v557_v9, %v2452_v0  ;;  %v712_v15 = vmax.f32 %v556_v7, 0.0  ;;  %1831 = vmatprep.subr.bf16.mxu0 %v2082_v8 }
  0xfe   : > { %v561_v16 = vpop.f32.mrf.mxu0  ;;  %v2477_v17 = vpop.f32.mrf.mxu1 }
  0xff   : > { %v713_v19 = vmax.f32 %v558_v14, 0.0  ;;  %v774_v26 = vpack.c.bf16 %v712_v15, %v710_v21  ;;  %v562_v32 = vadd.f32 %v561_v16, %v2456_v1  ;;  %v2083_v16 = vld [vmem:[%s2833_s5 + $0x8] sm:$0xff]  }
 0x100   : > { %v563_v22 = vpop.f32.mrf.mxu0  ;;  %v2482_v23 = vpop.f32.mrf.mxu1  ;;  %1832 = vmatpush3.bf16.msra.mxu0 %v2083_v16 }
 0x101   : > { %v775_v25 = vpack.c.bf16 %v713_v19, %v711_v18  ;;  %v564_v29 = vadd.f32 %v563_v22, %v2452_v0  ;;  %v714_v42 = vmax.f32 %v562_v32, 0.0 }
 0x102   : > { %v565_v27 = vpop.f32.mrf.mxu0  ;;  %v2487_v28 = vpop.f32.mrf.mxu1 }
 0x103   : > { %v566_v30 = vadd.f32 %v565_v27, %v2456_v1  ;;  %1042 = vmatprep.mubr.bf16.mxu1 %v775_v25  ;;  %v715_v39 = vmax.f32 %v564_v29, 0.0 }
 0x104   : > { %v567_v33 = vpop.f32.mrf.mxu0  ;;  %1043 = vmatmul.mubr.bf16.vlgmr.msra.gmra.mxu1 %v774_v26  ;;  %v2499_v38 = vpop.f32.mrf.mxu1 }
 0x105   : > { %v568_v35 = vadd.f32 %v567_v33, %v2452_v0  ;;  %v716_v36 = vmax.f32 %v566_v30, 0.0 }
 0x106   : > { %v571_v37 = vpop.f32.mrf.mxu0  ;;  %v2507_v48 = vpop.f32.mrf.mxu1 }
 0x107   : > { %v717_v40 = vmax.f32 %v568_v35, 0.0  ;;  %v776_v46 = vpack.c.bf16 %v716_v36, %v714_v42  ;;  %v572_v52 = vadd.f32 %v571_v37, %v2456_v1 }
 0x108   : > { %v573_v43 = vpop.f32.mrf.mxu0  ;;  %v2519_v61 = vpop.f32.mrf.mxu1 }
 0x109   : > { %v777_v45 = vpack.c.bf16 %v717_v40, %v715_v39  ;;  %v574_v49 = vadd.f32 %v573_v43, %v2452_v0  ;;  %v718_v6 = vmax.f32 %v572_v52, 0.0 }
 0x10a   : > { %v575_v47 = vpop.f32.mrf.mxu0  ;;  %v2527_v13 = vpop.f32.mrf.mxu1 }
 0x10b   : > { %v576_v50 = vadd.f32 %v575_v47, %v2456_v1  ;;  %1052 = vmatprep.mubr.bf16.mxu1 %v777_v45  ;;  %v719_v62 = vmax.f32 %v574_v49, 0.0 }
 0x10c   : > { %v577_v53 = vpop.f32.mrf.mxu0  ;;  %1053 = vmatmul.mubr.bf16.gmra.mxu1 %v776_v46  ;;  %v2536_v24 = vpop.f32.mrf.mxu1 }
 0x10d   : > { %v578_v55 = vadd.f32 %v577_v53, %v2452_v0  ;;  %v720_v56 = vmax.f32 %v576_v50, 0.0 }
 0x10e   : > { %v581_v57 = vpop.f32.mrf.mxu0  ;;  %v2538_v33 = vpop.f32.mrf.mxu1 }
 0x10f   : > { %v721_v2 = vmax.f32 %v578_v55, 0.0  ;;  %v778_v11 = vpack.c.bf16 %v720_v56, %v718_v6  ;;  %v582_v18 = vadd.f32 %v581_v57, %v2456_v1 }
 0x110   : > { %v583_v7 = vpop.f32.mrf.mxu0  ;;  %v2544_v42 = vpop.f32.mrf.mxu1 }
 0x111   : > { %v779_v9 = vpack.c.bf16 %v721_v2, %v719_v62  ;;  %v584_v14 = vadd.f32 %v583_v7, %v2452_v0  ;;  %v722_v27 = vmax.f32 %v582_v18, 0.0 }
 0x112   : > { %v585_v12 = vpop.f32.mrf.mxu0  ;;  %v2546_v51 = vpop.f32.mrf.mxu1 }
 0x113   : > { %v586_v15 = vadd.f32 %v585_v12, %v2456_v1  ;;  %1062 = vmatprep.mubr.bf16.mxu1 %v779_v9  ;;  %v723_v25 = vmax.f32 %v584_v14, 0.0 }
 0x114   : > { %v587_v19 = vpop.f32.mrf.mxu0  ;;  %1063 = vmatmul.mubr.bf16.gmra.mxu1 %v778_v11  ;;  %v2552_v2 = vpop.f32.mrf.mxu1 }
 0x115   : > { %v588_v20 = vadd.f32 %v587_v19, %v2452_v0  ;;  %v724_v21 = vmax.f32 %v586_v15, 0.0 }
 0x116   : > { %v591_v22 = vpop.f32.mrf.mxu0  ;;  %v2554_v14 = vpop.f32.mrf.mxu1 }
 0x117   : > { %v725_v26 = vmax.f32 %v588_v20, 0.0  ;;  %v780_v31 = vpack.c.bf16 %v724_v21, %v722_v27  ;;  %v592_v36 = vadd.f32 %v591_v22, %v2456_v1 }
 0x118   : > { %v593_v29 = vpop.f32.mrf.mxu0 }
 0x119   : > { %v781_v30 = vpack.c.bf16 %v725_v26, %v723_v25  ;;  %v594_v34 = vadd.f32 %v593_v29, %v2452_v0  ;;  %v726_v45 = vmax.f32 %v592_v36, 0.0  ;;  %v2560_v25 = vpop.f32.mrf.mxu1 }
 0x11a   : > { %v595_v32 = vpop.f32.mrf.mxu0 }
 0x11b   : > { %v596_v35 = vadd.f32 %v595_v32, %v2456_v1  ;;  %1072 = vmatprep.mubr.bf16.mxu1 %v781_v30  ;;  %v727_v43 = vmax.f32 %v594_v34, 0.0  ;;  %v634_v32 = vadd.f32 %v2458_v3, %v2452_v0  ;;  %v638_v34 = vadd.f32 %v2465_v10, %v2452_v0 }
 0x11c   : > { %v597_v37 = vpop.f32.mrf.mxu0  ;;  %1073 = vmatmul.mubr.bf16.gmra.mxu1 %v780_v31 }
 0x11d   : > { %v598_v39 = vadd.f32 %v597_v37, %v2452_v0  ;;  %v728_v40 = vmax.f32 %v596_v35, 0.0  ;;  %v2566_v37 = vpop.f32.mrf.mxu1  ;;  %v745_v3 = vmax.f32 %v638_v34, 0.0 }
 0x11e   : > { %v601_v41 = vpop.f32.mrf.mxu0 }
 0x11f   : > { %v729_v44 = vmax.f32 %v598_v39, 0.0  ;;  %v782_v49 = vpack.c.bf16 %v728_v40, %v726_v45  ;;  %v602_v54 = vadd.f32 %v601_v41, %v2456_v1 }
 0x120   : > { %v603_v46 = vpop.f32.mrf.mxu0 }
 0x121   : > { %v783_v47 = vpack.c.bf16 %v729_v44, %v727_v43  ;;  %v604_v52 = vadd.f32 %v603_v46, %v2452_v0  ;;  %v730_v7 = vmax.f32 %v602_v54, 0.0  ;;  %v743_v44 = vmax.f32 %v634_v32, 0.0 }
 0x122   : > { %v605_v50 = vpop.f32.mrf.mxu0  ;;  %v644_v54 = vadd.f32 %v2482_v23, %v2452_v0 }
 0x123   : > { %v606_v53 = vadd.f32 %v605_v50, %v2456_v1  ;;  %1082 = vmatprep.mubr.bf16.mxu1 %v783_v47  ;;  %v731_v4 = vmax.f32 %v604_v52, 0.0  ;;  %v677_v47 = vpop.f32.mrf.mxu1 }
 0x124   : > { %v607_v55 = vpop.f32.mrf.mxu0  ;;  %1083 = vmatmul.mubr.bf16.gmra.mxu1 %v782_v49 }
 0x125   : > { %v608_v56 = vadd.f32 %v607_v55, %v2452_v0  ;;  %v732_v57 = vmax.f32 %v606_v53, 0.0  ;;  %v791_v53 = vpack.c.bf16 %v745_v3, %v743_v44  ;;  %v648_v55 = vadd.f32 %v2499_v38, %v2452_v0 }
 0x126   : > { %v611_v62 = vpop.f32.mrf.mxu0  ;;  %v654_v38 = vadd.f32 %v2519_v61, %v2452_v0  ;;  %v664_v61 = vadd.f32 %v2544_v42, %v2452_v0  ;;  %v2085_v42 = vld [vmem:[%s2833_s5] sm:$0xff]  }
 0x127   : > { %v733_v6 = vmax.f32 %v608_v56, 0.0  ;;  %v784_v11 = vpack.c.bf16 %v732_v57, %v730_v7  ;;  %v612_v18 = vadd.f32 %v611_v62, %v2456_v1  ;;  %v632_v56 = vadd.f32 %v2448_v63, %v2456_v1 }
 0x128   : > { %v613_v8 = vpop.f32.mrf.mxu0  ;;  %v636_v62 = vadd.f32 %v2460_v5, %v2456_v1  ;;  %v749_v7 = vmax.f32 %v648_v55, 0.0  ;;  %v658_v63 = vadd.f32 %v2536_v24, %v2452_v0  ;;  %v642_v5 = vadd.f32 %v2477_v17, %v2456_v1 }
 0x129   : > { %v785_v9 = vpack.c.bf16 %v733_v6, %v731_v4  ;;  %v614_v15 = vadd.f32 %v613_v8, %v2452_v0  ;;  %v734_v29 = vmax.f32 %v612_v18, 0.0  ;;  %v2580_v4 = vpop.f32.mrf.mxu1  ;;  %v747_v6 = vmax.f32 %v644_v54, 0.0 }
 0x12a   : > { %v615_v12 = vpop.f32.mrf.mxu0  ;;  %v742_v8 = vmax.f32 %v632_v56, 0.0  ;;  %v751_v18 = vmax.f32 %v654_v38, 0.0  ;;  %v668_v24 = vadd.f32 %v2552_v2, %v2452_v0  ;;  %v652_v17 = vadd.f32 %v2507_v48, %v2456_v1 }
 0x12b   : > { %v616_v16 = vadd.f32 %v615_v12, %v2456_v1  ;;  %1092 = vmatprep.mubr.bf16.mxu1 %v785_v9  ;;  %v735_v26 = vmax.f32 %v614_v15, 0.0  ;;  %v744_v9 = vmax.f32 %v636_v62, 0.0  ;;  %v683_v23 = vpop.f32.mrf.mxu1  ;;  %v646_v15 = vadd.f32 %v2487_v28, %v2456_v1 }
 0x12c   : > { %v617_v19 = vpop.f32.mrf.mxu0  ;;  %1093 = vmatmul.mubr.bf16.gmra.mxu1 %v784_v11  ;;  %v793_v11 = vpack.c.bf16 %v749_v7, %v747_v6  ;;  %v656_v28 = vadd.f32 %v2527_v13, %v2456_v1  ;;  %v757_v32 = vmax.f32 %v668_v24, 0.0  ;;  %v750_v2 = vmax.f32 %v652_v17, 0.0 }
 0x12d   : > { %v618_v20 = vadd.f32 %v617_v19, %v2452_v0  ;;  %v736_v21 = vmax.f32 %v616_v16, 0.0  ;;  %v790_v12 = vpack.c.bf16 %v744_v9, %v742_v8  ;;  %v685_v16 = vpop.f32.mrf.mxu1  ;;  %v753_v19 = vmax.f32 %v658_v63, 0.0 }
 0x12e   : > { %v621_v22 = vpop.f32.mrf.mxu0  ;;  %v752_v34 = vmax.f32 %v656_v28, 0.0  ;;  %v674_v13 = vadd.f32 %v2560_v25, %v2452_v0  ;;  %v684_v25 = vadd.f32 %v683_v23, %v2452_v0  ;;  %v686_v9 = vadd.f32 %v685_v16, %v2456_v1 }
 0x12f   : > { %v737_v27 = vmax.f32 %v618_v20, 0.0  ;;  %v786_v35 = vpack.c.bf16 %v736_v21, %v734_v29  ;;  %v622_v41 = vadd.f32 %v621_v22, %v2456_v1  ;;  %v746_v20 = vmax.f32 %v642_v5, 0.0  ;;  %v687_v22 = vpop.f32.mrf.mxu1 }
 0x130   : > { %v623_v30 = vpop.f32.mrf.mxu0  ;;  %v748_v21 = vmax.f32 %v646_v15, 0.0  ;;  %v759_v44 = vmax.f32 %v674_v13, 0.0  ;;  %v764_v63 = vmax.f32 %v686_v9, 0.0 }
 0x131   : > { %v787_v31 = vpack.c.bf16 %v737_v27, %v735_v26  ;;  %v624_v39 = vadd.f32 %v623_v30, %v2452_v0  ;;  %v738_v50 = vmax.f32 %v622_v41, 0.0  ;;  %v795_v26 = vpack.c.bf16 %v753_v19, %v751_v18  ;;  %v691_v29 = vpop.f32.mrf.mxu1  ;;  %v2084_v30 = vld [vmem:[%s2833_s5 + $0x40] sm:$0xff]  }
 0x132   : > { %v625_v36 = vpop.f32.mrf.mxu0  ;;  %v792_v27 = vpack.c.bf16 %v748_v21, %v746_v20  ;;  %1833 = vmatprep.subr.bf16.mxu0 %v2084_v30  ;;  %v666_v41 = vadd.f32 %v2546_v51, %v2456_v1  ;;  %v676_v51 = vadd.f32 %v2566_v37, %v2456_v1  ;;  %v692_v20 = vadd.f32 %v691_v29, %v2456_v1  ;;  %v838_v29 = vld [vmem:[%s2832_s4] sm:$0x3] }
 0x133   : > { %v626_v40 = vadd.f32 %v625_v36, %v2456_v1  ;;  %1102 = vmatprep.mubr.bf16.mxu1 %v787_v31  ;;  %v739_v10 = vmax.f32 %v624_v39, 0.0  ;;  %v755_v31 = vmax.f32 %v664_v61, 0.0  ;;  %1834 = vmatpush3.bf16.msra.mxu0 %v2085_v42  ;;  %v678_v36 = vadd.f32 %v677_v47, %v2452_v0 }
 0x134   : > { %v627_v43 = vpop.f32.mrf.mxu0  ;;  %1103 = vmatmul.mubr.bf16.gmra.mxu1 %v786_v35  ;;  %v693_v35 = vpop.f32.mrf.mxu1  ;;  %v794_v39 = vpack.c.bf16 %v752_v34, %v750_v2  ;;  %v688_v47 = vadd.f32 %v687_v22, %v2452_v0  ;;  %v760_v56 = vmax.f32 %v676_v51, 0.0  ;;  %v766_v22 = vmax.f32 %v692_v20, 0.0 }
 0x135   : > { %v628_v45 = vadd.f32 %v627_v43, %v2452_v0  ;;  %v740_v46 = vmax.f32 %v626_v40, 0.0  ;;  %v797_v48 = vpack.c.bf16 %v757_v32, %v755_v31  ;;  %v662_v40 = vadd.f32 %v2538_v33, %v2456_v1 }
 0x136   : > { %v695_v43 = vpop.f32.mrf.mxu1  ;;  %v672_v33 = vadd.f32 %v2554_v14, %v2456_v1  ;;  %v765_v54 = vmax.f32 %v688_v47, 0.0  ;;  %v694_v6 = vadd.f32 %v693_v35, %v2452_v0  ;;  %v682_v14 = vadd.f32 %v2580_v4, %v2456_v1 }
 0x137   : > { %v741_v49 = vmax.f32 %v628_v45, 0.0  ;;  %v788_v57 = vpack.c.bf16 %v740_v46, %v738_v50  ;;  %v761_v45 = vmax.f32 %v678_v36, 0.0  ;;  %v754_v3 = vmax.f32 %v662_v40, 0.0 }
 0x138   : > { %v756_v46 = vmax.f32 %v666_v41, 0.0  ;;  %v758_v55 = vmax.f32 %v672_v33, 0.0  ;;  %v767_v23 = vmax.f32 %v694_v6, 0.0  ;;  %v762_v38 = vmax.f32 %v682_v14, 0.0 }
 0x139   : > { %v789_v52 = vpack.c.bf16 %v741_v49, %v739_v10  ;;  %v697_v10 = vpop.f32.mrf.mxu1  ;;  %v799_v49 = vpack.c.bf16 %v761_v45, %v759_v44  ;;  %v696_v4 = vadd.f32 %v695_v43, %v2456_v1  ;;  %v2633_v32 = vrot.slane %v838_v29, %v344_v59 }
 0x13a   : > { %v796_v50 = vpack.c.bf16 %v756_v46, %v754_v3  ;;  %v698_v7 = vadd.f32 %v697_v10, %v2452_v0  ;;  %v798_v8 = vpack.c.bf16 %v760_v56, %v758_v55  ;;  %v800_v19 = vpack.c.bf16 %v764_v63, %v762_v38 }
 0x13b   : > { %1112 = vmatprep.mubr.bf16.mxu1 %v789_v52  ;;  %v701_v52 = vpop.f32.mrf.mxu1  ;;  %v2637_v42 = vrot.slane %v838_v29, %v340_v60 }
 0x13c   : > { %1113 = vmatmul.mubr.bf16.gmra.mxu1 %v788_v57 }
 0x13d   : > { %1122 = vmatprep.mubr.bf16.mxu1 %v791_v53  ;;  %v763_v53 = vmax.f32 %v684_v25, 0.0  ;;  %v703_v57 = vpop.f32.mrf.mxu1 }
 0x13e   : > { %v704_v15 = vadd.f32 %v703_v57, %v2452_v0 }
 0x13f   : > { %v801_v62 = vpack.c.bf16 %v765_v54, %v763_v53  ;;  %v705_v37 = vpop.f32.mrf.mxu1 }
 0x140   : > { %v771_v16 = vmax.f32 %v704_v15, 0.0  ;;  %v706_v17 = vadd.f32 %v705_v37, %v2456_v1 }
 0x142   : > { %v772_v28 = vmax.f32 %v706_v17, 0.0 }
 0x144   : > { %1123 = vmatmul.mubr.bf16.gmra.mxu1 %v790_v12  ;;  %v707_v12 = vpop.f32.mrf.mxu1 }
 0x145   : > { %1132 = vmatprep.mubr.bf16.mxu1 %v793_v11  ;;  %v769_v11 = vmax.f32 %v698_v7, 0.0  ;;  %v708_v18 = vadd.f32 %v707_v12, %v2452_v0 }
 0x147   : > { %v803_v5 = vpack.c.bf16 %v769_v11, %v767_v23  ;;  %v773_v21 = vmax.f32 %v708_v18, 0.0 }
 0x149   : > { %v805_v61 = vpack.c.bf16 %v773_v21, %v771_v16 }
 0x14c   : > { %1133 = vmatmul.mubr.bf16.gmra.mxu1 %v792_v27  ;;  %v702_v27 = vadd.f32 %v701_v52, %v2456_v1 }
 0x14d   : > { %1142 = vmatprep.mubr.bf16.mxu1 %v795_v26  ;;  %v768_v26 = vmax.f32 %v696_v4, 0.0 }
 0x14e   : > { %v770_v0 = vmax.f32 %v702_v27, 0.0 }
 0x14f   : > { %v802_v24 = vpack.c.bf16 %v768_v26, %v766_v22 }
 0x150   : > { %v804_v30 = vpack.c.bf16 %v772_v28, %v770_v0 }
 0x154   : > { %1143 = vmatmul.mubr.bf16.gmra.mxu1 %v794_v39 }
 0x155   : > { %1152 = vmatprep.mubr.bf16.mxu1 %v797_v48 }
 0x15c   : > { %1153 = vmatmul.mubr.bf16.gmra.mxu1 %v796_v50 }
 0x15d   : > { %1162 = vmatprep.mubr.bf16.mxu1 %v799_v49 }
 0x164   : > { %1163 = vmatmul.mubr.bf16.gmra.mxu1 %v798_v8 }
 0x165   : > { %1172 = vmatprep.mubr.bf16.mxu1 %v801_v62 }
 0x16c   : > { %1173 = vmatmul.mubr.bf16.gmra.mxu1 %v800_v19 }
 0x16d   : > { %1182 = vmatprep.mubr.bf16.mxu1 %v803_v5 }
 0x174   : > { %1183 = vmatmul.mubr.bf16.gmra.mxu1 %v802_v24 }
 0x175   : > { %1192 = vmatprep.mubr.bf16.mxu1 %v805_v61 }
 0x17c   : > { %1193 = vmatmul.mubr.bf16.gmra.mxu1 %v804_v30 }
 0x1c4   : > { %v1044_v31 = vpop.f32.mrf.mxu1 }
 0x1c5   : > { %v1045_v48 = vadd.f32 %v1044_v31, %v2637_v42 }
 0x1c6   : > { %v1046_v1 = vpop.f32.mrf.mxu1 }
 0x1c7   : > { %v1047_v34 = vadd.f32 %v1046_v1, %v2633_v32  ;;  %v1203_v43 = vmax.f32 %v1045_v48, 0.0 }
 0x1c8   : > { %v1048_v2 = vpop.f32.mrf.mxu1 }
 0x1c9   : > { %v1049_v35 = vadd.f32 %v1048_v2, %v2637_v42  ;;  %v1204_v41 = vmax.f32 %v1047_v34, 0.0 }
 0x1ca   : > { %v1050_v13 = vpop.f32.mrf.mxu1 }
 0x1cb   : > { %v1051_v36 = vadd.f32 %v1050_v13, %v2633_v32  ;;  %v1205_v39 = vmax.f32 %v1049_v35, 0.0 }
 0x1cc   : > { %v1054_v40 = vpop.f32.mrf.mxu1 }
 0x1cd   : > { %v1206_v59 = vmax.f32 %v1051_v36, 0.0  ;;  %v1267_v60 = vpack.c.bf16 %v1205_v39, %v1203_v43  ;;  %v1055_v10 = vadd.f32 %v1054_v40, %v2637_v42 }
 0x1ce   : > { %v1056_v44 = vpop.f32.mrf.mxu1 }
 0x1cf   : > { %v1268_v58 = vpack.c.bf16 %v1206_v59, %v1204_v41  ;;  %v1057_v3 = vadd.f32 %v1056_v44, %v2633_v32  ;;  %v1207_v52 = vmax.f32 %v1055_v10, 0.0 }
 0x1d0   : > { %v1058_v45 = vpop.f32.mrf.mxu1 }
 0x1d1   : > { %v1059_v46 = vadd.f32 %v1058_v45, %v2637_v42  ;;  %1466 = vmatprep.mubr.bf16.mxu0 %v1268_v58  ;;  %v1208_v33 = vmax.f32 %v1057_v3, 0.0 }
 0x1d2   : > { %v1060_v49 = vpop.f32.mrf.mxu1  ;;  %1467 = vmatmul.mubr.bf16.vlgmr.msra.gmra.mxu0 %v1267_v60 }
 0x1d3   : > { %v1061_v25 = vadd.f32 %v1060_v49, %v2633_v32  ;;  %v1209_v47 = vmax.f32 %v1059_v46, 0.0 }
 0x1d4   : > { %v1064_v50 = vpop.f32.mrf.mxu1 }
 0x1d5   : > { %v1210_v51 = vmax.f32 %v1061_v25, 0.0  ;;  %v1269_v55 = vpack.c.bf16 %v1209_v47, %v1207_v52  ;;  %v1065_v6 = vadd.f32 %v1064_v50, %v2637_v42 }
 0x1d6   : > { %v1066_v53 = vpop.f32.mrf.mxu1 }
 0x1d7   : > { %v1270_v54 = vpack.c.bf16 %v1210_v51, %v1208_v33  ;;  %v1067_v57 = vadd.f32 %v1066_v53, %v2633_v32  ;;  %v1211_v11 = vmax.f32 %v1065_v6, 0.0 }
 0x1d8   : > { %v1068_v56 = vpop.f32.mrf.mxu1 }
 0x1d9   : > { %v1069_v62 = vadd.f32 %v1068_v56, %v2637_v42  ;;  %1474 = vmatprep.mubr.bf16.mxu0 %v1270_v54  ;;  %v1212_v37 = vmax.f32 %v1067_v57, 0.0 }
 0x1da   : > { %v1070_v7 = vpop.f32.mrf.mxu1  ;;  %1475 = vmatmul.mubr.bf16.gmra.mxu0 %v1269_v55 }
 0x1db   : > { %v1071_v8 = vadd.f32 %v1070_v7, %v2633_v32  ;;  %v1213_v14 = vmax.f32 %v1069_v62, 0.0 }
 0x1dc   : > { %v1074_v9 = vpop.f32.mrf.mxu1 }
 0x1dd   : > { %v1214_v23 = vmax.f32 %v1071_v8, 0.0  ;;  %v1271_v12 = vpack.c.bf16 %v1213_v14, %v1211_v11  ;;  %v1075_v19 = vadd.f32 %v1074_v9, %v2637_v42 }
 0x1de   : > { %v1076_v38 = vpop.f32.mrf.mxu1 }
 0x1df   : > { %v1272_v63 = vpack.c.bf16 %v1214_v23, %v1212_v37  ;;  %v1077_v15 = vadd.f32 %v1076_v38, %v2633_v32  ;;  %v1215_v61 = vmax.f32 %v1075_v19, 0.0 }
 0x1e0   : > { %v1078_v5 = vpop.f32.mrf.mxu1 }
 0x1e1   : > { %v1079_v18 = vadd.f32 %v1078_v5, %v2637_v42  ;;  %1482 = vmatprep.mubr.bf16.mxu0 %v1272_v63  ;;  %v1216_v22 = vmax.f32 %v1077_v15, 0.0 }
 0x1e2   : > { %v1080_v20 = vpop.f32.mrf.mxu1  ;;  %1483 = vmatmul.mubr.bf16.gmra.mxu0 %v1271_v12 }
 0x1e3   : > { %v1081_v4 = vadd.f32 %v1080_v20, %v2633_v32  ;;  %v1217_v16 = vmax.f32 %v1079_v18, 0.0 }
 0x1e4   : > { %v1084_v21 = vpop.f32.mrf.mxu1 }
 0x1e5   : > { %v1218_v26 = vmax.f32 %v1081_v4, 0.0  ;;  %v1273_v17 = vpack.c.bf16 %v1217_v16, %v1215_v61  ;;  %v1085_v29 = vadd.f32 %v1084_v21, %v2637_v42 }
 0x1e6   : > { %v1086_v24 = vpop.f32.mrf.mxu1 }
 0x1e7   : > { %v1274_v27 = vpack.c.bf16 %v1218_v26, %v1216_v22  ;;  %v1087_v28 = vadd.f32 %v1086_v24, %v2633_v32  ;;  %v1219_v13 = vmax.f32 %v1085_v29, 0.0 }
 0x1e8   : > { %v1088_v0 = vpop.f32.mrf.mxu1 }
 0x1e9   : > { %v1089_v30 = vadd.f32 %v1088_v0, %v2637_v42  ;;  %1490 = vmatprep.mubr.bf16.mxu0 %v1274_v27  ;;  %v1220_v35 = vmax.f32 %v1087_v28, 0.0 }
 0x1ea   : > { %v1090_v31 = vpop.f32.mrf.mxu1  ;;  %1491 = vmatmul.mubr.bf16.gmra.mxu0 %v1273_v17 }
 0x1eb   : > { %v1091_v1 = vadd.f32 %v1090_v31, %v2633_v32  ;;  %v1221_v2 = vmax.f32 %v1089_v30, 0.0 }
 0x1ec   : > { %v1094_v34 = vpop.f32.mrf.mxu1 }
 0x1ed   : > { %v1222_v48 = vmax.f32 %v1091_v1, 0.0  ;;  %v1275_v40 = vpack.c.bf16 %v1221_v2, %v1219_v13  ;;  %v1095_v44 = vadd.f32 %v1094_v34, %v2637_v42 }
 0x1ee   : > { %v1096_v36 = vpop.f32.mrf.mxu1 }
 0x1ef   : > { %v1276_v39 = vpack.c.bf16 %v1222_v48, %v1220_v35  ;;  %v1097_v59 = vadd.f32 %v1096_v36, %v2633_v32  ;;  %v1223_v49 = vmax.f32 %v1095_v44, 0.0 }
 0x1f0   : > { %v1098_v41 = vpop.f32.mrf.mxu1 }
 0x1f1   : > { %v1099_v43 = vadd.f32 %v1098_v41, %v2637_v42  ;;  %1498 = vmatprep.mubr.bf16.mxu0 %v1276_v39  ;;  %v1224_v46 = vmax.f32 %v1097_v59, 0.0 }
 0x1f2   : > { %v1100_v58 = vpop.f32.mrf.mxu1  ;;  %1499 = vmatmul.mubr.bf16.gmra.mxu0 %v1275_v40 }
 0x1f3   : > { %v1101_v60 = vadd.f32 %v1100_v58, %v2633_v32  ;;  %v1225_v45 = vmax.f32 %v1099_v43, 0.0 }
 0x1f4   : > { %v1104_v3 = vpop.f32.mrf.mxu1 }
 0x1f5   : > { %v1226_v10 = vmax.f32 %v1101_v60, 0.0  ;;  %v1277_v50 = vpack.c.bf16 %v1225_v45, %v1223_v49  ;;  %v1105_v53 = vadd.f32 %v1104_v3, %v2637_v42 }
 0x1f6   : > { %v1106_v25 = vpop.f32.mrf.mxu1 }
 0x1f7   : > { %v1278_v47 = vpack.c.bf16 %v1226_v10, %v1224_v46  ;;  %v1107_v51 = vadd.f32 %v1106_v25, %v2633_v32  ;;  %v1227_v7 = vmax.f32 %v1105_v53, 0.0 }
 0x1f8   : > { %v1108_v33 = vpop.f32.mrf.mxu1 }
 0x1f9   : > { %v1109_v52 = vadd.f32 %v1108_v33, %v2637_v42  ;;  %1506 = vmatprep.mubr.bf16.mxu0 %v1278_v47  ;;  %v1228_v62 = vmax.f32 %v1107_v51, 0.0 }
 0x1fa   : > { %v1110_v54 = vpop.f32.mrf.mxu1  ;;  %1507 = vmatmul.mubr.bf16.gmra.mxu0 %v1277_v50 }
 0x1fb   : > { %v1111_v55 = vadd.f32 %v1110_v54, %v2633_v32  ;;  %v1229_v56 = vmax.f32 %v1109_v52, 0.0 }
 0x1fc   : > { %v1114_v57 = vpop.f32.mrf.mxu1 }
 0x1fd   : > { %v1230_v6 = vmax.f32 %v1111_v55, 0.0  ;;  %v1279_v9 = vpack.c.bf16 %v1229_v56, %v1227_v7  ;;  %v1115_v38 = vadd.f32 %v1114_v57, %v2637_v42 }
 0x1fe   : > { %v1116_v8 = vpop.f32.mrf.mxu1 }
 0x1ff   : > { %v1280_v14 = vpack.c.bf16 %v1230_v6, %v1228_v62  ;;  %v1117_v23 = vadd.f32 %v1116_v8, %v2633_v32  ;;  %v1231_v20 = vmax.f32 %v1115_v38, 0.0 }
 0x200   : > { %v1118_v37 = vpop.f32.mrf.mxu1 }
 0x201   : > { %v1119_v11 = vadd.f32 %v1118_v37, %v2637_v42  ;;  %1514 = vmatprep.mubr.bf16.mxu0 %v1280_v14  ;;  %v1232_v18 = vmax.f32 %v1117_v23, 0.0 }
 0x202   : > { %v1120_v63 = vpop.f32.mrf.mxu1  ;;  %1515 = vmatmul.mubr.bf16.gmra.mxu0 %v1279_v9 }
 0x203   : > { %v1121_v12 = vadd.f32 %v1120_v63, %v2633_v32  ;;  %v1233_v5 = vmax.f32 %v1119_v11, 0.0 }
 0x204   : > { %v1124_v15 = vpop.f32.mrf.mxu1 }
 0x205   : > { %v1234_v19 = vmax.f32 %v1121_v12, 0.0  ;;  %v1281_v21 = vpack.c.bf16 %v1233_v5, %v1231_v20  ;;  %v1125_v24 = vadd.f32 %v1124_v15, %v2637_v42 }
 0x206   : > { %v1126_v4 = vpop.f32.mrf.mxu1 }
 0x207   : > { %v1282_v16 = vpack.c.bf16 %v1234_v19, %v1232_v18  ;;  %v1127_v26 = vadd.f32 %v1126_v4, %v2633_v32  ;;  %v1235_v31 = vmax.f32 %v1125_v24, 0.0 }
 0x208   : > { %v1128_v22 = vpop.f32.mrf.mxu1 }
 0x209   : > { %v1129_v61 = vadd.f32 %v1128_v22, %v2637_v42  ;;  %1522 = vmatprep.mubr.bf16.mxu0 %v1282_v16  ;;  %v1236_v30 = vmax.f32 %v1127_v26, 0.0 }
 0x20a   : > { %v1130_v27 = vpop.f32.mrf.mxu1  ;;  %1523 = vmatmul.mubr.bf16.gmra.mxu0 %v1281_v21 }
 0x20b   : > { %v1131_v17 = vadd.f32 %v1130_v27, %v2633_v32  ;;  %v1237_v0 = vmax.f32 %v1129_v61, 0.0 }
 0x20c   : > { %v1134_v28 = vpop.f32.mrf.mxu1 }
 0x20d   : > { %v1238_v29 = vmax.f32 %v1131_v17, 0.0  ;;  %v1283_v34 = vpack.c.bf16 %v1237_v0, %v1235_v31  ;;  %v1135_v36 = vadd.f32 %v1134_v28, %v2637_v42 }
 0x20e   : > { %v1136_v1 = vpop.f32.mrf.mxu1 }
 0x20f   : > { %v1284_v2 = vpack.c.bf16 %v1238_v29, %v1236_v30  ;;  %v1137_v48 = vadd.f32 %v1136_v1, %v2633_v32  ;;  %v1239_v58 = vmax.f32 %v1135_v36, 0.0 }
 0x210   : > { %v1138_v35 = vpop.f32.mrf.mxu1 }
 0x211   : > { %v1139_v13 = vadd.f32 %v1138_v35, %v2637_v42  ;;  %1530 = vmatprep.mubr.bf16.mxu0 %v1284_v2  ;;  %v1240_v43 = vmax.f32 %v1137_v48, 0.0 }
 0x212   : > { %v1140_v39 = vpop.f32.mrf.mxu1  ;;  %1531 = vmatmul.mubr.bf16.gmra.mxu0 %v1283_v34 }
 0x213   : > { %v1141_v40 = vadd.f32 %v1140_v39, %v2633_v32  ;;  %v1241_v41 = vmax.f32 %v1139_v13, 0.0 }
 0x214   : > { %v1144_v59 = vpop.f32.mrf.mxu1 }
 0x215   : > { %v1242_v44 = vmax.f32 %v1141_v40, 0.0  ;;  %v1285_v3 = vpack.c.bf16 %v1241_v41, %v1239_v58  ;;  %v1145_v25 = vadd.f32 %v1144_v59, %v2637_v42 }
 0x216   : > { %v1146_v60 = vpop.f32.mrf.mxu1 }
 0x217   : > { %v1286_v45 = vpack.c.bf16 %v1242_v44, %v1240_v43  ;;  %v1147_v10 = vadd.f32 %v1146_v60, %v2633_v32  ;;  %v1243_v54 = vmax.f32 %v1145_v25, 0.0 }
 0x218   : > { %v1148_v46 = vpop.f32.mrf.mxu1 }
 0x219   : > { %v1149_v49 = vadd.f32 %v1148_v46, %v2637_v42  ;;  %1538 = vmatprep.mubr.bf16.mxu0 %v1286_v45  ;;  %v1244_v52 = vmax.f32 %v1147_v10, 0.0 }
 0x21a   : > { %v1150_v47 = vpop.f32.mrf.mxu1  ;;  %1539 = vmatmul.mubr.bf16.gmra.mxu0 %v1285_v3 }
 0x21b   : > { %v1151_v50 = vadd.f32 %v1150_v47, %v2633_v32  ;;  %v1245_v33 = vmax.f32 %v1149_v49, 0.0 }
 0x21c   : > { %v1154_v51 = vpop.f32.mrf.mxu1 }
 0x21d   : > { %v1246_v53 = vmax.f32 %v1151_v50, 0.0  ;;  %v1287_v57 = vpack.c.bf16 %v1245_v33, %v1243_v54  ;;  %v1155_v8 = vadd.f32 %v1154_v51, %v2637_v42 }
 0x21e   : > { %v1156_v55 = vpop.f32.mrf.mxu1 }
 0x21f   : > { %v1288_v56 = vpack.c.bf16 %v1246_v53, %v1244_v52  ;;  %v1157_v6 = vadd.f32 %v1156_v55, %v2633_v32  ;;  %v1247_v63 = vmax.f32 %v1155_v8, 0.0 }
 0x220   : > { %v1158_v62 = vpop.f32.mrf.mxu1 }
 0x221   : > { %v1159_v7 = vadd.f32 %v1158_v62, %v2637_v42  ;;  %1546 = vmatprep.mubr.bf16.mxu0 %v1288_v56  ;;  %v1248_v11 = vmax.f32 %v1157_v6, 0.0 }
 0x222   : > { %v1160_v14 = vpop.f32.mrf.mxu1  ;;  %1547 = vmatmul.mubr.bf16.gmra.mxu0 %v1287_v57 }
 0x223   : > { %v1161_v9 = vadd.f32 %v1160_v14, %v2633_v32  ;;  %v1249_v37 = vmax.f32 %v1159_v7, 0.0 }
 0x224   : > { %v1164_v23 = vpop.f32.mrf.mxu1 }
 0x225   : > { %v1250_v38 = vmax.f32 %v1161_v9, 0.0  ;;  %v1289_v15 = vpack.c.bf16 %v1249_v37, %v1247_v63  ;;  %v1165_v4 = vadd.f32 %v1164_v23, %v2637_v42 }
 0x226   : > { %v1166_v12 = vpop.f32.mrf.mxu1 }
 0x227   : > { %v1290_v5 = vpack.c.bf16 %v1250_v38, %v1248_v11  ;;  %v1167_v19 = vadd.f32 %v1166_v12, %v2633_v32  ;;  %v1251_v27 = vmax.f32 %v1165_v4, 0.0 }
 0x228   : > { %v1168_v18 = vpop.f32.mrf.mxu1 }
 0x229   : > { %v1169_v20 = vadd.f32 %v1168_v18, %v2637_v42  ;;  %1554 = vmatprep.mubr.bf16.mxu0 %v1290_v5  ;;  %v1252_v61 = vmax.f32 %v1167_v19, 0.0 }
 0x22a   : > { %v1170_v16 = vpop.f32.mrf.mxu1  ;;  %1555 = vmatmul.mubr.bf16.gmra.mxu0 %v1289_v15 }
 0x22b   : > { %v1171_v21 = vadd.f32 %v1170_v16, %v2633_v32  ;;  %v1253_v22 = vmax.f32 %v1169_v20, 0.0 }
 0x22c   : > { %v1174_v26 = vpop.f32.mrf.mxu1 }
 0x22d   : > { %v1254_v24 = vmax.f32 %v1171_v21, 0.0  ;;  %v1291_v28 = vpack.c.bf16 %v1253_v22, %v1251_v27  ;;  %v1175_v1 = vadd.f32 %v1174_v26, %v2637_v42 }
 0x22e   : > { %v1176_v17 = vpop.f32.mrf.mxu1 }
 0x22f   : > { %v1292_v0 = vpack.c.bf16 %v1254_v24, %v1252_v61  ;;  %v1177_v29 = vadd.f32 %v1176_v17, %v2633_v32  ;;  %v1255_v39 = vmax.f32 %v1175_v1, 0.0 }
 0x230   : > { %v1178_v30 = vpop.f32.mrf.mxu1 }
 0x231   : > { %v1179_v31 = vadd.f32 %v1178_v30, %v2637_v42  ;;  %1562 = vmatprep.mubr.bf16.mxu0 %v1292_v0  ;;  %v1256_v13 = vmax.f32 %v1177_v29, 0.0 }
 0x232   : > { %v1180_v2 = vpop.f32.mrf.mxu1  ;;  %1563 = vmatmul.mubr.bf16.gmra.mxu0 %v1291_v28 }
 0x233   : > { %v1181_v34 = vadd.f32 %v1180_v2, %v2633_v32  ;;  %v1257_v35 = vmax.f32 %v1179_v31, 0.0 }
 0x234   : > { %v1184_v48 = vpop.f32.mrf.mxu1 }
 0x235   : > { %v1258_v36 = vmax.f32 %v1181_v34, 0.0  ;;  %v1293_v59 = vpack.c.bf16 %v1257_v35, %v1255_v39  ;;  %v1185_v60 = vadd.f32 %v1184_v48, %v2637_v42 }
 0x236   : > { %v1186_v40 = vpop.f32.mrf.mxu1 }
 0x237   : > { %v1294_v41 = vpack.c.bf16 %v1258_v36, %v1256_v13  ;;  %v1187_v44 = vadd.f32 %v1186_v40, %v2633_v32  ;;  %v1259_v47 = vmax.f32 %v1185_v60, 0.0 }
 0x238   : > { %v1188_v43 = vpop.f32.mrf.mxu1 }
 0x239   : > { %v1189_v58 = vadd.f32 %v1188_v43, %v2637_v42  ;;  %1570 = vmatprep.mubr.bf16.mxu0 %v1294_v41  ;;  %v1260_v49 = vmax.f32 %v1187_v44, 0.0 }
 0x23a   : > { %v1190_v45 = vpop.f32.mrf.mxu1  ;;  %1571 = vmatmul.mubr.bf16.gmra.mxu0 %v1293_v59 }
 0x23b   : > { %v1191_v3 = vadd.f32 %v1190_v45, %v2633_v32  ;;  %v1261_v46 = vmax.f32 %v1189_v58, 0.0 }
 0x23c   : > { %v1194_v10 = vpop.f32.mrf.mxu1 }
 0x23d   : > { %v1262_v25 = vmax.f32 %v1191_v3, 0.0  ;;  %v1295_v51 = vpack.c.bf16 %v1261_v46, %v1259_v47  ;;  %v1195_v55 = vadd.f32 %v1194_v10, %v2637_v42 }
 0x23e   : > { %v1196_v50 = vpop.f32.mrf.mxu1 }
 0x23f   : > { %v1296_v33 = vpack.c.bf16 %v1262_v25, %v1260_v49  ;;  %v1197_v53 = vadd.f32 %v1196_v50, %v2633_v32  ;;  %v1263_v8 = vmax.f32 %v1195_v55, 0.0 }
 0x240   : > { %v1198_v52 = vpop.f32.mrf.mxu1 }
 0x241   : > { %v1199_v54 = vadd.f32 %v1198_v52, %v2637_v42  ;;  %1578 = vmatprep.mubr.bf16.mxu0 %v1296_v33  ;;  %v1264_v6 = vmax.f32 %v1197_v53, 0.0  ;;  %v2709_v42 = vld [vmem:[%s2834_s6] ss:$0 sm:$0xff] }
 0x242   : > { %v1200_v56 = vpop.f32.mrf.mxu1  ;;  %1579 = vmatmul.mubr.bf16.gmra.mxu0 %v1295_v51 }
 0x243   : > { %v1201_v57 = vadd.f32 %v1200_v56, %v2633_v32  ;;  %v1265_v62 = vmax.f32 %v1199_v54, 0.0 }
 0x245   : > { %v1266_v7 = vmax.f32 %v1201_v57, 0.0  ;;  %v1297_v9 = vpack.c.bf16 %v1265_v62, %v1263_v8 }
 0x247   : > { %v1298_v14 = vpack.c.bf16 %v1266_v7, %v1264_v6 }
 0x249   : > { %1586 = vmatprep.mubr.bf16.mxu0 %v1298_v14 }
 0x24a   : > { %1587 = vmatmul.mubr.bf16.gmra.mxu0 %v1297_v9 }
 0x292   : > { %v1835_v37 = vpop.f32.mrf.mxu0 }
 0x294   : > { %v1836_v23 = vpop.f32.mrf.mxu0 }
 0x295   : > { %v1837_v11 = vadd.f32 %v1836_v23, %v1835_v37 }
 0x296   : > { %v1838_v32 = vpop.f32.mrf.mxu0 }
 0x297   : > { %v1469_v38 = vadd.f32 %v1837_v11, %v2709_v42 }
 0x298   : > { %v1839_v63 = vpop.f32.mrf.mxu0 }
 0x299   : > { %1595 = vst [vmem:[%s2712_s21] sm:$0xff] %v1469_v38  ;;  %v1840_v12 = vadd.f32 %v1839_v63, %v1838_v32 }
 0x29a   : > { %v1841_v5 = vpop.f32.mrf.mxu0 }
 0x29b   : > { %v1472_v15 = vadd.f32 %v1840_v12, %v2709_v42 }
 0x29c   : > { %v1842_v18 = vpop.f32.mrf.mxu0 }
 0x29d   : > { %1596 = vst [vmem:[%s2712_s21 + $0x8] sm:$0xff] %v1472_v15  ;;  %v1843_v19 = vadd.f32 %v1842_v18, %v1841_v5 }
 0x29e   : > { %v1844_v20 = vpop.f32.mrf.mxu0 }
 0x29f   : > { %v1477_v4 = vadd.f32 %v1843_v19, %v2709_v42 }
 0x2a0   : > { %v1845_v16 = vpop.f32.mrf.mxu0 }
 0x2a1   : > { %1597 = vst [vmem:[%s2712_s21 + $0x10] sm:$0xff] %v1477_v4  ;;  %v1846_v21 = vadd.f32 %v1845_v16, %v1844_v20 }
 0x2a2   : > { %v1847_v22 = vpop.f32.mrf.mxu0 }
 0x2a3   : > { %v1480_v26 = vadd.f32 %v1846_v21, %v2709_v42 }
 0x2a4   : > { %v1848_v61 = vpop.f32.mrf.mxu0 }
 0x2a5   : > { %1598 = vst [vmem:[%s2712_s21 + $0x18] sm:$0xff] %v1480_v26  ;;  %v1849_v24 = vadd.f32 %v1848_v61, %v1847_v22 }
 0x2a6   : > { %v1850_v27 = vpop.f32.mrf.mxu0 }
 0x2a7   : > { %v1485_v17 = vadd.f32 %v1849_v24, %v2709_v42 }
 0x2a8   : > { %v1851_v0 = vpop.f32.mrf.mxu0 }
 0x2a9   : > { %1599 = vst [vmem:[%s2712_s21 + $0x20] sm:$0xff] %v1485_v17  ;;  %v1852_v28 = vadd.f32 %v1851_v0, %v1850_v27 }
 0x2aa   : > { %v1853_v30 = vpop.f32.mrf.mxu0 }
 0x2ab   : > { %v1488_v29 = vadd.f32 %v1852_v28, %v2709_v42 }
 0x2ac   : > { %v1854_v31 = vpop.f32.mrf.mxu0 }
 0x2ad   : > { %1600 = vst [vmem:[%s2712_s21 + $0x28] sm:$0xff] %v1488_v29  ;;  %v1855_v1 = vadd.f32 %v1854_v31, %v1853_v30 }
 0x2ae   : > { %v1856_v2 = vpop.f32.mrf.mxu0 }
 0x2af   : > { %v1493_v34 = vadd.f32 %v1855_v1, %v2709_v42 }
 0x2b0   : > { %v1857_v35 = vpop.f32.mrf.mxu0 }
 0x2b1   : > { %1601 = vst [vmem:[%s2712_s21 + $0x30] sm:$0xff] %v1493_v34  ;;  %v1858_v48 = vadd.f32 %v1857_v35, %v1856_v2 }
 0x2b2   : > { %v1859_v13 = vpop.f32.mrf.mxu0 }
 0x2b3   : > { %v1496_v36 = vadd.f32 %v1858_v48, %v2709_v42 }
 0x2b4   : > { %v1860_v39 = vpop.f32.mrf.mxu0 }
 0x2b5   : > { %1602 = vst [vmem:[%s2712_s21 + $0x38] sm:$0xff] %v1496_v36  ;;  %v1861_v40 = vadd.f32 %v1860_v39, %v1859_v13 }
 0x2b6   : > { %v1862_v41 = vpop.f32.mrf.mxu0 }
 0x2b7   : > { %v1501_v59 = vadd.f32 %v1861_v40, %v2709_v42 }
 0x2b8   : > { %v1863_v43 = vpop.f32.mrf.mxu0 }
 0x2b9   : > { %1603 = vst [vmem:[%s2712_s21 + $0x40] sm:$0xff] %v1501_v59  ;;  %v1864_v44 = vadd.f32 %v1863_v43, %v1862_v41 }
 0x2ba   : > { %v1865_v58 = vpop.f32.mrf.mxu0 }
 0x2bb   : > { %v1504_v60 = vadd.f32 %v1864_v44, %v2709_v42 }
 0x2bc   : > { %v1866_v45 = vpop.f32.mrf.mxu0 }
 0x2bd   : > { %1604 = vst [vmem:[%s2712_s21 + $0x48] sm:$0xff] %v1504_v60  ;;  %v1867_v3 = vadd.f32 %v1866_v45, %v1865_v58 }
 0x2be   : > { %v1868_v46 = vpop.f32.mrf.mxu0 }
 0x2bf   : > { %v1509_v10 = vadd.f32 %v1867_v3, %v2709_v42 }
 0x2c0   : > { %v1869_v49 = vpop.f32.mrf.mxu0 }
 0x2c1   : > { %1605 = vst [vmem:[%s2712_s21 + $0x50] sm:$0xff] %v1509_v10  ;;  %v1870_v25 = vadd.f32 %v1869_v49, %v1868_v46 }
 0x2c2   : > { %v1871_v47 = vpop.f32.mrf.mxu0 }
 0x2c3   : > { %v1512_v50 = vadd.f32 %v1870_v25, %v2709_v42 }
 0x2c4   : > { %v1872_v33 = vpop.f32.mrf.mxu0 }
 0x2c5   : > { %1606 = vst [vmem:[%s2712_s21 + $0x58] sm:$0xff] %v1512_v50  ;;  %v1873_v51 = vadd.f32 %v1872_v33, %v1871_v47 }
 0x2c6   : > { %v1874_v52 = vpop.f32.mrf.mxu0 }
 0x2c7   : > { %v1517_v53 = vadd.f32 %v1873_v51, %v2709_v42 }
 0x2c8   : > { %v1875_v54 = vpop.f32.mrf.mxu0 }
 0x2c9   : > { %1607 = vst [vmem:[%s2712_s21 + $0x60] sm:$0xff] %v1517_v53  ;;  %v1876_v55 = vadd.f32 %v1875_v54, %v1874_v52 }
 0x2ca   : > { %v1877_v56 = vpop.f32.mrf.mxu0 }
 0x2cb   : > { %v1520_v57 = vadd.f32 %v1876_v55, %v2709_v42 }
 0x2cc   : > { %v1878_v62 = vpop.f32.mrf.mxu0 }
 0x2cd   : > { %1608 = vst [vmem:[%s2712_s21 + $0x68] sm:$0xff] %v1520_v57  ;;  %v1879_v6 = vadd.f32 %v1878_v62, %v1877_v56 }
 0x2ce   : > { %v1880_v7 = vpop.f32.mrf.mxu0 }
 0x2cf   : > { %v1525_v8 = vadd.f32 %v1879_v6, %v2709_v42 }
 0x2d0   : > { %v1881_v14 = vpop.f32.mrf.mxu0 }
 0x2d1   : > { %1609 = vst [vmem:[%s2712_s21 + $0x70] sm:$0xff] %v1525_v8  ;;  %v1882_v9 = vadd.f32 %v1881_v14, %v1880_v7 }
 0x2d2   : > { %v1883_v37 = vpop.f32.mrf.mxu0 }
 0x2d3   : > { %v1528_v23 = vadd.f32 %v1882_v9, %v2709_v42 }
 0x2d4   : > { %v1884_v11 = vpop.f32.mrf.mxu0 }
 0x2d5   : > { %1610 = vst [vmem:[%s2712_s21 + $0x78] sm:$0xff] %v1528_v23  ;;  %v1885_v32 = vadd.f32 %v1884_v11, %v1883_v37 }
 0x2d6   : > { %v1886_v38 = vpop.f32.mrf.mxu0 }
 0x2d7   : > { %v1533_v63 = vadd.f32 %v1885_v32, %v2709_v42 }
 0x2d8   : > { %v1887_v12 = vpop.f32.mrf.mxu0 }
 0x2d9   : > { %1611 = vst [vmem:[%s2712_s21 + $0x80] sm:$0xff] %v1533_v63  ;;  %v1888_v5 = vadd.f32 %v1887_v12, %v1886_v38 }
 0x2da   : > { %v1889_v15 = vpop.f32.mrf.mxu0 }
 0x2db   : > { %v1536_v18 = vadd.f32 %v1888_v5, %v2709_v42 }
 0x2dc   : > { %v1890_v19 = vpop.f32.mrf.mxu0 }
 0x2dd   : > { %1612 = vst [vmem:[%s2712_s21 + $0x88] sm:$0xff] %v1536_v18  ;;  %v1891_v20 = vadd.f32 %v1890_v19, %v1889_v15 }
 0x2de   : > { %v1892_v4 = vpop.f32.mrf.mxu0 }
 0x2df   : > { %v1541_v16 = vadd.f32 %v1891_v20, %v2709_v42 }
 0x2e0   : > { %v1893_v21 = vpop.f32.mrf.mxu0 }
 0x2e1   : > { %1613 = vst [vmem:[%s2712_s21 + $0x90] sm:$0xff] %v1541_v16  ;;  %v1894_v22 = vadd.f32 %v1893_v21, %v1892_v4 }
 0x2e2   : > { %v1895_v26 = vpop.f32.mrf.mxu0 }
 0x2e3   : > { %v1544_v61 = vadd.f32 %v1894_v22, %v2709_v42 }
 0x2e4   : > { %v1896_v24 = vpop.f32.mrf.mxu0 }
 0x2e5   : > { %1614 = vst [vmem:[%s2712_s21 + $0x98] sm:$0xff] %v1544_v61  ;;  %v1897_v27 = vadd.f32 %v1896_v24, %v1895_v26 }
 0x2e6   : > { %v1898_v17 = vpop.f32.mrf.mxu0 }
 0x2e7   : > { %v1549_v0 = vadd.f32 %v1897_v27, %v2709_v42 }
 0x2e8   : > { %v1899_v28 = vpop.f32.mrf.mxu0 }
 0x2e9   : > { %1615 = vst [vmem:[%s2712_s21 + $0xa0] sm:$0xff] %v1549_v0  ;;  %v1900_v30 = vadd.f32 %v1899_v28, %v1898_v17 }
 0x2ea   : > { %v1901_v29 = vpop.f32.mrf.mxu0 }
 0x2eb   : > { %v1552_v31 = vadd.f32 %v1900_v30, %v2709_v42 }
 0x2ec   : > { %v1902_v1 = vpop.f32.mrf.mxu0 }
 0x2ed   : > { %1616 = vst [vmem:[%s2712_s21 + $0xa8] sm:$0xff] %v1552_v31  ;;  %v1903_v2 = vadd.f32 %v1902_v1, %v1901_v29 }
 0x2ee   : > { %v1904_v34 = vpop.f32.mrf.mxu0 }
 0x2ef   : > { %v1557_v35 = vadd.f32 %v1903_v2, %v2709_v42 }
 0x2f0   : > { %v1905_v48 = vpop.f32.mrf.mxu0 }
 0x2f1   : > { %1617 = vst [vmem:[%s2712_s21 + $0xb0] sm:$0xff] %v1557_v35  ;;  %v1906_v13 = vadd.f32 %v1905_v48, %v1904_v34 }
 0x2f2   : > { %v1907_v36 = vpop.f32.mrf.mxu0 }
 0x2f3   : > { %v1560_v39 = vadd.f32 %v1906_v13, %v2709_v42 }
 0x2f4   : > { %v1908_v40 = vpop.f32.mrf.mxu0 }
 0x2f5   : > { %1618 = vst [vmem:[%s2712_s21 + $0xb8] sm:$0xff] %v1560_v39  ;;  %v1909_v41 = vadd.f32 %v1908_v40, %v1907_v36 }
 0x2f6   : > { %v1910_v59 = vpop.f32.mrf.mxu0 }
 0x2f7   : > { %v1565_v43 = vadd.f32 %v1909_v41, %v2709_v42 }
 0x2f8   : > { %v1911_v44 = vpop.f32.mrf.mxu0 }
 0x2f9   : > { %1619 = vst [vmem:[%s2712_s21 + $0xc0] sm:$0xff] %v1565_v43  ;;  %v1912_v58 = vadd.f32 %v1911_v44, %v1910_v59 }
 0x2fa   : > { %v1913_v60 = vpop.f32.mrf.mxu0 }
 0x2fb   : > { %v1568_v45 = vadd.f32 %v1912_v58, %v2709_v42 }
 0x2fc   : > { %v1914_v3 = vpop.f32.mrf.mxu0 }
 0x2fd   : > { %1620 = vst [vmem:[%s2712_s21 + $0xc8] sm:$0xff] %v1568_v45  ;;  %v1915_v46 = vadd.f32 %v1914_v3, %v1913_v60 }
 0x2fe   : > { %v1916_v10 = vpop.f32.mrf.mxu0 }
 0x2ff   : > { %v1573_v49 = vadd.f32 %v1915_v46, %v2709_v42 }
 0x300   : > { %v1917_v25 = vpop.f32.mrf.mxu0 }
 0x301   : > { %1621 = vst [vmem:[%s2712_s21 + $0xd0] sm:$0xff] %v1573_v49  ;;  %v1918_v47 = vadd.f32 %v1917_v25, %v1916_v10 }
 0x302   : > { %v1919_v50 = vpop.f32.mrf.mxu0 }
 0x303   : > { %v1576_v33 = vadd.f32 %v1918_v47, %v2709_v42 }
 0x304   : > { %v1920_v51 = vpop.f32.mrf.mxu0 }
 0x305   : > { %1622 = vst [vmem:[%s2712_s21 + $0xd8] sm:$0xff] %v1576_v33  ;;  %v1921_v52 = vadd.f32 %v1920_v51, %v1919_v50 }
 0x306   : > { %v1922_v53 = vpop.f32.mrf.mxu0 }
 0x307   : > { %v1581_v54 = vadd.f32 %v1921_v52, %v2709_v42 }
 0x308   : > { %v1923_v55 = vpop.f32.mrf.mxu0 }
 0x309   : > { %1623 = vst [vmem:[%s2712_s21 + $0xe0] sm:$0xff] %v1581_v54  ;;  %v1924_v56 = vadd.f32 %v1923_v55, %v1922_v53 }
 0x30a   : > { %v1925_v57 = vpop.f32.mrf.mxu0 }
 0x30b   : > { %v1584_v62 = vadd.f32 %v1924_v56, %v2709_v42 }
 0x30c   : > { %v1926_v6 = vpop.f32.mrf.mxu0 }
 0x30d   : > { %1624 = vst [vmem:[%s2712_s21 + $0xe8] sm:$0xff] %v1584_v62  ;;  %v1927_v7 = vadd.f32 %v1926_v6, %v1925_v57 }
 0x30e   : > { %v1928_v8 = vpop.f32.mrf.mxu0 }
 0x30f   : > { %v1589_v14 = vadd.f32 %v1927_v7, %v2709_v42 }
 0x310   : > { %v1929_v9 = vpop.f32.mrf.mxu0 }
 0x311   : > { %1625 = vst [vmem:[%s2712_s21 + $0xf0] sm:$0xff] %v1589_v14  ;;  %v1930_v37 = vadd.f32 %v1929_v9, %v1928_v8 }
 0x313   : > { %v1592_v23 = vadd.f32 %v1930_v37, %v2709_v42 }
 0x315   : > { %1626 = vst [vmem:[%s2712_s21 + $0xf8] sm:$0xff] %v1592_v23 }
 0x316   : > { %2125 = shalt.err (!%p2122_p0)
}
 0x317   : > { %s2126_s8 = scalar_lea.hbm %s2780_s13, 4096  ;;  %s2130_s20 = scalar_lea.hbm %s2835_s7, 8192 }
 0x318   : > { %p2127_p1 = scmp.ne.s32.totalorder %s2780_s13, %s2126_s8  ;;  %p2131_p4 = scmp.lt.s32.totalorder %s2780_s13, %s2835_s7 }
 0x319   : > { %p2132_p7 = scmp.lt.s32.totalorder %s2130_s20, %s2126_s8 }
 0x31a   : > { %p2128_p2 = pnand %p2127_p1, %p2263_p5 }
 0x31b   : > { %p2133_p6 = por %p2132_p7, %p2131_p4 }
 0x31c   : > { %p2129_p3 = pneg %p2128_p2 }
 0x31e   : > { %p2134_p8 = pnand %p2133_p6, %p2129_p3 }
 0x320   : > { %2137 = shalt.err (!%p2134_p8)
}
 0x321   : > { %s2183_s29 = smov 128   ;;  %s2184_s9 = smov 8  }
 0x322   : > { %1943 = dma.vmem_to_hbm [thread:$0]  (%p2263_p5), %s2782_s23, 4096, %s2780_s13, %s2788_s14, %s2183_s29, %s2183_s29, %s2184_s9  }
 0x323 PF: > { %p1955_p9 = scmp.ge.s32.totalorder %s2176_s27, 2  ;;  %s1656_s28 = sand.u32 1, %s2164_s24  }
 0x324   : > { %p2839_p10 = scmp.ne.s32.totalorder %s2837_s12, 0  ;;  %s1657_s15 = scalar_lea.sflag [#allocation4], %s1656_s28 }
 0x326   : > { %p1950_p11 = pnand %p1955_p9, %p2839_p10 }
 0x328   : > { %p1951_p12 = pneg %p1950_p11 }
 0x32a   : > { %2159 = dma.done.wait (%p1951_p12), %s1657_s15, 4096  }
 0x32b   : > { %2161 = vsyncadd (%p1951_p12), %s1657_s15, 4294963200  ;;  %p18_p13 = scmp.ge.s32.totalorder %s2250_s30, 4   ;;  %s2840_s24 = smov %s2168_s25 }
 0x32c   : > { %s2841_s25 = smov %s2172_s26  ;;  %s2842_s26 = smov %s2261_s10 }
 0x32d   : > { %s2843_s27 = smov %s2250_s30  ;;  %20 = sbr.rel (!%p18_p13) target bundleno = 4 (0x4), region = 88 }
 0x332   :  { %1662 = vsyncpa [#allocation3], 1 }
 0x333   :  { %1664 = vsyncpa [#allocation3 + $0x1], 1 }
 0x334   :  { %1665 = vsyncpa [#allocation4], 1 }
 0x335   :  { %1667 = vsyncpa [#allocation4 + $0x1], 1 }

</bundles_post_ra>
